<compile_context>
chip_gen: v6e
topology: v6e:2x2x1
jax: 0.10.0
libtpu: 0.0.40
codegen_flags: <defaults>
</compile_context>

<pallas_src>
import functools

import jax
import jax.numpy as jnp
from jax import lax
from jax.experimental import pallas as pl
from jax.experimental.pallas import tpu as pltpu

EPS = 1e-5  # nn.BatchNorm2d default eps


# ----------------------------------------------------- per-generation tuning
def _hw_config():
    cfg = dict(vmem_limit=48 * 1024 * 1024, row_target=512,
               single_buffer_weights=False)
    try:
        info = pltpu.get_tpu_info()
        vmem = int(getattr(info, "vmem_capacity_bytes"))
        if vmem >= 96 * 1024 * 1024:          # v5e / v6e class (128 MiB VMEM)
            cfg.update(vmem_limit=100 * 1024 * 1024, row_target=1024,
                       single_buffer_weights=False)
        else:                                  # v7x class (64 MiB per TC)
            cfg.update(vmem_limit=48 * 1024 * 1024, row_target=512,
                       single_buffer_weights=True)
    except Exception:
        pass                                   # conservative defaults
    return cfg


_CFG = _hw_config()


def _cparams(n_grid_axes=0):
    if n_grid_axes:
        return pltpu.CompilerParams(
            dimension_semantics=("parallel",) * n_grid_axes,
            vmem_limit_bytes=_CFG["vmem_limit"])
    return pltpu.CompilerParams(vmem_limit_bytes=_CFG["vmem_limit"])


def _vmem_spec():
    return pl.BlockSpec(memory_space=pltpu.MemorySpace.VMEM)


def _divisor_tile(ho, wo, target_rows, n_batch):
    """Largest divisor th of ho with th*wo <= target_rows; keep grid >= 2."""
    th = 1
    for d in range(1, ho + 1):
        if ho % d == 0 and d * wo <= target_rows:
            th = d
    while th > 1 and n_batch * (ho // th) < 2:   # megacore: >= 2 grid steps
        nxt = 1
        for d in range(1, th):
            if ho % d == 0:
                nxt = d
        th = nxt
    return th


def _weight_spec(cin, cout):
    # Resident weights (constant block index).  On v7x (tight VMEM) a single
    # buffer is enough since the block never changes.
    if _CFG["single_buffer_weights"] and hasattr(pl, "Buffered"):
        return pl.BlockSpec((9, cin, cout), lambda n, i: (0, 0, 0),
                            pipeline_mode=pl.Buffered(1))
    return pl.BlockSpec((9, cin, cout), lambda n, i: (0, 0, 0))


# ---------------------------------------------------------------- kernels ---
def _make_conv3x3_kernel(*, stride, th, wo, cout, merge_rows, mode):
    """3x3 conv (pad 1) as 9 shifted matmuls, f32 accumulation.

    mode == "bias": conv + bias + swish (conv1).
    mode == "bn":   conv only + per-tile BN partial statistics (pass 1).
    """

    def kernel(x_ref, w_ref, *rest):
        r0 = pl.program_id(1) * th
        cin = x_ref.shape[-1]
        acc = None
        for kh in range(3):
            for kw in range(3):
                if stride == 1:
                    if merge_rows:
                        xs = x_ref[pl.ds(r0 + kh, th), pl.ds(kw, wo), :]
                        xs = xs.reshape(th * wo, cin)
                    else:
                        xs = x_ref[r0 + kh, pl.ds(kw, wo), :]
                else:
                    par = (kh % 2) * 2 + (kw % 2)
                    if merge_rows:
                        xs = x_ref[par, pl.ds(r0 + kh // 2, th),
                                   pl.ds(kw // 2, wo), :]
                        xs = xs.reshape(th * wo, cin)
                    else:
                        xs = x_ref[par, r0 + kh // 2, pl.ds(kw // 2, wo), :]
                part = jnp.dot(xs, w_ref[kh * 3 + kw],
                               preferred_element_type=jnp.float32)
                acc = part if acc is None else acc + part

        if mode == "bias":
            b_ref, o_ref = rest
            y = acc + b_ref[...].astype(jnp.float32)
            sig = jax.nn.sigmoid(y.astype(jnp.bfloat16)).astype(jnp.float32)
            y = y * sig
            if merge_rows:
                o_ref[...] = y.reshape(th, wo, cout).astype(o_ref.dtype)
            else:
                o_ref[0] = y.astype(o_ref.dtype)
        else:  # "bn": bias is skipped (cancelled by the mean subtraction)
            y_ref, stats_ref = rest
            if merge_rows:
                y_ref[...] = acc.reshape(th, wo, cout).astype(y_ref.dtype)
            else:
                y_ref[0] = acc.astype(y_ref.dtype)
            s = jnp.sum(acc, axis=0, keepdims=True)          # (1, Cout)
            ss = jnp.sum(acc * acc, axis=0, keepdims=True)   # (1, Cout)
            row = lax.broadcasted_iota(jnp.int32, stats_ref.shape, 0)
            stats_ref[...] = jnp.where(row == 0, s, jnp.where(row == 1, ss, 0.0))

    return kernel


def _make_bn_swish_kernel(emit_colsum):
    """Pass 2 of a BN layer: y*scale + shift, swish, optional column-sum."""

    def kernel(y_ref, scale_ref, shift_ref, *out_refs):
        y = y_ref[...].astype(jnp.float32) * scale_ref[...] + shift_ref[...]
        sig = jax.nn.sigmoid(y.astype(jnp.bfloat16)).astype(jnp.float32)
        z = y * sig
        o_ref = out_refs[0]
        o_ref[...] = z.astype(o_ref.dtype)
        if emit_colsum:
            sum_ref = out_refs[1]
            s = jnp.sum(jnp.sum(z, axis=0), axis=0, keepdims=True)  # (1, Cout)
            row = lax.broadcasted_iota(jnp.int32, sum_ref.shape, 0)
            sum_ref[...] = jnp.where(row == 0, s, 0.0)

    return kernel


def _head_kernel(xs_ref, w_ref, b_ref, o_ref, *, inv_pos):
    # conv9 (1x1, pad=1) + global avg-pool + sigmoid + BCE vs ones.
    # With zero padding the pooled mean is exactly (sum_hw x)@w/P_out + b.
    pooled = jnp.dot(xs_ref[...], w_ref[...],
                     preferred_element_type=jnp.float32)          # (N, 1)
    pooled = pooled * inv_pos + b_ref[...]
    # -log(sigmoid(p)) = softplus(-p); torch BCELoss clamps log at -100.
    sp = jnp.maximum(-pooled, 0.0) + jnp.log(1.0 + jnp.exp(-jnp.abs(pooled)))
    per = jnp.minimum(sp, 100.0)
    o_ref[...] = jnp.mean(per, keepdims=True).astype(o_ref.dtype)


# ------------------------------------------------------------- layer calls --
def _conv_inputs(x, stride):
    """Padded (and parity-decimated for stride 2) conv input + its BlockSpec."""
    n, hi, wi, cin = x.shape
    ho = (hi + 2 - 3) // stride + 1
    wo = (wi + 2 - 3) // stride + 1
    xp = jnp.pad(x, ((0, 0), (1, 1), (1, 1), (0, 0)))
    if stride == 1:
        spec = pl.BlockSpec((None, hi + 2, wi + 2, cin),
                            lambda n_, i: (n_, 0, 0, 0))
        return xp, spec, ho, wo
    # stride 2: split padded image into 4 (row-parity, col-parity) arrays so
    # every in-kernel slice is contiguous (no strided VMEM access).
    hd, wd = ho + 1, wo + 1
    parts = []
    for p in range(2):
        for q in range(2):
            sub = xp[:, p::2, q::2, :][:, :hd, :wd, :]
            pad_h = hd - sub.shape[1]
            pad_w = wd - sub.shape[2]
            if pad_h or pad_w:
                sub = jnp.pad(sub, ((0, 0), (0, pad_h), (0, pad_w), (0, 0)))
            parts.append(sub)
    x_in = jnp.stack(parts, axis=1)                 # (N, 4, hd, wd, Cin)
    spec = pl.BlockSpec((None, 4, hd, wd, cin),
                        lambda n_, i: (n_, 0, 0, 0, 0))
    return x_in, spec, ho, wo


def _conv_pass1(x, w, stride, *, bias=None):
    """3x3 conv (pad 1).  bias given => conv+bias+swish (conv1); else conv
    only + per-tile BN statistics (pass 1 of a BN layer)."""
    n = x.shape[0]
    cin = x.shape[-1]
    cout = w.shape[-1]
    x_in, x_spec, ho, wo = _conv_inputs(x, stride)

    # Merge H rows into the matmul M dim only when the in-kernel reshape is
    # sublane-tile aligned (bf16 tile = 16 rows); otherwise one output row per
    # grid step (still no im2col, just smaller matmuls for tiny spatial dims).
    merge_rows = (wo % 16 == 0)
    row_target = _CFG["row_target"] * (2 if cout <= 128 else 1)
    th = _divisor_tile(ho, wo, row_target, n) if merge_rows else 1
    n_h = ho // th

    w9 = w.reshape(9, cin, cout).astype(jnp.bfloat16)
    mode = "bias" if bias is not None else "bn"
    kernel = _make_conv3x3_kernel(stride=stride, th=th, wo=wo, cout=cout,
                                  merge_rows=merge_rows, mode=mode)

    y_spec = pl.BlockSpec((None, th, wo, cout), lambda n_, i: (n_, i, 0, 0))
    in_specs = [x_spec, _weight_spec(cin, cout)]
    args = [x_in, w9]
    if mode == "bias":
        in_specs.append(pl.BlockSpec((1, cout), lambda n_, i: (0, 0)))
        args.append(bias.astype(jnp.float32))
        out_shape = jax.ShapeDtypeStruct((n, ho, wo, cout), jnp.bfloat16)
        out_specs = y_spec
    else:
        out_shape = (jax.ShapeDtypeStruct((n, ho, wo, cout), jnp.bfloat16),
                     jax.ShapeDtypeStruct((n, n_h, 8, cout), jnp.float32))
        out_specs = (y_spec,
                     pl.BlockSpec((None, None, 8, cout),
                                  lambda n_, i: (n_, i, 0, 0)))

    return pl.pallas_call(
        kernel,
        out_shape=out_shape,
        grid=(n, n_h),
        in_specs=in_specs,
        out_specs=out_specs,
        compiler_params=_cparams(2),
    )(*args)


def _bn_swish(y, scale, shift, *, emit_colsum):
    n, ho, wo, cout = y.shape
    th = _divisor_tile(ho, wo, _CFG["row_target"] * 2, n)
    n_h = ho // th
    kernel = _make_bn_swish_kernel(emit_colsum)

    y_spec = pl.BlockSpec((None, th, wo, cout), lambda n_, i: (n_, i, 0, 0))
    vec_spec = pl.BlockSpec((1, cout), lambda n_, i: (0, 0))
    out_shapes = [jax.ShapeDtypeStruct((n, ho, wo, cout), jnp.bfloat16)]
    out_specs = [y_spec]
    if emit_colsum:
        out_shapes.append(jax.ShapeDtypeStruct((n, n_h, 8, cout), jnp.float32))
        out_specs.append(pl.BlockSpec((None, None, 8, cout),
                                      lambda n_, i: (n_, i, 0, 0)))

    res = pl.pallas_call(
        kernel,
        out_shape=tuple(out_shapes) if emit_colsum else out_shapes[0],
        grid=(n, n_h),
        in_specs=[y_spec, vec_spec, vec_spec],
        out_specs=tuple(out_specs) if emit_colsum else out_specs[0],
        compiler_params=_cparams(2),
    )(y, scale, shift)

    if emit_colsum:
        out, partial = res
        colsum = jnp.sum(partial[:, :, 0, :], axis=1)        # (N, Cout) f32
        return out, colsum
    return res, None


def conv_bias_swish_layer(x, p):
    return _conv_pass1(x, p["w"], p["stride"], bias=p["b"])


def conv_bn_swish_layer(x, p, *, emit_colsum=False):
    cout = p["w"].shape[-1]
    y, stats = _conv_pass1(x, p["w"], p["stride"])
    # Tiny cross-tile reduction + BN scale/shift on (Cout,)-sized arrays (XLA).
    tot = jnp.sum(stats, axis=(0, 1))                         # (8, Cout)
    m_count = y.shape[0] * y.shape[1] * y.shape[2]
    mean = tot[0] / m_count
    var = jnp.maximum(tot[1] / m_count - mean * mean, 0.0)    # biased (training)
    inv = lax.rsqrt(var + EPS)
    g = p["gamma"].reshape(-1)
    scale = (g * inv).reshape(1, cout).astype(jnp.float32)
    shift = (p["beta"].reshape(-1) - mean * g * inv).reshape(1, cout)
    shift = shift.astype(jnp.float32)
    return _bn_swish(y, scale, shift, emit_colsum=emit_colsum)


# ------------------------------------------------------------------- model --
# (cin, cout, stride, use_bn) — cin=None means "input channels"
LAYER_CFG = [
    (None, 64, 1, False),    # conv1
    (64,   64, 2, True),     # conv2 + bn2
    (64,  128, 1, True),     # conv3 + bn3
    (128, 128, 2, True),     # conv4 + bn4
    (128, 256, 1, True),     # conv5 + bn5
    (256, 256, 2, True),     # conv6 + bn6
    (256, 512, 1, True),     # conv7 + bn7
    (512, 512, 2, True),     # conv8 + bn8
]


def init_params(key, channels):
    params = []
    for (cin, cout, stride, bn) in LAYER_CFG:
        cin = channels if cin is None else cin
        key, k1, k2 = jax.random.split(key, 3)
        params.append(dict(
            w=jax.random.normal(k1, (3, 3, cin, cout), jnp.float32) * 0.05,
            b=jax.random.normal(k2, (1, cout), jnp.float32) * 0.01,
            gamma=jnp.ones((1, cout), jnp.float32),
            beta=jnp.zeros((1, cout), jnp.float32),
            stride=stride, bn=bn))
    key, k1, k2 = jax.random.split(key, 3)
    w9 = jax.random.normal(k1, (1, 1, 512, 1), jnp.float32) * 0.05
    b9 = jax.random.normal(k2, (1, 1), jnp.float32) * 0.01
    return params, (w9, b9)


def adversarial_loss(params, head_params, x_nchw, y_nchw=None):
    # Inference branch only: loss = BCE(model(x), ones).  BatchNorm uses
    # training-mode batch statistics (fresh module, no running stats), as in
    # the reference module's default training state.
    del y_nchw
    x = jnp.transpose(x_nchw, (0, 2, 3, 1)).astype(jnp.bfloat16)   # NCHW->NHWC

    xs_head = None
    for li, p in enumerate(params):
        last = (li == len(params) - 1)
        if p["bn"]:
            x, colsum = conv_bn_swish_layer(x, p, emit_colsum=last)
            if last:
                xs_head = colsum                       # fused spatial sum
        else:
            x = conv_bias_swish_layer(x, p)
    if xs_head is None:                                # fallback (not hit here)
        xs_head = jnp.sum(x.astype(jnp.float32), axis=(1, 2))

    # Head: conv9 (1x1, pad=1) + avg-pool over the full (H+2)x(W+2) output +
    # sigmoid + BCE(target=1), collapsed onto the spatially-summed features.
    n, h8, w8, _ = x.shape
    p_out = (h8 + 2) * (w8 + 2)
    w9, b9 = head_params
    loss = pl.pallas_call(
        functools.partial(_head_kernel, inv_pos=1.0 / p_out),
        out_shape=jax.ShapeDtypeStruct((1, 1), jnp.float32),
        in_specs=[_vmem_spec()] * 3,
        out_specs=_vmem_spec(),
        compiler_params=_cparams(0),
    )(xs_head, w9.reshape(-1, 1).astype(jnp.float32), b9.astype(jnp.float32))
    return loss[0, 0]


if __name__ == "__main__":
    key = jax.random.PRNGKey(0)
    kp, kx, ky = jax.random.split(key, 3)
    channels = 4
    params, head = init_params(kp, channels)
    x = jax.random.normal(kx, (2, channels, 16, 16), jnp.float32)
    y = jax.random.normal(ky, (2, channels, 16, 16), jnp.float32)

    loss = adversarial_loss(params, head, x, y)
    jax.block_until_ready(loss)
    print("KERNEL_OK")
</pallas_src>

<mosaic_0001>
module attributes {stable_mosaic.version = 11 : i64} {
  func.func @kernel(%arg0: i32, %arg1: i32, %arg2: memref<1x18x18x4xbf16, #tpu.memory_space<vmem>>, %arg3: memref<9x4x64xbf16, #tpu.memory_space<vmem>>, %arg4: memref<1x64xf32, #tpu.memory_space<vmem>>, %arg5: memref<1x16x16x64xbf16, #tpu.memory_space<vmem>>) attributes {dimension_semantics = [#tpu.dimension_semantics<parallel>, #tpu.dimension_semantics<parallel>], iteration_bounds = array<i64: 2, 1>, scalar_prefetch = 0 : i64, scratch_operands = 0 : i64, tpu.core_type = #tpu.core_type<tc>, window_params = [{transform_indices = @transform_0, window_bounds = array<i64: 1, 18, 18, 4>}, {pipeline_mode = #tpu.pipeline_mode<synchronous>, transform_indices = @transform_1, window_bounds = array<i64: 9, 4, 64>}, {pipeline_mode = #tpu.pipeline_mode<synchronous>, transform_indices = @transform_2, window_bounds = array<i64: 1, 64>}, {transform_indices = @transform_3, window_bounds = array<i64: 1, 16, 16, 64>}]} {
    %c16_i32 = arith.constant 16 : i32
    %0 = arith.muli %arg1, %c16_i32 : i32
    %c0_i32 = arith.constant 0 : i32
    %1 = arith.addi %0, %c0_i32 : i32
    %c0 = arith.constant 0 : index
    %2 = arith.index_cast %1 : i32 to index
    %c0_0 = arith.constant 0 : index
    %c0_1 = arith.constant 0 : index
    %3 = vector.load %arg2[%c0, %2, %c0_0, %c0_1] : memref<1x18x18x4xbf16, #tpu.memory_space<vmem>>, vector<1x16x16x4xbf16>
    %4 = vector.shape_cast %3 : vector<1x16x16x4xbf16> to vector<16x16x4xbf16>
    %5 = vector.shape_cast %4 : vector<16x16x4xbf16> to vector<256x4xbf16>
    %c0_2 = arith.constant 0 : index
    %c0_3 = arith.constant 0 : index
    %c0_4 = arith.constant 0 : index
    %6 = vector.load %arg3[%c0_2, %c0_3, %c0_4] : memref<9x4x64xbf16, #tpu.memory_space<vmem>>, vector<1x4x64xbf16>
    %7 = vector.shape_cast %6 : vector<1x4x64xbf16> to vector<4x64xbf16>
    %cst = arith.constant dense<0.000000e+00> : vector<256x64xf32>
    %8 = tpu.matmul %5, %7, %cst {dimension_numbers = #tpu.dot_dimension_numbers<[1], [0], [0], [1], [0, 0, 1, 1], [], []>} : vector<256x4xbf16>, vector<4x64xbf16>, vector<256x64xf32> -> vector<256x64xf32>
    %c0_i32_5 = arith.constant 0 : i32
    %9 = arith.addi %0, %c0_i32_5 : i32
    %c0_6 = arith.constant 0 : index
    %10 = arith.index_cast %9 : i32 to index
    %c1 = arith.constant 1 : index
    %c0_7 = arith.constant 0 : index
    %11 = vector.load %arg2[%c0_6, %10, %c1, %c0_7] : memref<1x18x18x4xbf16, #tpu.memory_space<vmem>>, vector<1x16x16x4xbf16>
    %12 = vector.shape_cast %11 : vector<1x16x16x4xbf16> to vector<16x16x4xbf16>
    %13 = vector.shape_cast %12 : vector<16x16x4xbf16> to vector<256x4xbf16>
    %c1_8 = arith.constant 1 : index
    %c0_9 = arith.constant 0 : index
    %c0_10 = arith.constant 0 : index
    %14 = vector.load %arg3[%c1_8, %c0_9, %c0_10] : memref<9x4x64xbf16, #tpu.memory_space<vmem>>, vector<1x4x64xbf16>
    %15 = vector.shape_cast %14 : vector<1x4x64xbf16> to vector<4x64xbf16>
    %cst_11 = arith.constant dense<0.000000e+00> : vector<256x64xf32>
    %16 = tpu.matmul %13, %15, %cst_11 {dimension_numbers = #tpu.dot_dimension_numbers<[1], [0], [0], [1], [0, 0, 1, 1], [], []>} : vector<256x4xbf16>, vector<4x64xbf16>, vector<256x64xf32> -> vector<256x64xf32>
    %17 = arith.addf %8, %16 : vector<256x64xf32>
    %c0_i32_12 = arith.constant 0 : i32
    %18 = arith.addi %0, %c0_i32_12 : i32
    %c0_13 = arith.constant 0 : index
    %19 = arith.index_cast %18 : i32 to index
    %c2 = arith.constant 2 : index
    %c0_14 = arith.constant 0 : index
    %20 = vector.load %arg2[%c0_13, %19, %c2, %c0_14] : memref<1x18x18x4xbf16, #tpu.memory_space<vmem>>, vector<1x16x16x4xbf16>
    %21 = vector.shape_cast %20 : vector<1x16x16x4xbf16> to vector<16x16x4xbf16>
    %22 = vector.shape_cast %21 : vector<16x16x4xbf16> to vector<256x4xbf16>
    %c2_15 = arith.constant 2 : index
    %c0_16 = arith.constant 0 : index
    %c0_17 = arith.constant 0 : index
    %23 = vector.load %arg3[%c2_15, %c0_16, %c0_17] : memref<9x4x64xbf16, #tpu.memory_space<vmem>>, vector<1x4x64xbf16>
    %24 = vector.shape_cast %23 : vector<1x4x64xbf16> to vector<4x64xbf16>
    %cst_18 = arith.constant dense<0.000000e+00> : vector<256x64xf32>
    %25 = tpu.matmul %22, %24, %cst_18 {dimension_numbers = #tpu.dot_dimension_numbers<[1], [0], [0], [1], [0, 0, 1, 1], [], []>} : vector<256x4xbf16>, vector<4x64xbf16>, vector<256x64xf32> -> vector<256x64xf32>
    %26 = arith.addf %17, %25 : vector<256x64xf32>
    %c1_i32 = arith.constant 1 : i32
    %27 = arith.addi %0, %c1_i32 : i32
    %c0_19 = arith.constant 0 : index
    %28 = arith.index_cast %27 : i32 to index
    %c0_20 = arith.constant 0 : index
    %c0_21 = arith.constant 0 : index
    %29 = vector.load %arg2[%c0_19, %28, %c0_20, %c0_21] : memref<1x18x18x4xbf16, #tpu.memory_space<vmem>>, vector<1x16x16x4xbf16>
    %30 = vector.shape_cast %29 : vector<1x16x16x4xbf16> to vector<16x16x4xbf16>
    %31 = vector.shape_cast %30 : vector<16x16x4xbf16> to vector<256x4xbf16>
    %c3 = arith.constant 3 : index
    %c0_22 = arith.constant 0 : index
    %c0_23 = arith.constant 0 : index
    %32 = vector.load %arg3[%c3, %c0_22, %c0_23] : memref<9x4x64xbf16, #tpu.memory_space<vmem>>, vector<1x4x64xbf16>
    %33 = vector.shape_cast %32 : vector<1x4x64xbf16> to vector<4x64xbf16>
    %cst_24 = arith.constant dense<0.000000e+00> : vector<256x64xf32>
    %34 = tpu.matmul %31, %33, %cst_24 {dimension_numbers = #tpu.dot_dimension_numbers<[1], [0], [0], [1], [0, 0, 1, 1], [], []>} : vector<256x4xbf16>, vector<4x64xbf16>, vector<256x64xf32> -> vector<256x64xf32>
    %35 = arith.addf %26, %34 : vector<256x64xf32>
    %c1_i32_25 = arith.constant 1 : i32
    %36 = arith.addi %0, %c1_i32_25 : i32
    %c0_26 = arith.constant 0 : index
    %37 = arith.index_cast %36 : i32 to index
    %c1_27 = arith.constant 1 : index
    %c0_28 = arith.constant 0 : index
    %38 = vector.load %arg2[%c0_26, %37, %c1_27, %c0_28] : memref<1x18x18x4xbf16, #tpu.memory_space<vmem>>, vector<1x16x16x4xbf16>
    %39 = vector.shape_cast %38 : vector<1x16x16x4xbf16> to vector<16x16x4xbf16>
    %40 = vector.shape_cast %39 : vector<16x16x4xbf16> to vector<256x4xbf16>
    %c4 = arith.constant 4 : index
    %c0_29 = arith.constant 0 : index
    %c0_30 = arith.constant 0 : index
    %41 = vector.load %arg3[%c4, %c0_29, %c0_30] : memref<9x4x64xbf16, #tpu.memory_space<vmem>>, vector<1x4x64xbf16>
    %42 = vector.shape_cast %41 : vector<1x4x64xbf16> to vector<4x64xbf16>
    %cst_31 = arith.constant dense<0.000000e+00> : vector<256x64xf32>
    %43 = tpu.matmul %40, %42, %cst_31 {dimension_numbers = #tpu.dot_dimension_numbers<[1], [0], [0], [1], [0, 0, 1, 1], [], []>} : vector<256x4xbf16>, vector<4x64xbf16>, vector<256x64xf32> -> vector<256x64xf32>
    %44 = arith.addf %35, %43 : vector<256x64xf32>
    %c1_i32_32 = arith.constant 1 : i32
    %45 = arith.addi %0, %c1_i32_32 : i32
    %c0_33 = arith.constant 0 : index
    %46 = arith.index_cast %45 : i32 to index
    %c2_34 = arith.constant 2 : index
    %c0_35 = arith.constant 0 : index
    %47 = vector.load %arg2[%c0_33, %46, %c2_34, %c0_35] : memref<1x18x18x4xbf16, #tpu.memory_space<vmem>>, vector<1x16x16x4xbf16>
    %48 = vector.shape_cast %47 : vector<1x16x16x4xbf16> to vector<16x16x4xbf16>
    %49 = vector.shape_cast %48 : vector<16x16x4xbf16> to vector<256x4xbf16>
    %c5 = arith.constant 5 : index
    %c0_36 = arith.constant 0 : index
    %c0_37 = arith.constant 0 : index
    %50 = vector.load %arg3[%c5, %c0_36, %c0_37] : memref<9x4x64xbf16, #tpu.memory_space<vmem>>, vector<1x4x64xbf16>
    %51 = vector.shape_cast %50 : vector<1x4x64xbf16> to vector<4x64xbf16>
    %cst_38 = arith.constant dense<0.000000e+00> : vector<256x64xf32>
    %52 = tpu.matmul %49, %51, %cst_38 {dimension_numbers = #tpu.dot_dimension_numbers<[1], [0], [0], [1], [0, 0, 1, 1], [], []>} : vector<256x4xbf16>, vector<4x64xbf16>, vector<256x64xf32> -> vector<256x64xf32>
    %53 = arith.addf %44, %52 : vector<256x64xf32>
    %c2_i32 = arith.constant 2 : i32
    %54 = arith.addi %0, %c2_i32 : i32
    %c0_39 = arith.constant 0 : index
    %55 = arith.index_cast %54 : i32 to index
    %c0_40 = arith.constant 0 : index
    %c0_41 = arith.constant 0 : index
    %56 = vector.load %arg2[%c0_39, %55, %c0_40, %c0_41] : memref<1x18x18x4xbf16, #tpu.memory_space<vmem>>, vector<1x16x16x4xbf16>
    %57 = vector.shape_cast %56 : vector<1x16x16x4xbf16> to vector<16x16x4xbf16>
    %58 = vector.shape_cast %57 : vector<16x16x4xbf16> to vector<256x4xbf16>
    %c6 = arith.constant 6 : index
    %c0_42 = arith.constant 0 : index
    %c0_43 = arith.constant 0 : index
    %59 = vector.load %arg3[%c6, %c0_42, %c0_43] : memref<9x4x64xbf16, #tpu.memory_space<vmem>>, vector<1x4x64xbf16>
    %60 = vector.shape_cast %59 : vector<1x4x64xbf16> to vector<4x64xbf16>
    %cst_44 = arith.constant dense<0.000000e+00> : vector<256x64xf32>
    %61 = tpu.matmul %58, %60, %cst_44 {dimension_numbers = #tpu.dot_dimension_numbers<[1], [0], [0], [1], [0, 0, 1, 1], [], []>} : vector<256x4xbf16>, vector<4x64xbf16>, vector<256x64xf32> -> vector<256x64xf32>
    %62 = arith.addf %53, %61 : vector<256x64xf32>
    %c2_i32_45 = arith.constant 2 : i32
    %63 = arith.addi %0, %c2_i32_45 : i32
    %c0_46 = arith.constant 0 : index
    %64 = arith.index_cast %63 : i32 to index
    %c1_47 = arith.constant 1 : index
    %c0_48 = arith.constant 0 : index
    %65 = vector.load %arg2[%c0_46, %64, %c1_47, %c0_48] : memref<1x18x18x4xbf16, #tpu.memory_space<vmem>>, vector<1x16x16x4xbf16>
    %66 = vector.shape_cast %65 : vector<1x16x16x4xbf16> to vector<16x16x4xbf16>
    %67 = vector.shape_cast %66 : vector<16x16x4xbf16> to vector<256x4xbf16>
    %c7 = arith.constant 7 : index
    %c0_49 = arith.constant 0 : index
    %c0_50 = arith.constant 0 : index
    %68 = vector.load %arg3[%c7, %c0_49, %c0_50] : memref<9x4x64xbf16, #tpu.memory_space<vmem>>, vector<1x4x64xbf16>
    %69 = vector.shape_cast %68 : vector<1x4x64xbf16> to vector<4x64xbf16>
    %cst_51 = arith.constant dense<0.000000e+00> : vector<256x64xf32>
    %70 = tpu.matmul %67, %69, %cst_51 {dimension_numbers = #tpu.dot_dimension_numbers<[1], [0], [0], [1], [0, 0, 1, 1], [], []>} : vector<256x4xbf16>, vector<4x64xbf16>, vector<256x64xf32> -> vector<256x64xf32>
    %71 = arith.addf %62, %70 : vector<256x64xf32>
    %c2_i32_52 = arith.constant 2 : i32
    %72 = arith.addi %0, %c2_i32_52 : i32
    %c0_53 = arith.constant 0 : index
    %73 = arith.index_cast %72 : i32 to index
    %c2_54 = arith.constant 2 : index
    %c0_55 = arith.constant 0 : index
    %74 = vector.load %arg2[%c0_53, %73, %c2_54, %c0_55] : memref<1x18x18x4xbf16, #tpu.memory_space<vmem>>, vector<1x16x16x4xbf16>
    %75 = vector.shape_cast %74 : vector<1x16x16x4xbf16> to vector<16x16x4xbf16>
    %76 = vector.shape_cast %75 : vector<16x16x4xbf16> to vector<256x4xbf16>
    %c8 = arith.constant 8 : index
    %c0_56 = arith.constant 0 : index
    %c0_57 = arith.constant 0 : index
    %77 = vector.load %arg3[%c8, %c0_56, %c0_57] : memref<9x4x64xbf16, #tpu.memory_space<vmem>>, vector<1x4x64xbf16>
    %78 = vector.shape_cast %77 : vector<1x4x64xbf16> to vector<4x64xbf16>
    %cst_58 = arith.constant dense<0.000000e+00> : vector<256x64xf32>
    %79 = tpu.matmul %76, %78, %cst_58 {dimension_numbers = #tpu.dot_dimension_numbers<[1], [0], [0], [1], [0, 0, 1, 1], [], []>} : vector<256x4xbf16>, vector<4x64xbf16>, vector<256x64xf32> -> vector<256x64xf32>
    %80 = arith.addf %71, %79 : vector<256x64xf32>
    %c0_59 = arith.constant 0 : index
    %c0_60 = arith.constant 0 : index
    %81 = vector.load %arg4[%c0_59, %c0_60] : memref<1x64xf32, #tpu.memory_space<vmem>>, vector<1x64xf32>
    %82 = vector.broadcast %81 : vector<1x64xf32> to vector<256x64xf32>
    %83 = arith.addf %80, %82 : vector<256x64xf32>
    %84 = arith.truncf %83 : vector<256x64xf32> to vector<256x64xbf16>
    %85 = arith.negf %84 : vector<256x64xbf16>
    %86 = math.exp %85 : vector<256x64xbf16>
    %cst_61 = arith.constant 1.000000e+00 : bf16
    %87 = vector.broadcast %cst_61 : bf16 to vector<256x64xbf16>
    %88 = arith.addf %87, %86 : vector<256x64xbf16>
    %89 = arith.divf %87, %88 : vector<256x64xbf16>
    %90 = arith.extf %89 : vector<256x64xbf16> to vector<256x64xf32>
    %91 = arith.mulf %83, %90 : vector<256x64xf32>
    %92 = vector.shape_cast %91 : vector<256x64xf32> to vector<16x16x64xf32>
    %93 = arith.truncf %92 : vector<16x16x64xf32> to vector<16x16x64xbf16>
    %c0_62 = arith.constant 0 : index
    %c0_63 = arith.constant 0 : index
    %c0_64 = arith.constant 0 : index
    %c0_65 = arith.constant 0 : index
    %94 = vector.load %arg5[%c0_62, %c0_63, %c0_64, %c0_65] : memref<1x16x16x64xbf16, #tpu.memory_space<vmem>>, vector<1x16x16x64xbf16>
    %95 = vector.shape_cast %94 : vector<1x16x16x64xbf16> to vector<16x16x64xbf16>
    %96 = vector.shape_cast %93 : vector<16x16x64xbf16> to vector<1x16x16x64xbf16>
    tpu.vector_store %arg5[%c0_62, %c0_63, %c0_64, %c0_65], %96 {strides = array<i32>} : memref<1x16x16x64xbf16, #tpu.memory_space<vmem>>, vector<1x16x16x64xbf16>,
    return
  }
  func.func @transform_0(%arg0: i32, %arg1: i32) -> (i32, i32, i32, i32) {
    %c0_i32 = arith.constant 0 : i32
    %c0_i32_0 = arith.constant 0 : i32
    %c0_i32_1 = arith.constant 0 : i32
    %c0_i32_2 = arith.constant 0 : i32
    return %arg0, %c0_i32, %c0_i32_0, %c0_i32_1 : i32, i32, i32, i32
  }
  func.func @transform_1(%arg0: i32, %arg1: i32) -> (i32, i32, i32) {
    %c0_i32 = arith.constant 0 : i32
    %c0_i32_0 = arith.constant 0 : i32
    %c0_i32_1 = arith.constant 0 : i32
    %c0_i32_2 = arith.constant 0 : i32
    return %c0_i32, %c0_i32_0, %c0_i32_1 : i32, i32, i32
  }
  func.func @transform_2(%arg0: i32, %arg1: i32) -> (i32, i32) {
    %c0_i32 = arith.constant 0 : i32
    %c0_i32_0 = arith.constant 0 : i32
    %c0_i32_1 = arith.constant 0 : i32
    return %c0_i32, %c0_i32_0 : i32, i32
  }
  func.func @transform_3(%arg0: i32, %arg1: i32) -> (i32, i32, i32, i32) {
    %c0_i32 = arith.constant 0 : i32
    %c0_i32_0 = arith.constant 0 : i32
    %c0_i32_1 = arith.constant 0 : i32
    return %arg0, %arg1, %c0_i32, %c0_i32_0 : i32, i32, i32, i32
  }
}

</mosaic_0001>

<bundles_post_ra>
// kernel: tpu_custom_call.1
= control target key start
LH: loop header
LB: loop body
LE: loop exit
PB: predicated region body
PF: predicated region fallthrough
CT: control target
= control target key end

     0   :  { %8 = vsyncpa [#allocation3], 0  ;;  %s9482_s0 = inlined_call_operand.vmem [shape: bf16[2,18,18,4], index: 0, kind: input, shape index: {}]   ;;  %s9483_s1 = inlined_call_operand.vmem [shape: bf16[9,4,64], index: 1, kind: input, shape index: {}]   ;;  %s9484_s2 = inlined_call_operand.vmem [shape: f32[1,64], index: 2, kind: input, shape index: {}]   ;;  %s9485_s3 = inlined_call_operand.hbm [shape: bf16[2,16,16,64], index: 3, kind: output, shape index: {}]  }
   0x1   :  { %10 = vsyncpa [#allocation3 + $0x1], 0  ;;  %s6621_s12 = smov 0   ;;  %s6623_s13 = smov 0  }
   0x2   :  { %s6625_s14 = smov 0   ;;  %s6627_s15 = smov 0  }
   0x3   :  { %s6629_s16 = smov 0   ;;  %s6631_s17 = smov 0  }
   0x4 LB: > { %s5247_s18 = sadd.s32 4294967295, %s6596_s17   ;;  %s5248_s19 = sadd.s32 4294967294, %s6596_s17   ;;  %s6596_s17 = sphi %s6631_s17, %s16_s17   ;;  %s6592_s16 = sphi %s6629_s16, %s9702_s16   ;;  %s6588_s15 = sphi %s6627_s15, %s9701_s15   ;;  %s6584_s14 = sphi %s6625_s14, %s9700_s14   ;;  %s6580_s13 = sphi %s6623_s13, %s9699_s13   ;;  %s6576_s12 = sphi %s6621_s12, %s9698_s12  }
   0x5   : > { %s28_s20 = sadd.s32 1, %s6592_s16  ;;  %s105_s21 = sadd.s32 1, %s6584_s14 }
   0x6   : > { %p30_p0 = scmp.ge.s32.totalorder %s28_s20, 2  ;;  %p115_p1 = scmp.ne.s32.totalorder %s6584_s14, %s6580_s13 }
   0x7   : > { %p116_p2 = scmp.eq.s32.totalorder %s5247_s18, 1  ;;  %p121_p3 = scmp.ne.s32.totalorder %s6580_s13, %s6576_s12 }
   0x8   : > { %s9704_s20 = smov (%p30_p0, %s28_s20), 0  ;;  %p122_p5 = scmp.eq.s32.totalorder %s5248_s19, 1 }
   0x9   : > { %p6661_p4 = por %p116_p2, %p115_p1  ;;  %s100_s23 = ssub.s32 %s6592_s16, %s9704_s20 }
   0xa   : > { %p5251_p6 = scmp.ge.s32.totalorder %s6596_s17, 1  ;;  %p103_p7 = scmp.eq.s32.totalorder %s100_s23, 0 }
   0xb   : > { %p6668_p8 = por %p122_p5, %p121_p3  ;;  %p154_p9 = scmp.lt.s32.totalorder %s6596_s17, 3 }
   0xc   : > { %s6674_s25 = scalar_select %p103_p7, %s6584_s14, %s105_s21  }
   0xd   : > { %p155_p10 = pnand %p5251_p6, %p154_p9 }
   0xf   : > { %158 = sbr.rel (%p155_p10) target bundleno = 626 (0x272), region = 32 }
  0x14   : > { %v5254_v0 = vld [vmem:[%s9483_s1 + $0x2] sm:$0x3]  ;;  %vm725_vm0 = vcmask 1041408   ;;  %p178_p11 = scmp.lt.s32.totalorder %s6588_s15, 1  ;;  %v222_v2 = vld [vmem:[%s9483_s1] sm:$0x3] }
  0x15   : > { %6339 = vmatprep.subr.msk.bf16.mxu1 %vm725_vm0, %v5254_v0  ;;  %6338 = vmatprep.subr.msk.bf16.mxu0 %vm725_vm0, %v5254_v0  ;;  %v727_v1 = vsel %vm725_vm0, %v5254_v0, 0  ;;  %v5335_v3 = vld [vmem:[%s9483_s1 + $0x4] sm:$0x3]  ;;  %vm239_vm1 = vsmask.f32 3328  ;;  %v6698_v4 = vsel %vm725_vm0, %v222_v2, 0 }
  0x16   : > { %6337 = vmatpush3.bf16.msra.mxu1 %v727_v1  ;;  %6031 = vmatpush3.bf16.msra.mxu0 %v727_v1  ;;  %s179_s30 = scalar_select %p178_p11, %s6588_s15, 1  ;;  %vm240_vm2 = vsmask.f32 7440  ;;  %vm676_vm3 = vcmask 31744   ;;  %v6724_v16 = vsel %vm725_vm0, %v5335_v3, 0  ;;  %vm1230_vm5 = vcmask 1042432  }
  0x17   : > { %6340 = vmatprep.subr.msk.bf16.mxu1 %vm725_vm0, %v222_v2  ;;  %6341 = vmatprep.subr.msk.bf16.mxu0 %vm725_vm0, %v5335_v3  ;;  %vm6739_vm4 = vmor %vm239_vm1, %vm240_vm2  ;;  %vm1231_vm6 = vcmask 1046532   ;;  %vm5114_vm8 = vcmask 519168   ;;  %s175_s7 = sand.u32 1, %s6580_s13   ;;  %s5876_s10 = sshll.u32 %s6588_s15, 11 }
  0x18   : > { %s6348_s6 = smul.u32 216, %s179_s30  ;;  %vm7025_vm7 = vmor %vm1230_vm5, %vm1231_vm6  ;;  %s9273_s8 = sshll.u32 %s175_s7, 7 }
  0x19   : > { %s9427_s21 = scalar_lea.hbm %s9485_s3, %s5876_s10  ;;  %s9437_s15 = scalar_lea.sflag [#allocation3], %s175_s7 }
  0x1a   : > { %s6695_s9 = scalar_lea.vmem %s9482_s0, %s6348_s6  ;;  %s6598_s26 = smov [#allocation2]  }
  0x1b   : > { %v6701_v5 = vld [vmem:[%s6695_s9] sm:$0xf]  ;;  %v6704_v6 = vld [vmem:[%s6695_s9 + $0x4] sm:$0xf]  ;;  %v6707_v7 = vld [vmem:[%s6695_s9 + $0x8] sm:$0x1] }
  0x1c   : > { %v243_v8 = vshrl.u32 %v6701_v5, 16  ;;  %v246_v9 = vshll.u32 %v6701_v5, 16  ;;  %v252_v10 = vshll.u32 %v6704_v6, 16  ;;  %v256_v11 = vshrl.u32 %v6704_v6, 16  ;;  %v6714_v12 = vld [vmem:[%s6695_s9 + $0x60] sm:$0xf] }
  0x1d   : > { %v262_v13 = vshll.u32 %v6707_v7, 16  ;;  %v6718_v14 = vld [vmem:[%s6695_s9 + $0x64] sm:$0xf]  ;;  %v6721_v15 = vld [vmem:[%s6695_s9 + $0x68] sm:$0x1]  ;;  %v435_v22 = vshrl.u32 %v6714_v12, 16 }
  0x1e   : > { %v245_v17 = vrot.slane %v243_v8, 4  ;;  %v248_v18 = vrot.slane %v246_v9, 5  ;;  %v254_v19 = vrot.slane %v252_v10, 5  ;;  %v258_v20 = vrot.slane %v256_v11, 4  ;;  %v6732_v29 = vld [vmem:[%s6695_s9 + $0xc] sm:$0xf] }
  0x1f   : > { %v264_v21 = vrot.slane %v262_v13, 5  ;;  %v438_v23 = vshll.u32 %v6714_v12, 16  ;;  %v444_v24 = vshll.u32 %v6718_v14, 16  ;;  %v448_v27 = vshrl.u32 %v6718_v14, 16  ;;  %v6735_v30 = vld [vmem:[%s6695_s9 + $0x10] sm:$0xf] }
  0x20   : > { %v249_v25 = vor.u32 %v248_v18, %v245_v17  ;;  %v259_v26 = vor.u32 %v258_v20, %v254_v19  ;;  %v454_v28 = vshll.u32 %v6721_v15, 16  ;;  %v437_v33 = vrot.slane %v435_v22, 4  ;;  %v6745_v41 = vld [vmem:[%s6695_s9 + $0x14] sm:$0x1]  ;;  %v6756_v53 = vld [vmem:[%s6695_s9 + $0x6c] sm:$0xf] }
  0x21   : > { %v440_v34 = vrot.slane %v438_v23, 5  ;;  %v446_v35 = vrot.slane %v444_v24, 5  ;;  %v450_v38 = vrot.slane %v448_v27, 4  ;;  %v267_v42 = vshrl.u32 %v6732_v29, 16  ;;  %v6760_v58 = vld [vmem:[%s6695_s9 + $0x70] sm:$0xf] }
  0x22   : > { %v250_v36 = vrot.slane %v249_v25, 4  ;;  %v260_v37 = vrot.slane %v259_v26, 4  ;;  %v456_v39 = vrot.slane %v454_v28, 5  ;;  %v270_v43 = vshll.u32 %v6732_v29, 16  ;;  %v6768_v63 = vld [vmem:[%s6695_s9 + $0x74] sm:$0x1] }
  0x23   : > { %v441_v40 = vor.u32 %v440_v34, %v437_v33  ;;  %v276_v44 = vshll.u32 %v6735_v30, 16  ;;  %v451_v47 = vor.u32 %v450_v38, %v446_v35  ;;  %v280_v48 = vshrl.u32 %v6735_v30, 16  ;;  %v6774_v8 = vld [vmem:[%s6695_s9 + $0x18] sm:$0xf]  ;;  %v6787_v25 = vld [vmem:[%s6695_s9 + $0x20] sm:$0x1] }
  0x24   : > { %v255_v45 = vsel %vm6739_vm4, %v250_v36, %v254_v19  ;;  %v265_v46 = vsel %vm6739_vm4, %v260_v37, %v264_v21  ;;  %v269_v51 = vrot.slane %v267_v42, 4  ;;  %v272_v52 = vrot.slane %v270_v43, 5  ;;  %v6781_v21 = vld [vmem:[%s6695_s9 + $0x1c] sm:$0xf]  ;;  %s6524_s27 = sshll.u32 %s6598_s26, 4  ;;  %s6525_s27 = int_to_ptr.vmem [resolvable:$false] %s6524_s27 }
  0x25   : > { %v5255_v49 = vcombine.low %v255_v45, %v265_v46  ;;  %v442_v50 = vrot.slane %v441_v40, 4  ;;  %v452_v54 = vrot.slane %v451_v47, 4  ;;  %v278_v55 = vrot.slane %v276_v44, 5  ;;  %v6800_v40 = vld [vmem:[%s9483_s1 + $0x8] sm:$0x3]  ;;  %s6526_s28 = scalar_lea.vmem %s6525_s27, 4096 }
  0x26   : > { %v282_v56 = vrot.slane %v280_v48, 4  ;;  %v286_v57 = vshll.u32 %v6745_v41, 16  ;;  %v273_v60 = vor.u32 %v272_v52, %v269_v51  ;;  %v459_v3 = vshrl.u32 %v6756_v53, 16  ;;  %v6805_v46 = vld [vmem:[%s6695_s9 + $0x7c] sm:$0xf] }
  0x27   : > { %6032 = vmatprep.mubr.msk.bf16.mxu0 %vm676_vm3, %v5255_v49  ;;  %v447_v59 = vsel %vm6739_vm4, %v442_v50, %v446_v35  ;;  %v457_v0 = vsel %vm6739_vm4, %v452_v54, %v456_v39  ;;  %v462_v11 = vshll.u32 %v6756_v53, 16  ;;  %v468_v13 = vshll.u32 %v6760_v58, 16  ;;  %v6794_v35 = vld [vmem:[%s6695_s9 + $0x78] sm:$0xf] }
  0x28   : > { %v283_v1 = vor.u32 %v282_v56, %v278_v55  ;;  %v288_v2 = vrot.slane %v286_v57, 5  ;;  %v5263_v9 = vcombine.low %v447_v59, %v457_v0  ;;  %v274_v10 = vrot.slane %v273_v60, 4  ;;  %v6812_v56 = vld [vmem:[%s6695_s9 + $0x80] sm:$0x1] }
  0x29   : > { %v461_v18 = vrot.slane %v459_v3, 4  ;;  %v472_v19 = vshrl.u32 %v6760_v58, 16  ;;  %v478_v20 = vshll.u32 %v6768_v63, 16  ;;  %v464_v23 = vrot.slane %v462_v11, 5  ;;  %9523 = vst [vmem:[#allocation5_spill] sm:$0xff] %v6812_v56 }
  0x2a   : > { %v284_v17 = vrot.slane %v283_v1, 4  ;;  %6048 = vmatprep.mubr.msk.bf16.mxu1 %vm676_vm3, %v5263_v9  ;;  %v279_v22 = vsel %vm6739_vm4, %v274_v10, %v278_v55  ;;  %v470_v24 = vrot.slane %v468_v13, 5  ;;  %v291_v26 = vshrl.u32 %v6774_v8, 16  ;;  %v6818_v1 = vld [vmem:[%s6695_s9 + $0x24] sm:$0xf] }
  0x2b   : > { %v474_v28 = vrot.slane %v472_v19, 4  ;;  %v480_v33 = vrot.slane %v478_v20, 5  ;;  %v294_v34 = vshll.u32 %v6774_v8, 16  ;;  %v465_v37 = vor.u32 %v464_v23, %v461_v18  ;;  %v6826_v10 = vld [vmem:[%s6695_s9 + $0x28] sm:$0xf] }
  0x2c   : > { %v289_v27 = vsel %vm6739_vm4, %v284_v17, %v288_v2  ;;  %v293_v38 = vrot.slane %v291_v26, 4  ;;  %v300_v39 = vshll.u32 %v6781_v21, 16  ;;  %v304_v44 = vshrl.u32 %v6781_v21, 16  ;;  %v6832_v19 = vld [vmem:[%s9483_s1 + $0x6] sm:$0x3] }
  0x2d   : > { %v5256_v36 = vcombine.low %v279_v22, %v289_v27  ;;  %v475_v42 = vor.u32 %v474_v28, %v470_v24  ;;  %v296_v43 = vrot.slane %v294_v34, 5  ;;  %v310_v45 = vshll.u32 %v6787_v25, 16 }
  0x2e   : > { %v466_v47 = vrot.slane %v465_v37, 4  ;;  %v302_v48 = vrot.slane %v300_v39, 5  ;;  %v483_v49 = vshrl.u32 %v6794_v35, 16  ;;  %v486_v50 = vshll.u32 %v6794_v35, 16 }
  0x2f   : > { %6033 = vmatmul.mubr.msk.bf16.vlgmr.msra.gmra.mxu0 %vm676_vm3, %v5256_v36  ;;  %v476_v51 = vrot.slane %v475_v42, 4  ;;  %v297_v52 = vor.u32 %v296_v43, %v293_v38  ;;  %v306_v54 = vrot.slane %v304_v44, 4  ;;  %v312_v55 = vrot.slane %v310_v45, 5  ;;  %v6844_v36 = vld [vmem:[%s6695_s9 + $0x84] sm:$0xf] }
  0x30   : > { %6099 = vmatpush3.bf16.msra.mxu0 %v6724_v16  ;;  %v471_v57 = vsel %vm6739_vm4, %v466_v47, %v470_v24  ;;  %v485_v59 = vrot.slane %v483_v49, 4  ;;  %v488_v60 = vrot.slane %v486_v50, 5  ;;  %v492_v0 = vshll.u32 %v6805_v46, 16  ;;  %v6837_v24 = vld [vmem:[%s6695_s9 + $0x2c] sm:$0x1] }
  0x31   : > { %6343 = vmatprep.subr.msk.bf16.mxu0 %vm725_vm0, %v6800_v40  ;;  %v481_v16 = vsel %vm6739_vm4, %v476_v51, %v480_v33  ;;  %v298_v2 = vrot.slane %v297_v52, 4  ;;  %v307_v3 = vor.u32 %v306_v54, %v302_v48  ;;  %v496_v9 = vshrl.u32 %v6805_v46, 16  ;;  %v6851_v43 = vld [vmem:[%s6695_s9 + $0x88] sm:$0xf]  ;;  %v6859_v51 = vld [vmem:[%s6695_s9 + $0x8c] sm:$0x1] }
  0x32   : > { %v5264_v11 = vcombine.low %v471_v57, %v481_v16  ;;  %v489_v13 = vor.u32 %v488_v60, %v485_v59  ;;  %v494_v17 = vrot.slane %v492_v0, 5  ;;  %v502_v18 = vshll.u32 %v6812_v56, 16  ;;  %9524 = vst [vmem:[#allocation6_spill] sm:$0xff] %v6859_v51  ;;  %v6867_v60 = vld [vmem:[%s6695_s9 + $0x30] sm:$0xf] }
  0x33   : > { %v303_v20 = vsel %vm6739_vm4, %v298_v2, %v302_v48  ;;  %v308_v22 = vrot.slane %v307_v3, 4  ;;  %v498_v23 = vrot.slane %v496_v9, 4  ;;  %v315_v26 = vshrl.u32 %v6818_v1, 16  ;;  %v6872_v9 = vld [vmem:[%s6695_s9 + $0x34] sm:$0xf] }
  0x34   : > { %6049 = vmatmul.mubr.msk.bf16.vlgmr.msra.gmra.mxu1 %vm676_vm3, %v5264_v11  ;;  %v490_v27 = vrot.slane %v489_v13, 4  ;;  %v504_v28 = vrot.slane %v502_v18, 5  ;;  %v318_v33 = vshll.u32 %v6818_v1, 16  ;;  %v324_v34 = vshll.u32 %v6826_v10, 16 }
  0x35   : > { %6065 = vmatpush3.bf16.msra.mxu1 %v6698_v4  ;;  %v313_v37 = vsel %vm6739_vm4, %v308_v22, %v312_v55  ;;  %v499_v38 = vor.u32 %v498_v23, %v494_v17  ;;  %v317_v39 = vrot.slane %v315_v26, 4  ;;  %v328_v42 = vshrl.u32 %v6826_v10, 16 }
  0x36   : > { %v5257_v44 = vcombine.low %v303_v20, %v313_v37  ;;  %v495_v45 = vsel %vm6739_vm4, %v490_v27, %v494_v17  ;;  %v320_v47 = vrot.slane %v318_v33, 5  ;;  %v326_v48 = vrot.slane %v324_v34, 5  ;;  %6342 = vmatprep.subr.msk.bf16.mxu1 %vm725_vm0, %v6832_v19  ;;  %v6880_v33 = vld [vmem:[%s6695_s9 + $0x38] sm:$0x1] }
  0x37   : > { %v500_v4 = vrot.slane %v499_v38, 4  ;;  %v330_v49 = vrot.slane %v328_v42, 4  ;;  %v334_v50 = vshll.u32 %v6837_v24, 16  ;;  %v507_v52 = vshrl.u32 %v6844_v36, 16  ;;  %v6885_v38 = vld [vmem:[%s6695_s9 + $0x90] sm:$0xf] }
  0x38   : > { %6036 = vmatprep.mubr.msk.bf16.mxu0 %vm676_vm3, %v5257_v44  ;;  %v321_v54 = vor.u32 %v320_v47, %v317_v39  ;;  %v510_v55 = vshll.u32 %v6844_v36, 16  ;;  %v516_v57 = vshll.u32 %v6851_v43, 16  ;;  %v520_v59 = vshrl.u32 %v6851_v43, 16  ;;  %9525 = vst [vmem:[#allocation7_spill] sm:$0xff] %v6885_v38  ;;  %v6890_v47 = vld [vmem:[%s6695_s9 + $0x94] sm:$0xf] }
  0x39   : > { %v505_v0 = vsel %vm6739_vm4, %v500_v4, %v504_v28  ;;  %v331_v16 = vor.u32 %v330_v49, %v326_v48  ;;  %v336_v2 = vrot.slane %v334_v50, 5  ;;  %v509_v3 = vrot.slane %v507_v52, 4  ;;  %9526 = vst [vmem:[#allocation8_spill] sm:$0xff] %v6890_v47 }
  0x3a   : > { %v5265_v11 = vcombine.low %v495_v45, %v505_v0  ;;  %v322_v13 = vrot.slane %v321_v54, 4  ;;  %v512_v17 = vrot.slane %v510_v55, 5  ;;  %v518_v18 = vrot.slane %v516_v57, 5 }
  0x3b   : > { %v332_v20 = vrot.slane %v331_v16, 4  ;;  %v522_v22 = vrot.slane %v520_v59, 4  ;;  %v526_v23 = vshll.u32 %v6859_v51, 16  ;;  %v339_v26 = vshrl.u32 %v6867_v60, 16  ;;  %v6899_v16 = vld [vmem:[%s6695_s9 + $0x98] sm:$0x1] }
  0x3c   : > { %6052 = vmatprep.mubr.msk.bf16.mxu1 %vm676_vm3, %v5265_v11  ;;  %v327_v27 = vsel %vm6739_vm4, %v322_v13, %v326_v48  ;;  %v513_v28 = vor.u32 %v512_v17, %v509_v3  ;;  %v342_v34 = vshll.u32 %v6867_v60, 16  ;;  %v348_v37 = vshll.u32 %v6872_v9, 16  ;;  %9527 = vst [vmem:[#allocation9_spill] sm:$0xff] %v6899_v16  ;;  %v6904_v11 = vld [vmem:[%s6695_s9 + $0x3c] sm:$0xf] }
  0x3d   : > { %v337_v39 = vsel %vm6739_vm4, %v332_v20, %v336_v2  ;;  %v523_v42 = vor.u32 %v522_v22, %v518_v18  ;;  %v528_v44 = vrot.slane %v526_v23, 5  ;;  %v341_v45 = vrot.slane %v339_v26, 4  ;;  %v6909_v23 = vld [vmem:[%s6695_s9 + $0x40] sm:$0xf]  ;;  %v1183_v51 = vld [vmem:[%s6695_s9 + $0xc] sm:$0xe] }
  0x3e   : > { %v5258_v48 = vcombine.low %v327_v27, %v337_v39  ;;  %v514_v4 = vrot.slane %v513_v28, 4  ;;  %v344_v49 = vrot.slane %v342_v34, 5  ;;  %v350_v50 = vrot.slane %v348_v37, 5 }
  0x3f   : > { %v524_v52 = vrot.slane %v523_v42, 4  ;;  %v352_v54 = vshrl.u32 %v6872_v9, 16  ;;  %v358_v55 = vshll.u32 %v6880_v33, 16  ;;  %v531_v57 = vshrl.u32 %v6885_v38, 16 }
  0x40   : > { %6037 = vmatmul.mubr.msk.bf16.gmra.mxu0 %vm676_vm3, %v5258_v48  ;;  %v519_v59 = vsel %vm6739_vm4, %v514_v4, %v518_v18  ;;  %v345_v0 = vor.u32 %v344_v49, %v341_v45  ;;  %v534_v2 = vshll.u32 %v6885_v38, 16  ;;  %v540_v3 = vshll.u32 %v6890_v47, 16  ;;  %v6918_v48 = vld [vmem:[%s6695_s9 + $0x44] sm:$0x1] }
  0x41   : > { %v529_v13 = vsel %vm6739_vm4, %v524_v52, %v528_v44  ;;  %v354_v17 = vrot.slane %v352_v54, 4  ;;  %v360_v20 = vrot.slane %v358_v55, 5  ;;  %v533_v22 = vrot.slane %v531_v57, 4  ;;  %v6923_v52 = vld [vmem:[%s6695_s9 + $0x9c] sm:$0xf] }
  0x42   : > { %v5266_v18 = vcombine.low %v519_v59, %v529_v13  ;;  %v346_v26 = vrot.slane %v345_v0, 4  ;;  %v536_v27 = vrot.slane %v534_v2, 5  ;;  %v542_v28 = vrot.slane %v540_v3, 5  ;;  %9528 = vst [vmem:[#allocation10_spill] sm:$0xff] %v6923_v52  ;;  %v6927_v13 = vld [vmem:[%s6695_s9 + $0xa0] sm:$0xf] }
  0x43   : > { %v355_v34 = vor.u32 %v354_v17, %v350_v50  ;;  %v544_v37 = vshrl.u32 %v6890_v47, 16  ;;  %v550_v39 = vshll.u32 %v6899_v16, 16  ;;  %v363_v42 = vshrl.u32 %v6904_v11, 16  ;;  %9529 = vst [vmem:[#allocation11_spill] sm:$0xff] %v6927_v13 }
  0x44   : > { %6053 = vmatmul.mubr.msk.bf16.gmra.mxu1 %vm676_vm3, %v5266_v18  ;;  %v351_v44 = vsel %vm6739_vm4, %v346_v26, %v350_v50  ;;  %v537_v45 = vor.u32 %v536_v27, %v533_v22  ;;  %v366_v4 = vshll.u32 %v6904_v11, 16  ;;  %v372_v49 = vshll.u32 %v6909_v23, 16  ;;  %v6933_v26 = vld [vmem:[%s6695_s9 + $0xa4] sm:$0x1] }
  0x45   : > { %v356_v54 = vrot.slane %v355_v34, 4  ;;  %v546_v55 = vrot.slane %v544_v37, 4  ;;  %v552_v57 = vrot.slane %v550_v39, 5  ;;  %v365_v59 = vrot.slane %v363_v42, 4  ;;  %9530 = vst [vmem:[#allocation12_spill] sm:$0xff] %v6933_v26 }
  0x46   : > { %v538_v0 = vrot.slane %v537_v45, 4  ;;  %v368_v2 = vrot.slane %v366_v4, 5  ;;  %v374_v3 = vrot.slane %v372_v49, 5  ;;  %v376_v50 = vshrl.u32 %v6909_v23, 16  ;;  %v6937_v34 = vld [vmem:[%s6695_s9 + $0x48] sm:$0xf] }
  0x47   : > { %v361_v17 = vsel %vm6739_vm4, %v356_v54, %v360_v20  ;;  %v547_v22 = vor.u32 %v546_v55, %v542_v28  ;;  %v382_v18 = vshll.u32 %v6918_v48, 16  ;;  %v555_v27 = vshrl.u32 %v6923_v52, 16 }
  0x48   : > { %v5259_v37 = vcombine.low %v351_v44, %v361_v17  ;;  %v543_v39 = vsel %vm6739_vm4, %v538_v0, %v542_v28  ;;  %v369_v42 = vor.u32 %v368_v2, %v365_v59  ;;  %v378_v45 = vrot.slane %v376_v50, 4  ;;  %v6946_v17 = vld [vmem:[%s6695_s9 + $0x4c] sm:$0xf]  ;;  %v6952_v2 = vld [vmem:[%s6695_s9 + $0x50] sm:$0x1] }
  0x49   : > { %v548_v4 = vrot.slane %v547_v22, 4  ;;  %v384_v49 = vrot.slane %v382_v18, 5  ;;  %v557_v20 = vrot.slane %v555_v27, 4  ;;  %v558_v54 = vshll.u32 %v6923_v52, 16 }
  0x4a   : > { %6040 = vmatprep.mubr.msk.bf16.mxu0 %vm676_vm3, %v5259_v37  ;;  %v370_v55 = vrot.slane %v369_v42, 4  ;;  %v379_v62 = vor.u32 %v378_v45, %v374_v3  ;;  %v564_v32 = vshll.u32 %v6927_v13, 16  ;;  %v568_v44 = vshrl.u32 %v6927_v13, 16  ;;  %v6958_v42 = vld [vmem:[%s6695_s9 + $0xa8] sm:$0xf] }
  0x4b   : > { %v553_v28 = vsel %vm6739_vm4, %v548_v4, %v552_v57  ;;  %v560_v59 = vrot.slane %v558_v54, 5  ;;  %v574_v0 = vshll.u32 %v6933_v26, 16  ;;  %v387_v50 = vshrl.u32 %v6937_v34, 16  ;;  %9531 = vst [vmem:[#allocation13_spill] sm:$0xff] %v6958_v42 }
  0x4c   : > { %v5267_v22 = vcombine.low %v543_v39, %v553_v28  ;;  %v375_v18 = vsel %vm6739_vm4, %v370_v55, %v374_v3  ;;  %v380_v27 = vrot.slane %v379_v62, 4  ;;  %v566_v37 = vrot.slane %v564_v32, 5 }
  0x4d   : > { %v561_v45 = vor.u32 %v560_v59, %v557_v20  ;;  %v570_v61 = vrot.slane %v568_v44, 4  ;;  %v576_v57 = vrot.slane %v574_v0, 5  ;;  %v389_v4 = vrot.slane %v387_v50, 4  ;;  %v6968_v44 = vld [vmem:[%s6695_s9 + $0xac] sm:$0xf] }
  0x4e   : > { %6056 = vmatprep.mubr.msk.bf16.mxu1 %vm676_vm3, %v5267_v22  ;;  %v385_v54 = vsel %vm6739_vm4, %v380_v27, %v384_v49  ;;  %v390_v39 = vshll.u32 %v6937_v34, 16  ;;  %v396_v28 = vshll.u32 %v6946_v17, 16  ;;  %v400_v62 = vshrl.u32 %v6946_v17, 16  ;;  %9532 = vst [vmem:[#allocation14_spill] sm:$0xff] %v6968_v44  ;;  %v6971_v22 = vld [vmem:[%s6695_s9 + $0xb0] sm:$0x1] }
  0x4f   : > { %v5260_v3 = vcombine.low %v375_v18, %v385_v54  ;;  %v562_v32 = vrot.slane %v561_v45, 4  ;;  %v571_v55 = vor.u32 %v570_v61, %v566_v37  ;;  %v406_v20 = vshll.u32 %v6952_v2, 16  ;;  %9533 = vst [vmem:[#allocation15_spill] sm:$0xff] %v6971_v22 }
  0x50   : > { %v392_v59 = vrot.slane %v390_v39, 5  ;;  %v398_v0 = vrot.slane %v396_v28, 5  ;;  %v402_v50 = vrot.slane %v400_v62, 4  ;;  %v579_v49 = vshrl.u32 %v6958_v42, 16  ;;  %v6980_v62 = vld [vmem:[%s6695_s9 + $0x54] sm:$0xf] }
  0x51   : > { %6041 = vmatmul.mubr.msk.bf16.gmra.mxu0 %vm676_vm3, %v5260_v3  ;;  %v567_v18 = vsel %vm6739_vm4, %v562_v32, %v566_v37  ;;  %v572_v27 = vrot.slane %v571_v55, 4  ;;  %v408_v61 = vrot.slane %v406_v20, 5  ;;  %v582_v45 = vshll.u32 %v6958_v42, 16  ;;  %v6987_v55 = vld [vmem:[%s6695_s9 + $0x58] sm:$0xf] }
  0x52   : > { %v393_v54 = vor.u32 %v392_v59, %v389_v4  ;;  %v403_v56 = vor.u32 %v402_v50, %v398_v0  ;;  %v581_v39 = vrot.slane %v579_v49, 4  ;;  %v588_v28 = vshll.u32 %v6968_v44, 16  ;;  %v6990_v49 = vld [vmem:[%s6695_s9 + $0x5c] sm:$0x1] }
  0x53   : > { %v577_v3 = vsel %vm6739_vm4, %v572_v27, %v576_v57  ;;  %v584_v26 = vrot.slane %v582_v45, 5  ;;  %v592_v37 = vshrl.u32 %v6968_v44, 16  ;;  %v598_v32 = vshll.u32 %v6971_v22, 16  ;;  %v1182_v22 = vld [vmem:[%s6695_s9] sm:$0xe] }
  0x54   : > { %v5268_v4 = vcombine.low %v567_v18, %v577_v3  ;;  %v394_v20 = vrot.slane %v393_v54, 4  ;;  %v404_v59 = vrot.slane %v403_v56, 4  ;;  %v590_v50 = vrot.slane %v588_v28, 5  ;;  %v7001_v54 = vld [vmem:[%s6695_s9 + $0xb4] sm:$0xf] }
  0x55   : > { %v585_v42 = vor.u32 %v584_v26, %v581_v39  ;;  %v594_v52 = vrot.slane %v592_v37, 4  ;;  %v600_v13 = vrot.slane %v598_v32, 5  ;;  %v411_v57 = vshrl.u32 %v6980_v62, 16  ;;  %9534 = vst [vmem:[#allocation16_spill] sm:$0xff] %v7001_v54  ;;  %v7004_v37 = vld [vmem:[%s6695_s9 + $0xb8] sm:$0xf] }
  0x56   : > { %6057 = vmatmul.mubr.msk.bf16.gmra.mxu1 %vm676_vm3, %v5268_v4  ;;  %v399_v27 = vsel %vm6739_vm4, %v394_v20, %v398_v0  ;;  %v409_v18 = vsel %vm6739_vm4, %v404_v59, %v408_v61  ;;  %v414_v56 = vshll.u32 %v6980_v62, 16  ;;  %v420_v45 = vshll.u32 %v6987_v55, 16  ;;  %v7009_v61 = vld [vmem:[%s6695_s9 + $0xbc] sm:$0x1] }
  0x57   : > { %v5261_v26 = vcombine.low %v399_v27, %v409_v18  ;;  %v586_v39 = vrot.slane %v585_v42, 4  ;;  %v595_v28 = vor.u32 %v594_v52, %v590_v50  ;;  %v413_v3 = vrot.slane %v411_v57, 4 }
  0x58   : > { %v416_v32 = vrot.slane %v414_v56, 5  ;;  %v422_v4 = vrot.slane %v420_v45, 5  ;;  %v424_v0 = vshrl.u32 %v6987_v55, 16  ;;  %v430_v20 = vshll.u32 %v6990_v49, 16 }
  0x59   : > { %6044 = vmatprep.mubr.msk.bf16.mxu0 %vm676_vm3, %v5261_v26  ;;  %v591_v59 = vsel %vm6739_vm4, %v586_v39, %v590_v50  ;;  %v596_v27 = vrot.slane %v595_v28, 4  ;;  %v603_v52 = vshrl.u32 %v7001_v54, 16  ;;  %v606_v42 = vshll.u32 %v7001_v54, 16 }
  0x5a   : > { %v417_v57 = vor.u32 %v416_v32, %v413_v3  ;;  %v426_v18 = vrot.slane %v424_v0, 4  ;;  %v432_v56 = vrot.slane %v430_v20, 5  ;;  %v612_v45 = vshll.u32 %v7004_v37, 16 }
  0x5b   : > { %v601_v44 = vsel %vm6739_vm4, %v596_v27, %v600_v13  ;;  %v605_v16 = vrot.slane %v603_v52, 4  ;;  %v608_v26 = vrot.slane %v606_v42, 5  ;;  %v616_v38 = vshrl.u32 %v7004_v37, 16 }
  0x5c   : > { %v5269_v50 = vcombine.low %v591_v59, %v601_v44  ;;  %v418_v39 = vrot.slane %v417_v57, 4  ;;  %v427_v28 = vor.u32 %v426_v18, %v422_v4  ;;  %v614_v47 = vrot.slane %v612_v45, 5  ;;  %v1184_v57 = vld [vmem:[%s6695_s9 + $0x18] sm:$0xe] }
  0x5d   : > { %v609_v54 = vor.u32 %v608_v26, %v605_v16  ;;  %v618_v3 = vrot.slane %v616_v38, 4  ;;  %v622_v32 = vshll.u32 %v7009_v61, 16  ;;  %v5319_v13 = vrot.slane %v1182_v22, 9 }
  0x5e   : > { %6060 = vmatprep.mubr.msk.bf16.mxu1 %vm676_vm3, %v5269_v50  ;;  %v423_v44 = vsel %vm6739_vm4, %v418_v39, %v422_v4  ;;  %v428_v20 = vrot.slane %v427_v28, 4  ;;  %v1235_v59 = vrot.slane %v6704_v6, 5  ;;  %v5288_v38 = vcombine.low %v6732_v29, %v6735_v30 }
  0x5f   : > { %v610_v16 = vrot.slane %v609_v54, 4  ;;  %v619_v27 = vor.u32 %v618_v3, %v614_v47  ;;  %v624_v52 = vrot.slane %v622_v32, 5  ;;  %v5320_v42 = vrot.slane %v1183_v51, 9 }
  0x60   : > { %v433_v18 = vsel %vm6739_vm4, %v428_v20, %v432_v56  ;;  %v1236_v22 = vsel %vm7025_vm7, %v5319_v13, %v1235_v59  ;;  %v1237_v45 = vrot.slane %v1235_v59, 4  ;;  %v9537_v4 = vrot.slane %v6735_v30, 5 }
  0x61   : > { %v5262_v50 = vcombine.low %v423_v44, %v433_v18  ;;  %v615_v54 = vsel %vm6739_vm4, %v610_v16, %v614_v47  ;;  %v620_v39 = vrot.slane %v619_v27, 4  ;;  %v5287_v51 = vcombine.low %v6701_v5, %v6704_v6  ;;  %v1185_v27 = vld [vmem:[%s6695_s9 + $0x24] sm:$0xe] }
  0x62   : > { %v1244_v26 = vrot.slane %v9537_v4, 4  ;;  %v9538_v28 = vrot.slane %v6707_v7, 5  ;;  %v9539_v3 = vmov %v9537_v4  ;;  %v5289_v13 = vcombine.low %v6774_v8, %v6781_v21  ;;  %v1187_v4 = vld [vmem:[%s6695_s9 + $0x3c] sm:$0xe] }
  0x63   : > { %v1243_v32 = vsel %vm7025_vm7, %v5320_v42, %v9539_v3  ;;  %v5321_v44 = vrot.slane %v1184_v57, 9  ;;  %6045 = vmatmul.mubr.msk.bf16.gmra.mxu0 %vm676_vm3, %v5262_v50  ;;  %v625_v47 = vsel %vm6739_vm4, %v620_v39, %v624_v52  ;;  %v9540_v6 = vrot.slane %v6745_v41, 5  ;;  %v1186_v42 = vld [vmem:[%s6695_s9 + $0x30] sm:$0xe]  ;;  %v1188_v39 = vld [vmem:[%s6695_s9 + $0x48] sm:$0xe] }
  0x64   : > { %v1239_v56 = vsel %vm7025_vm7, %v1237_v45, %v9538_v28  ;;  %v1249_v20 = vrot.slane %v6781_v21, 5  ;;  %v5270_v59 = vcombine.low %v615_v54, %v625_v47  ;;  %v1252_v16 = vrot.slane %v6787_v25, 5  ;;  %v1189_v47 = vld [vmem:[%s6695_s9 + $0x54] sm:$0xe]  ;;  %v7320_v21 = vld [vmem:[%s6695_s9 + $0x2c] sm:$0x1] }
  0x65   : > { %v5336_v5 = vcombine.low %v1236_v22, %v1239_v56  ;;  %v1246_v7 = vsel %vm7025_vm7, %v1244_v26, %v9540_v6  ;;  %v1806_v52 = vsel %vm725_vm0, %v6832_v19, 0  ;;  %v1256_v18 = vrot.slane %v6826_v10, 5 }
  0x66   : > { %v1250_v41 = vsel %vm7025_vm7, %v5321_v44, %v1249_v20  ;;  %v1251_v57 = vrot.slane %v1249_v20, 4  ;;  %6061 = vmatmul.mubr.msk.bf16.gmra.mxu1 %vm676_vm3, %v5270_v59  ;;  %v5337_v22 = vcombine.low %v1243_v32, %v1246_v7  ;;  %v2532_v25 = vsel %vm725_vm0, %v6800_v40, 0 }
  0x67   : > { %6100 = vmatprep.mubr.msk.bf16.mxu0 %vm676_vm3, %v5336_v5  ;;  %v1263_v45 = vrot.slane %v6872_v9, 5  ;;  %6066 = vmatprep.mubr.msk.bf16.mxu1 %vm676_vm3, %v5287_v51  ;;  %v5322_v26 = vrot.slane %v1185_v27, 9  ;;  %v1259_v50 = vrot.slane %v6837_v24, 5  ;;  %v5323_v54 = vrot.slane %v1186_v42, 9  ;;  %v7092_v24 = vld [vmem:[%s9483_s1 + $0xc] sm:$0x3] }
  0x68   : > { %v1253_v19 = vsel %vm7025_vm7, %v1251_v57, %v1252_v16  ;;  %v1258_v56 = vrot.slane %v1256_v18, 4  ;;  %v1266_v32 = vrot.slane %v6880_v33, 5  ;;  %v5324_v44 = vrot.slane %v1187_v4, 9 }
  0x69   : > { %v5338_v28 = vcombine.low %v1250_v41, %v1253_v19  ;;  %v1265_v3 = vrot.slane %v1263_v45, 4  ;;  %v1270_v40 = vrot.slane %v6909_v23, 5  ;;  %v1294_v5 = vrot.slane %v6721_v15, 5 }
  0x6a   : > { %v1273_v51 = vrot.slane %v6918_v48, 5  ;;  %v5325_v6 = vrot.slane %v1188_v39, 9  ;;  %v1277_v7 = vrot.slane %v6946_v17, 5  ;;  %v5290_v33 = vcombine.low %v6818_v1, %v6826_v10  ;;  %v1190_v1 = vld [vmem:[%s6695_s9 + $0x60] sm:$0xe] }
  0x6b   : > { %6101 = vmatmul.mubr.msk.bf16.vlgmr.msra.gmra.mxu0 %vm676_vm3, %v5337_v22  ;;  %v1257_v20 = vsel %vm7025_vm7, %v5322_v26, %v1256_v18  ;;  %v1272_v59 = vrot.slane %v1270_v40, 4  ;;  %v1280_v16 = vrot.slane %v6952_v2, 5  ;;  %v1260_v48 = vsel %vm7025_vm7, %v1258_v56, %v1259_v50  ;;  %v7120_v22 = vld [vmem:[%s9483_s1 + $0xa] sm:$0x3]  ;;  %v7145_v50 = vld [vmem:[%s6695_s9 + $0x6c] sm:$0xe] }
  0x6c   : > { %6167 = vmatpush3.bf16.msra.mxu0 %v2532_v25  ;;  %6104 = vmatprep.mubr.msk.bf16.mxu0 %vm676_vm3, %v5338_v28  ;;  %v1264_v27 = vsel %vm7025_vm7, %v5323_v54, %v1263_v45  ;;  %v1267_v42 = vsel %vm7025_vm7, %v1265_v3, %v1266_v32  ;;  %v1279_v41 = vrot.slane %v1277_v7, 4  ;;  %v7110_v10 = vsel %vm7025_vm7, %v5324_v44, %v1270_v40  ;;  %v1193_v39 = vld [vmem:[%s6695_s9 + $0x84] sm:$0xe]  ;;  %v7174_v44 = vld [vmem:[%s6695_s9 + $0x78] sm:$0xe] }
  0x6d   : > { %v7114_v2 = vsel %vm7025_vm7, %v5325_v6, %v1277_v7  ;;  %v5326_v57 = vrot.slane %v1189_v47, 9  ;;  %v1284_v18 = vrot.slane %v6987_v55, 5  ;;  %6345 = vmatprep.subr.msk.bf16.mxu0 %vm725_vm0, %v7092_v24  ;;  %v7130_v25 = vsel %vm7025_vm7, %v1272_v59, %v1273_v51  ;;  %v1194_v40 = vld [vmem:[%s6695_s9 + $0x90] sm:$0xe] }
  0x6e   : > { %6067 = vmatmul.mubr.msk.bf16.vlgmr.msra.gmra.mxu1 %vm676_vm3, %v5288_v38  ;;  %v7134_v45 = vsel %vm7025_vm7, %v1279_v41, %v1280_v16  ;;  %v1287_v4 = vrot.slane %v6990_v49, 5  ;;  %v1291_v19 = vrot.slane %v6718_v14, 5  ;;  %v5339_v29 = vcombine.low %v1257_v20, %v1260_v48  ;;  %v9541_v48 = vld [vmem:[#allocation6_spill] sm:$0xff] }
  0x6f   : > { %6133 = vmatpush3.bf16.msra.mxu1 %v1806_v52  ;;  %6070 = vmatprep.mubr.msk.bf16.mxu1 %vm676_vm3, %v5289_v13  ;;  %v5291_v30 = vcombine.low %v6867_v60, %v6872_v9  ;;  %v1286_v38 = vrot.slane %v1284_v18, 4  ;;  %v5327_v26 = vrot.slane %v1190_v1, 9  ;;  %v5340_v49 = vcombine.low %v1264_v27, %v1267_v42  ;;  %v1195_v42 = vld [vmem:[%s6695_s9 + $0x9c] sm:$0xe] }
  0x70   : > { %v5292_v52 = vcombine.low %v6904_v11, %v6909_v23  ;;  %v5293_v8 = vcombine.low %v6937_v34, %v6946_v17  ;;  %6344 = vmatprep.subr.msk.bf16.mxu1 %vm725_vm0, %v7120_v22  ;;  %v5341_v60 = vcombine.low %v7110_v10, %v7130_v25  ;;  %v5342_v9 = vcombine.low %v7114_v2, %v7134_v45  ;;  %v9542_v10 = vld [vmem:[#allocation8_spill] sm:$0xff]  ;;  %v9543_v2 = vld [vmem:[#allocation7_spill] sm:$0xff] }
  0x71   : > { %v1293_v54 = vrot.slane %v1291_v19, 4  ;;  %v7164_v28 = vsel %vm7025_vm7, %v5326_v57, %v1284_v18  ;;  %v7168_v56 = vsel %vm7025_vm7, %v1286_v38, %v1287_v4  ;;  %v5328_v32 = vrot.slane %v7145_v50, 9  ;;  %v1196_v18 = vld [vmem:[%s6695_s9 + $0xa8] sm:$0xe]  ;;  %v9545_v38 = vld [vmem:[#allocation11_spill] sm:$0xff] }
  0x72   : > { %v7180_v47 = vsel %vm7025_vm7, %v5327_v26, %v1291_v19  ;;  %v1298_v51 = vrot.slane %v6760_v58, 5  ;;  %v1301_v6 = vrot.slane %v6768_v63, 5  ;;  %v5330_v59 = vrot.slane %v1193_v39, 9  ;;  %v9544_v19 = vld [vmem:[#allocation9_spill] sm:$0xff]  ;;  %v9546_v26 = vld [vmem:[#allocation10_spill] sm:$0xff] }
  0x73   : > { %6105 = vmatmul.mubr.msk.bf16.gmra.mxu0 %vm676_vm3, %v5339_v29  ;;  %v1312_v16 = vrot.slane %v6851_v43, 5  ;;  %v1315_v27 = vrot.slane %v9541_v48, 5  ;;  %v5343_v41 = vcombine.low %v7164_v28, %v7168_v56  ;;  %v7198_v63 = vsel %vm7025_vm7, %v1293_v54, %v1294_v5  ;;  %v9548_v48 = vld [vmem:[#allocation14_spill] sm:$0xff] }
  0x74   : > { %6108 = vmatprep.mubr.msk.bf16.mxu0 %vm676_vm3, %v5340_v49  ;;  %v5329_v1 = vrot.slane %v7174_v44, 9  ;;  %v5331_v4 = vrot.slane %v1194_v40, 9  ;;  %v1319_v15 = vrot.slane %v9542_v10, 5  ;;  %v1300_v5 = vrot.slane %v1298_v51, 4  ;;  %v5433_v57 = vld [vmem:[%s6695_s9 + $0xc] sm:$0xf] }
  0x75   : > { %v7207_v25 = vsel %vm7025_vm7, %v5330_v59, %v1312_v16  ;;  %v1314_v45 = vrot.slane %v1312_v16, 4  ;;  %v1322_v29 = vrot.slane %v9544_v19, 5  ;;  %v5332_v49 = vrot.slane %v1195_v42, 9  ;;  %v9547_v59 = vld [vmem:[#allocation12_spill] sm:$0xff]  ;;  %v9549_v42 = vld [vmem:[#allocation13_spill] sm:$0xff] }
  0x76   : > { %6071 = vmatmul.mubr.msk.bf16.gmra.mxu1 %vm676_vm3, %v5290_v33  ;;  %v1305_v33 = vrot.slane %v6805_v46, 5  ;;  %v7221_v39 = vsel %vm7025_vm7, %v5331_v4, %v1319_v15  ;;  %v1321_v44 = vrot.slane %v1319_v15, 4  ;;  %v1326_v40 = vrot.slane %v9545_v38, 5  ;;  %v9550_v15 = vld [vmem:[#allocation15_spill] sm:$0xff] }
  0x77   : > { %6074 = vmatprep.mubr.msk.bf16.mxu1 %vm676_vm3, %v5291_v30  ;;  %v7217_v54 = vsel %vm7025_vm7, %v1314_v45, %v1315_v27  ;;  %v1329_v16 = vrot.slane %v9547_v59, 5  ;;  %v5333_v45 = vrot.slane %v1196_v18, 9  ;;  %v1333_v4 = vrot.slane %v9548_v48, 5 }
  0x78   : > { %v7231_v27 = vsel %vm7025_vm7, %v1321_v44, %v1322_v29  ;;  %v1336_v50 = vrot.slane %v9550_v15, 5  ;;  %v7241_v19 = vsel %vm7025_vm7, %v5332_v49, %v1326_v40  ;;  %v1328_v7 = vrot.slane %v1326_v40, 4  ;;  %v9551_v29 = vld [vmem:[#allocation16_spill] sm:$0xff]  ;;  %v9552_v15 = vld [vmem:[#allocation5_spill] sm:$0xff]  ;;  %v7256_v49 = vld [vmem:[%s6695_s9 + $0x10] sm:$0xf] }
  0x79   : > { %v7248_v18 = vsel %vm7025_vm7, %v5328_v32, %v1298_v51  ;;  %v7253_v59 = vsel %vm7025_vm7, %v5333_v45, %v1333_v4  ;;  %v1335_v30 = vrot.slane %v1333_v4, 4  ;;  %v5436_v40 = vld [vmem:[%s6695_s9 + $0x18] sm:$0xf]  ;;  %v1307_v20 = vrot.slane %v1305_v33, 4 }
  0x7a   : > { %v2050_v44 = vshrl.u32 %v5433_v57, 16  ;;  %v2053_v32 = vshll.u32 %v5433_v57, 16  ;;  %v5344_v51 = vcombine.low %v7180_v47, %v7198_v63  ;;  %v7271_v45 = vsel %vm7025_vm7, %v1300_v5, %v1301_v6  ;;  %v1197_v57 = vld [vmem:[%s6695_s9 + $0xb4] sm:$0xe]  ;;  %v7292_v47 = vld [vmem:[%s6695_s9 + $0x14] sm:$0x1] }
  0x7b   : > { %6109 = vmatmul.mubr.msk.bf16.gmra.mxu0 %vm676_vm3, %v5341_v60  ;;  %v1308_v60 = vrot.slane %v9552_v15, 5  ;;  %v7286_v11 = vsel %vm7025_vm7, %v5329_v1, %v1305_v33  ;;  %v2059_v6 = vshll.u32 %v7256_v49, 16  ;;  %v5437_v63 = vld [vmem:[%s6695_s9 + $0x1c] sm:$0xf]  ;;  %v2063_v17 = vshrl.u32 %v7256_v49, 16 }
  0x7c   : > { %6112 = vmatprep.mubr.msk.bf16.mxu0 %vm676_vm3, %v5342_v9  ;;  %v7261_v9 = vsel %vm7025_vm7, %v1328_v7, %v1329_v16  ;;  %v7277_v7 = vsel %vm7025_vm7, %v1335_v30, %v1336_v50  ;;  %v2052_v5 = vrot.slane %v2050_v44, 4  ;;  %v2055_v34 = vrot.slane %v2053_v32, 5  ;;  %v5439_v15 = vld [vmem:[%s6695_s9 + $0x24] sm:$0xf]  ;;  %v7305_v44 = vld [vmem:[%s6695_s9 + $0x28] sm:$0xf] }
  0x7d   : > { %v2074_v50 = vshrl.u32 %v5436_v40, 16  ;;  %v1309_v1 = vsel %vm7025_vm7, %v1307_v20, %v1308_v60  ;;  %v5334_v33 = vrot.slane %v1197_v57, 9  ;;  %v7300_v30 = vrot.slane %v2059_v6, 5 }
  0x7e   : > { %6075 = vmatmul.mubr.msk.bf16.gmra.mxu1 %vm676_vm3, %v5292_v52  ;;  %v1340_v52 = vrot.slane %v7004_v37, 5  ;;  %v2077_v16 = vshll.u32 %v5436_v40, 16  ;;  %v1343_v23 = vrot.slane %v7009_v61, 5  ;;  %v2065_v4 = vrot.slane %v2063_v17, 4 }
  0x7f   : > { %6078 = vmatprep.mubr.msk.bf16.mxu1 %vm676_vm3, %v5293_v8  ;;  %v5438_v8 = vld [vmem:[%s6695_s9 + $0x20] sm:$0x1]  ;;  %v2076_v3 = vrot.slane %v2074_v50, 4  ;;  %v2083_v13 = vshll.u32 %v5437_v63, 16  ;;  %v2069_v20 = vshll.u32 %v7292_v47, 16  ;;  %v2087_v57 = vshrl.u32 %v5437_v63, 16 }
  0x80   : > { %v1342_v32 = vrot.slane %v1340_v52, 4  ;;  %v2079_v60 = vrot.slane %v2077_v16, 5  ;;  %v5345_v61 = vcombine.low %v7248_v18, %v7271_v45  ;;  %v5346_v40 = vcombine.low %v7286_v11, %v1309_v1 }
  0x81   : > { %v2056_v6 = vor.u32 %v2055_v34, %v2052_v5  ;;  %v7316_v17 = vrot.slane %v2083_v13, 5  ;;  %v2066_v28 = vor.u32 %v2065_v4, %v7300_v30  ;;  %v2093_v50 = vshll.u32 %v5438_v8, 16  ;;  %v7343_v5 = vld [vmem:[%s6695_s9 + $0x34] sm:$0xf] }
  0x82   : > { %v2080_v56 = vor.u32 %v2079_v60, %v2076_v3  ;;  %v7328_v18 = vsel %vm7025_vm7, %v5334_v33, %v1340_v52  ;;  %v2098_v13 = vshrl.u32 %v5439_v15, 16  ;;  %v2101_v45 = vshll.u32 %v5439_v15, 16  ;;  %v5442_v52 = vld [vmem:[%s6695_s9 + $0x30] sm:$0xf] }
  0x83   : > { %6113 = vmatmul.mubr.msk.bf16.gmra.mxu0 %vm676_vm3, %v5343_v41  ;;  %v2089_v41 = vrot.slane %v2087_v57, 4  ;;  %v2107_v11 = vshll.u32 %v7305_v44, 16  ;;  %v9554_v3 = vcombine.low %v6714_v12, %v6718_v14  ;;  %v7337_v4 = vsel %vm7025_vm7, %v1342_v32, %v1343_v23 }
  0x84   : > { %6116 = vmatprep.mubr.msk.bf16.mxu0 %vm676_vm3, %v5344_v51  ;;  %v9553_v51 = vcombine.low %v6980_v62, %v6987_v55  ;;  %v2071_v62 = vrot.slane %v2069_v20, 5  ;;  %v2111_v63 = vshrl.u32 %v7305_v44, 16  ;;  %v2057_v34 = vrot.slane %v2056_v6, 4 }
  0x85   : > { %v2090_v55 = vor.u32 %v2089_v41, %v7316_v17  ;;  %v2100_v8 = vrot.slane %v2098_v13, 4  ;;  %v2103_v1 = vrot.slane %v2101_v45, 5  ;;  %v7345_v33 = vrot.slane %v2107_v11, 5  ;;  %v7351_v41 = vld [vmem:[%s6695_s9 + $0x38] sm:$0x1] }
  0x86   : > { %6079 = vmatmul.mubr.msk.bf16.gmra.mxu1 %vm676_vm3, %v9553_v51  ;;  %v2067_v12 = vrot.slane %v2066_v28, 4  ;;  %v2081_v14 = vrot.slane %v2080_v56, 4  ;;  %v2095_v16 = vrot.slane %v2093_v50, 5  ;;  %v2113_v23 = vrot.slane %v2111_v63, 4  ;;  %v5445_v13 = vld [vmem:[%s6695_s9 + $0x3c] sm:$0xf] }
  0x87   : > { %6082 = vmatprep.mubr.msk.bf16.mxu1 %vm676_vm3, %v9554_v3  ;;  %v2091_v15 = vrot.slane %v2090_v55, 4  ;;  %v2117_v32 = vshll.u32 %v7320_v21, 16  ;;  %v2122_v20 = vshrl.u32 %v5442_v52, 16  ;;  %v2125_v60 = vshll.u32 %v5442_v52, 16 }
  0x88   : > { %v2104_v57 = vor.u32 %v2103_v1, %v2100_v8  ;;  %v2114_v6 = vor.u32 %v2113_v23, %v7345_v33  ;;  %v2131_v28 = vshll.u32 %v7343_v5, 16  ;;  %v2135_v56 = vshrl.u32 %v7343_v5, 16  ;;  %v5448_v8 = vld [vmem:[%s6695_s9 + $0x48] sm:$0xf]  ;;  %v7378_v1 = vld [vmem:[%s6695_s9 + $0x4c] sm:$0xf] }
  0x89   : > { %v2124_v50 = vrot.slane %v2122_v20, 4  ;;  %v2127_v51 = vrot.slane %v2125_v60, 5  ;;  %v9555_v3 = vcombine.low %v6756_v53, %v6760_v58  ;;  %v5351_v55 = vcombine.low %v7328_v18, %v7337_v4 }
  0x8a   : > { %v7357_v45 = vrot.slane %v2131_v28, 5  ;;  %v2137_v11 = vrot.slane %v2135_v56, 4  ;;  %v2072_v63 = vsel %vm6739_vm4, %v2067_v12, %v2071_v62  ;;  %v2086_v52 = vsel %vm6739_vm4, %v2081_v14, %v7316_v17 }
  0x8b   : > { %6117 = vmatmul.mubr.msk.bf16.gmra.mxu0 %vm676_vm3, %v5345_v61  ;;  %v7360_v61 = vld [vmem:[%s6695_s9 + $0x40] sm:$0xf]  ;;  %v9556_v53 = vcombine.low %v6794_v35, %v6805_v46  ;;  %v2096_v58 = vsel %vm6739_vm4, %v2091_v15, %v2095_v16  ;;  %v2105_v23 = vrot.slane %v2104_v57, 4  ;;  %v2128_v20 = vor.u32 %v2127_v51, %v2124_v50  ;;  %v7412_v50 = vld [vmem:[%s6695_s9 + $0x44] sm:$0x1] }
  0x8c   : > { %6120 = vmatprep.mubr.msk.bf16.mxu0 %vm676_vm3, %v5346_v40  ;;  %v2062_v40 = vsel %vm6739_vm4, %v2057_v34, %v7300_v30  ;;  %v2115_v30 = vrot.slane %v2114_v6, 4  ;;  %v2119_v34 = vrot.slane %v2117_v32, 5  ;;  %v2141_v62 = vshll.u32 %v7351_v41, 16  ;;  %v5451_v51 = vld [vmem:[%s6695_s9 + $0x54] sm:$0xf] }
  0x8d   : > { %v2146_v12 = vshrl.u32 %v5445_v13, 16  ;;  %v2149_v17 = vshll.u32 %v5445_v13, 16  ;;  %v7389_v14 = vsel %vm725_vm0, %v7120_v22, 0  ;;  %v2138_v35 = vor.u32 %v2137_v11, %v7357_v45 }
  0x8e   : > { %6083 = vmatmul.mubr.msk.bf16.gmra.mxu1 %vm676_vm3, %v9555_v3  ;;  %v2155_v46 = vshll.u32 %v7360_v61, 16  ;;  %v2159_v16 = vshrl.u32 %v7360_v61, 16  ;;  %v7394_v15 = vcombine.low %v2062_v40, %v2072_v63  ;;  %v7398_v32 = vsel %vm725_vm0, %v7092_v24, 0  ;;  %v7421_v40 = vld [vmem:[%s6695_s9 + $0x58] sm:$0xf] }
  0x8f   : > { %6086 = vmatprep.mubr.msk.bf16.mxu1 %vm676_vm3, %v9556_v53  ;;  %v2170_v60 = vshrl.u32 %v5448_v8, 16  ;;  %v2173_v57 = vshll.u32 %v5448_v8, 16  ;;  %v9557_v6 = vcombine.low %v7207_v25, %v7217_v54  ;;  %v7404_v22 = vcombine.low %v2086_v52, %v2096_v58  ;;  %v7426_v8 = vld [vmem:[%s6695_s9 + $0x50] sm:$0x1] }
  0x90   : > { %v2110_v28 = vsel %vm6739_vm4, %v2105_v23, %v7345_v33  ;;  %v2120_v56 = vsel %vm6739_vm4, %v2115_v30, %v2119_v34  ;;  %v2179_v24 = vshll.u32 %v7378_v1, 16  ;;  %v9558_v25 = vcombine.low %v7221_v39, %v7231_v27  ;;  %v5454_v34 = vld [vmem:[%s6695_s9 + $0x60] sm:$0xf] }
  0x91   : > { %v2129_v54 = vrot.slane %v2128_v20, 4  ;;  %v2143_v13 = vrot.slane %v2141_v62, 5  ;;  %v2148_v11 = vrot.slane %v2146_v12, 4  ;;  %v2151_v3 = vrot.slane %v2149_v17, 5 }
  0x92   : > { %v2139_v33 = vrot.slane %v2138_v35, 4  ;;  %v7423_v63 = vrot.slane %v2155_v46, 5  ;;  %v2161_v52 = vrot.slane %v2159_v16, 4  ;;  %v2183_v53 = vshrl.u32 %v7378_v1, 16  ;;  %v7443_v35 = vld [vmem:[%s6695_s9 + $0x5c] sm:$0x1] }
  0x93   : > { %6121 = vmatmul.mubr.msk.bf16.gmra.mxu0 %vm676_vm3, %v9557_v6  ;;  %v9559_v39 = vcombine.low %v6844_v36, %v6851_v43  ;;  %v2172_v27 = vrot.slane %v2170_v60, 4  ;;  %v2175_v58 = vrot.slane %v2173_v57, 5  ;;  %v2194_v23 = vshrl.u32 %v5451_v51, 16 }
  0x94   : > { %6124 = vmatprep.mubr.msk.bf16.mxu0 %vm676_vm3, %v9558_v25  ;;  %v2197_v30 = vshll.u32 %v5451_v51, 16  ;;  %v9560_v20 = vcombine.low %v9543_v2, %v9542_v10  ;;  %v7438_v62 = vcombine.low %v2110_v28, %v2120_v56  ;;  %v7440_v12 = vrot.slane %v2179_v24, 5  ;;  %v7456_v28 = vld [vmem:[%s6695_s9 + $0x64] sm:$0xf] }
  0x95   : > { %v2185_v17 = vrot.slane %v2183_v53, 4  ;;  %v2203_v36 = vshll.u32 %v7421_v40, 16  ;;  %v2165_v43 = vshll.u32 %v7412_v50, 16  ;;  %v2196_v46 = vrot.slane %v2194_v23, 4 }
  0x96   : > { %6087 = vmatmul.mubr.msk.bf16.gmra.mxu1 %vm676_vm3, %v9559_v39  ;;  %v2199_v16 = vrot.slane %v2197_v30, 5  ;;  %v2207_v60 = vshrl.u32 %v7421_v40, 16  ;;  %v2134_v10 = vsel %vm6739_vm4, %v2129_v54, %v7357_v45  ;;  %v2144_v2 = vsel %vm6739_vm4, %v2139_v33, %v2143_v13  ;;  %v7478_v30 = vld [vmem:[%s6695_s9 + $0x68] sm:$0x1] }
  0x97   : > { %6090 = vmatprep.mubr.msk.bf16.mxu1 %vm676_vm3, %v9560_v20  ;;  %v2152_v57 = vor.u32 %v2151_v3, %v2148_v11  ;;  %v7453_v6 = vrot.slane %v2203_v36, 5  ;;  %v2162_v56 = vor.u32 %v2161_v52, %v7423_v63  ;;  %v2176_v24 = vor.u32 %v2175_v58, %v2172_v27  ;;  %v5457_v3 = vld [vmem:[%s6695_s9 + $0x6c] sm:$0xf]  ;;  %v7475_v27 = vld [vmem:[%s6695_s9 + $0x70] sm:$0xf] }
  0x98   : > { %v2189_v51 = vshll.u32 %v7426_v8, 16  ;;  %v2209_v25 = vrot.slane %v2207_v60, 4  ;;  %v9561_v53 = vcombine.low %v7241_v19, %v7261_v9  ;;  %v2186_v45 = vor.u32 %v2185_v17, %v7440_v12 }
  0x99   : > { %v2200_v54 = vor.u32 %v2199_v16, %v2196_v46  ;;  %v2218_v13 = vshrl.u32 %v5454_v34, 16  ;;  %v2221_v11 = vshll.u32 %v5454_v34, 16  ;;  %v9562_v33 = vcombine.low %v7253_v59, %v7277_v7  ;;  %v5460_v16 = vld [vmem:[%s6695_s9 + $0x78] sm:$0xf] }
  0x9a   : > { %v2210_v52 = vor.u32 %v2209_v25, %v7453_v6  ;;  %v2213_v39 = vshll.u32 %v7443_v35, 16  ;;  %v2227_v19 = vshll.u32 %v7456_v28, 16  ;;  %v2231_v9 = vshrl.u32 %v7456_v28, 16 }
  0x9b   : > { %6125 = vmatmul.mubr.msk.bf16.gmra.mxu0 %vm676_vm3, %v9561_v53  ;;  %v2153_v58 = vrot.slane %v2152_v57, 4  ;;  %v2167_v23 = vrot.slane %v2165_v43, 5  ;;  %v2220_v34 = vrot.slane %v2218_v13, 4  ;;  %v2223_v20 = vrot.slane %v2221_v11, 5 }
  0x9c   : > { %6128 = vmatprep.mubr.msk.bf16.mxu0 %vm676_vm3, %v9562_v33  ;;  %v9563_v59 = vcombine.low %v9546_v26, %v9545_v38  ;;  %v7484_v7 = vcombine.low %v2134_v10, %v2144_v2  ;;  %v2163_v17 = vrot.slane %v2162_v56, 4  ;;  %v2177_v36 = vrot.slane %v2176_v24, 4  ;;  %v7494_v2 = vld [vmem:[%s6695_s9 + $0x7c] sm:$0xf] }
  0x9d   : > { %v7486_v46 = vrot.slane %v2227_v19, 5  ;;  %v9564_v43 = vcombine.low %v9549_v42, %v9548_v48  ;;  %v2187_v60 = vrot.slane %v2186_v45, 4  ;;  %v2191_v57 = vrot.slane %v2189_v51, 5  ;;  %9565 = vst [vmem:[#allocation6_spill] sm:$0xff] %v7494_v2  ;;  %v5463_v19 = vld [vmem:[%s6695_s9 + $0x84] sm:$0xf] }
  0x9e   : > { %6091 = vmatmul.mubr.msk.bf16.gmra.mxu1 %vm676_vm3, %v9563_v59  ;;  %v2201_v25 = vrot.slane %v2200_v54, 4  ;;  %v2233_v38 = vrot.slane %v2231_v9, 4  ;;  %v2211_v26 = vrot.slane %v2210_v52, 4  ;;  %v2215_v53 = vrot.slane %v2213_v39, 5 }
  0x9f   : > { %6094 = vmatprep.mubr.msk.bf16.mxu1 %vm676_vm3, %v9564_v43  ;;  %v2224_v13 = vor.u32 %v2223_v20, %v2220_v34  ;;  %v2242_v10 = vshrl.u32 %v5457_v3, 16  ;;  %v2158_v56 = vsel %vm6739_vm4, %v2153_v58, %v7423_v63  ;;  %v2245_v24 = vshll.u32 %v5457_v3, 16  ;;  %v6422_v63 = vld [vmem:[%s6695_s9 + $0xc] sm:$0xff]   ;;  %v7528_v34 = vld [vmem:[%s6695_s9 + $0x88] sm:$0xf] }
  0xa0   : > { %v2251_v48 = vshll.u32 %v7475_v27, 16  ;;  %v2255_v42 = vshrl.u32 %v7475_v27, 16  ;;  %v2168_v51 = vsel %vm6739_vm4, %v2163_v17, %v2167_v23  ;;  %v2182_v45 = vsel %vm6739_vm4, %v2177_v36, %v7440_v12  ;;  %9566 = vst [vmem:[#allocation8_spill] sm:$0xff] %v7528_v34  ;;  %v7537_v36 = vld [vmem:[%s6695_s9 + $0x74] sm:$0x1] }
  0xa1   : > { %v2234_v54 = vor.u32 %v2233_v38, %v7486_v46  ;;  %v2237_v11 = vshll.u32 %v7478_v30, 16  ;;  %v2192_v3 = vsel %vm6739_vm4, %v2187_v60, %v2191_v57  ;;  %v2206_v33 = vsel %vm6739_vm4, %v2201_v25, %v7453_v6  ;;  %9568 = vst [vmem:[#allocation7_spill] sm:$0xff] %v7537_v36  ;;  %v7547_v38 = vld [vmem:[%s6695_s9 + $0x80] sm:$0x1] }
  0xa2   : > { %v2266_v52 = vshrl.u32 %v5460_v16, 16  ;;  %v2269_v12 = vshll.u32 %v5460_v16, 16  ;;  %v2216_v18 = vsel %vm6739_vm4, %v2211_v26, %v2215_v53  ;;  %v2225_v4 = vrot.slane %v2224_v13, 4  ;;  %9569 = vst [vmem:[#allocation9_spill] sm:$0xff] %v7547_v38  ;;  %v7550_v26 = vld [vmem:[%s6695_s9 + $0x8c] sm:$0x1] }
  0xa3   : > { %6129 = vmatmul.mubr.msk.bf16.gmra.mxu0 %vm676_vm3, %v5351_v55  ;;  %v2244_v55 = vrot.slane %v2242_v10, 4  ;;  %v2275_v39 = vshll.u32 %v7494_v2, 16  ;;  %v2247_v9 = vrot.slane %v2245_v24, 5  ;;  %v7524_v58 = vrot.slane %v2251_v48, 5  ;;  %9570 = vst [vmem:[#allocation11_spill] sm:$0xff] %v7550_v26  ;;  %v6423_v10 = vld [vmem:[%s6695_s9 + $0x18] sm:$0xff]  }
  0xa4   : > { %6168 = vmatprep.mubr.msk.bf16.mxu0 %vm676_vm3, %v7394_v15  ;;  %v2257_v23 = vrot.slane %v2255_v42, 4  ;;  %v2279_v6 = vshrl.u32 %v7494_v2, 16  ;;  %v9567_v15 = vcombine.low %v9551_v29, %v7004_v37  ;;  %v7534_v20 = vcombine.low %v2158_v56, %v2168_v51  ;;  %v5466_v51 = vld [vmem:[%s6695_s9 + $0x90] sm:$0xf] }
  0xa5   : > { %v2235_v59 = vrot.slane %v2234_v54, 4  ;;  %v2239_v17 = vrot.slane %v2237_v11, 5  ;;  %v2268_v16 = vrot.slane %v2266_v52, 4  ;;  %v2271_v43 = vrot.slane %v2269_v12, 5 }
  0xa6   : > { %6095 = vmatmul.mubr.msk.bf16.gmra.mxu1 %vm676_vm3, %v9567_v15  ;;  %v7540_v60 = vrot.slane %v2275_v39, 5  ;;  %v2281_v57 = vrot.slane %v2279_v6, 4  ;;  %v2290_v25 = vshrl.u32 %v5463_v19, 16  ;;  %v7542_v37 = vcombine.low %v2182_v45, %v2192_v3  ;;  %v7561_v45 = vld [vmem:[%s6695_s9 + $0x94] sm:$0xf] }
  0xa7   : > { %6134 = vmatprep.mubr.msk.bf16.mxu1 %vm676_vm3, %v6422_v63  ;;  %v7544_v29 = vcombine.low %v2206_v33, %v2216_v18  ;;  %v2293_v53 = vshll.u32 %v5463_v19, 16  ;;  %v2299_v13 = vshll.u32 %v7528_v34, 16  ;;  %v2230_v56 = vsel %vm6739_vm4, %v2225_v4, %v7486_v46  ;;  %9571 = vst [vmem:[#allocation10_spill] sm:$0xff] %v7561_v45  ;;  %v7569_v33 = vld [vmem:[%s9483_s1 + $0x10] sm:$0x3]  ;;  %v6424_v46 = vld [vmem:[%s6695_s9 + $0x24] sm:$0xff]  }
  0xa8   : > { %v2248_v24 = vor.u32 %v2247_v9, %v2244_v55  ;;  %v2258_v48 = vor.u32 %v2257_v23, %v7524_v58  ;;  %v2261_v42 = vshll.u32 %v7537_v36, 16  ;;  %v2292_v54 = vrot.slane %v2290_v25, 4  ;;  %9572 = vst [vmem:[#allocation12_spill] sm:$0xff] %v7569_v33 }
  0xa9   : > { %v2295_v11 = vrot.slane %v2293_v53, 5  ;;  %v7563_v63 = vrot.slane %v2299_v13, 5  ;;  %v2303_v3 = vshrl.u32 %v7528_v34, 16  ;;  %v2240_v52 = vsel %vm6739_vm4, %v2235_v59, %v2239_v17 }
  0xaa   : > { %v2272_v12 = vor.u32 %v2271_v43, %v2268_v16  ;;  %v2282_v18 = vor.u32 %v2281_v57, %v7540_v60  ;;  %v2285_v4 = vshll.u32 %v7547_v38, 16  ;;  %v2314_v19 = vshrl.u32 %v5466_v51, 16  ;;  %v7603_v57 = vld [vmem:[%s6695_s9 + $0xa0] sm:$0xf] }
  0xab   : > { %6169 = vmatmul.mubr.msk.bf16.vlgmr.msra.gmra.mxu0 %vm676_vm3, %v7404_v22  ;;  %v2296_v55 = vor.u32 %v2295_v11, %v2292_v54  ;;  %v2305_v39 = vrot.slane %v2303_v3, 4  ;;  %v2317_v9 = vshll.u32 %v5466_v51, 16  ;;  %v5469_v22 = vld [vmem:[%s6695_s9 + $0x9c] sm:$0xf]  ;;  %v7582_v23 = vrot.slane %v2248_v24, 4  ;;  %9574 = vst [vmem:[#allocation13_spill] sm:$0xff] %v7603_v57 }
  0xac   : > { %6235 = vmatpush3.bf16.msra.mxu0 %v7398_v32  ;;  %6172 = vmatprep.mubr.msk.bf16.mxu0 %vm676_vm3, %v7438_v62  ;;  %v7584_v6 = vrot.slane %v2261_v42, 5  ;;  %v2309_v15 = vshll.u32 %v7550_v26, 16  ;;  %v2323_v59 = vshll.u32 %v7561_v45, 16  ;;  %v7591_v32 = vld [vmem:[%s9483_s1 + $0xe] sm:$0x3]  ;;  %v7596_v62 = vcombine.low %v2230_v56, %v2240_v52 }
  0xad   : > { %9573 = vst [vmem:[#allocation14_spill] sm:$0xff] %v7591_v32  ;;  %6347 = vmatprep.subr.msk.bf16.mxu0 %vm725_vm0, %v7569_v33  ;;  %v7598_v17 = vrot.slane %v2258_v48, 4  ;;  %v2306_v16 = vor.u32 %v2305_v39, %v7563_v63  ;;  %v2327_v43 = vshrl.u32 %v7561_v45, 16  ;;  %v7607_v25 = vrot.slane %v2272_v12, 4  ;;  %v7616_v56 = vld [vmem:[%s6695_s9 + $0x98] sm:$0x1] }
  0xae   : > { %6135 = vmatmul.mubr.msk.bf16.vlgmr.msra.gmra.mxu1 %vm676_vm3, %v6423_v10  ;;  %v7609_v53 = vrot.slane %v2282_v18, 4  ;;  %v7611_v13 = vrot.slane %v2285_v4, 5  ;;  %v7613_v10 = vrot.slane %v2296_v55, 4  ;;  %9575 = vst [vmem:[#allocation15_spill] sm:$0xff] %v7616_v56  ;;  %v2316_v24 = vrot.slane %v2314_v19, 4  ;;  %v6426_v19 = vld [vmem:[%s6695_s9 + $0x3c] sm:$0xff]  }
  0xaf   : > { %6201 = vmatpush3.bf16.msra.mxu1 %v7389_v14  ;;  %6138 = vmatprep.mubr.msk.bf16.mxu1 %vm676_vm3, %v6424_v46  ;;  %v2319_v48 = vrot.slane %v2317_v9, 5  ;;  %v2338_v42 = vshrl.u32 %v5469_v22, 16  ;;  %v2341_v51 = vshll.u32 %v5469_v22, 16  ;;  %v6425_v14 = vld [vmem:[%s6695_s9 + $0x30] sm:$0xff]   ;;  %v7625_v11 = vrot.slane %v2309_v15, 5 }
  0xb0   : > { %6346 = vmatprep.subr.msk.bf16.mxu1 %vm725_vm0, %v7591_v32  ;;  %v7627_v3 = vrot.slane %v2323_v59, 5  ;;  %v2347_v46 = vshll.u32 %v7603_v57, 16  ;;  %v5472_v52 = vld [vmem:[%s6695_s9 + $0xa8] sm:$0xf]  ;;  %v7631_v12 = vrot.slane %v2306_v16, 4  ;;  %v2329_v18 = vrot.slane %v2327_v43, 4 }
  0xb1   : > { %v2333_v4 = vshll.u32 %v7616_v56, 16  ;;  %v2351_v55 = vshrl.u32 %v7603_v57, 16  ;;  %v7636_v39 = vld [vmem:[%s6695_s9 + $0xac] sm:$0xf]  ;;  %v2320_v59 = vor.u32 %v2319_v48, %v2316_v24  ;;  %v7660_v16 = vld [vmem:[%s6695_s9 + $0xa4] sm:$0x1] }
  0xb2   : > { %9576 = vst [vmem:[#allocation16_spill] sm:$0xff] %v7636_v39  ;;  %9577 = vst [vmem:[#allocation5_spill] sm:$0xff] %v7660_v16  ;;  %v2340_v43 = vrot.slane %v2338_v42, 4  ;;  %v2343_v22 = vrot.slane %v2341_v51, 5  ;;  %v2362_v54 = vshrl.u32 %v5472_v52, 16  ;;  %v7662_v9 = vrot.slane %v2347_v46, 5 }
  0xb3   : > { %6173 = vmatmul.mubr.msk.bf16.gmra.mxu0 %vm676_vm3, %v7484_v7  ;;  %v2353_v32 = vrot.slane %v2351_v55, 4  ;;  %v2365_v15 = vshll.u32 %v5472_v52, 16  ;;  %v2371_v33 = vshll.u32 %v7636_v39, 16  ;;  %v5475_v57 = vld [vmem:[%s6695_s9 + $0xb4] sm:$0xf]  ;;  %v2330_v24 = vor.u32 %v2329_v18, %v7627_v3 }
  0xb4   : > { %6176 = vmatprep.mubr.msk.bf16.mxu0 %vm676_vm3, %v7534_v20  ;;  %v2312_v20 = vsel %vm6739_vm4, %v7631_v12, %v7625_v11  ;;  %v7672_v48 = vrot.slane %v2333_v4, 5  ;;  %v7675_v42 = vld [vmem:[%s6695_s9 + $0xb0] sm:$0x1]  ;;  %v2364_v51 = vrot.slane %v2362_v54, 4  ;;  %v7678_v46 = vld [vmem:[%s6695_s9 + $0xb8] sm:$0xf]  ;;  %v2344_v18 = vor.u32 %v2343_v22, %v2340_v43 }
  0xb5   : > { %9578 = vst [vmem:[#allocation17_spill] sm:$0xff] %v7675_v42  ;;  %9579 = vst [vmem:[#allocation18_spill] sm:$0xff] %v7678_v46  ;;  %v2367_v52 = vrot.slane %v2365_v15, 5  ;;  %v7682_v55 = vrot.slane %v2371_v33, 5  ;;  %v2375_v11 = vshrl.u32 %v7636_v39, 16  ;;  %v7685_v12 = vrot.slane %v2320_v59, 4 }
  0xb6   : > { %6139 = vmatmul.mubr.msk.bf16.gmra.mxu1 %vm676_vm3, %v6425_v14  ;;  %v2357_v14 = vshll.u32 %v7660_v16, 16  ;;  %v7688_v4 = vld [vmem:[%s6695_s9 + $0xbc] sm:$0x1]  ;;  %v2386_v54 = vshrl.u32 %v5475_v57, 16  ;;  %v2389_v7 = vshll.u32 %v5475_v57, 16  ;;  %v2354_v56 = vor.u32 %v2353_v32, %v7662_v9  ;;  %v6427_v16 = vld [vmem:[%s6695_s9 + $0x48] sm:$0xff]  }
  0xb7   : > { %6142 = vmatprep.mubr.msk.bf16.mxu1 %vm676_vm3, %v6426_v19  ;;  %v2377_v45 = vrot.slane %v2375_v11, 4  ;;  %v2381_v19 = vshll.u32 %v7675_v42, 16  ;;  %v2395_v15 = vshll.u32 %v7678_v46, 16  ;;  %v5478_v33 = vld [vmem:[%s6695_s9 + $0xc0] sm:$0xf]  ;;  %v2368_v26 = vor.u32 %v2367_v52, %v2364_v51  ;;  %v6428_v57 = vld [vmem:[%s6695_s9 + $0x54] sm:$0xff]  }
  0xb8   : > { %v2388_v39 = vrot.slane %v2386_v54, 4  ;;  %v2391_v34 = vrot.slane %v2389_v7, 5  ;;  %v2399_v59 = vshrl.u32 %v7678_v46, 16  ;;  %v7697_v22 = vld [vmem:[%s6695_s9 + $0xc4] sm:$0xf]  ;;  %v2331_v43 = vrot.slane %v2330_v24, 4 }
  0xb9   : > { %v2359_v32 = vrot.slane %v2357_v14, 5  ;;  %v2378_v11 = vor.u32 %v2377_v45, %v7682_v55  ;;  %v2397_v42 = vrot.slane %v2395_v15, 5  ;;  %v2405_v7 = vshll.u32 %v7688_v4, 16  ;;  %v7709_v45 = vld [vmem:[%s6695_s9 + $0xc8] sm:$0x1] }
  0xba   : > { %v2392_v51 = vor.u32 %v2391_v34, %v2388_v39  ;;  %v2401_v52 = vrot.slane %v2399_v59, 4  ;;  %v2410_v54 = vshrl.u32 %v5478_v33, 16  ;;  %v2345_v46 = vrot.slane %v2344_v18, 4 }
  0xbb   : > { %6177 = vmatmul.mubr.msk.bf16.gmra.mxu0 %vm676_vm3, %v7542_v37  ;;  %v2355_v38 = vrot.slane %v2354_v56, 4  ;;  %v2413_v2 = vshll.u32 %v5478_v33, 16  ;;  %v2419_v37 = vshll.u32 %v7697_v22, 16  ;;  %v2369_v24 = vrot.slane %v2368_v26, 4 }
  0xbc   : > { %6180 = vmatprep.mubr.msk.bf16.mxu0 %vm676_vm3, %v7544_v29  ;;  %v2383_v14 = vrot.slane %v2381_v19, 5  ;;  %v2402_v36 = vor.u32 %v2401_v52, %v2397_v42  ;;  %v2412_v15 = vrot.slane %v2410_v54, 4  ;;  %v2379_v34 = vrot.slane %v2378_v11, 4 }
  0xbd   : > { %v2415_v29 = vrot.slane %v2413_v2, 5  ;;  %v7712_v39 = vrot.slane %v2419_v37, 5  ;;  %v2423_v56 = vshrl.u32 %v7697_v22, 16  ;;  %v9580_v26 = vsel %vm6739_vm4, %v7598_v17, %v7584_v6 }
  0xbe   : > { %6143 = vmatmul.mubr.msk.bf16.gmra.mxu1 %vm676_vm3, %v6427_v16  ;;  %v9581_v16 = vsel %vm6739_vm4, %v7582_v23, %v7524_v58  ;;  %v2393_v19 = vrot.slane %v2392_v51, 4  ;;  %v2403_v33 = vrot.slane %v2402_v36, 4  ;;  %v2407_v2 = vrot.slane %v2405_v7, 5  ;;  %v6429_v23 = vld [vmem:[%s6695_s9 + $0x60] sm:$0xff]  }
  0xbf   : > { %6146 = vmatprep.mubr.msk.bf16.mxu1 %vm676_vm3, %v6428_v57  ;;  %v5490_v18 = vcombine.low %v9581_v16, %v9580_v26  ;;  %v9582_v59 = vsel %vm6739_vm4, %v7609_v53, %v7611_v13  ;;  %v9583_v6 = vsel %vm6739_vm4, %v7607_v25, %v7540_v60  ;;  %v2416_v57 = vor.u32 %v2415_v29, %v2412_v15  ;;  %v5516_v13 = vld [vmem:[%s6695_s9 + $0x24] sm:$0xe]  ;;  %v5519_v26 = vld [vmem:[%s6695_s9 + $0x48] sm:$0xe] }
  0xc0   : > { %v5491_v17 = vcombine.low %v9583_v6, %v9582_v59  ;;  %v2425_v11 = vrot.slane %v2423_v56, 4  ;;  %v2429_v58 = vshll.u32 %v7709_v45, 16  ;;  %v9584_v36 = vsel %vm6739_vm4, %v7613_v10, %v7563_v63  ;;  %v6430_v63 = vld [vmem:[%s6695_s9 + $0x6c] sm:$0xff]   ;;  %v5520_v6 = vld [vmem:[%s6695_s9 + $0x54] sm:$0xe] }
  0xc1   : > { %v5492_v51 = vcombine.low %v9584_v36, %v2312_v20  ;;  %v2326_v53 = vsel %vm6739_vm4, %v7685_v12, %v7627_v3  ;;  %v2336_v60 = vsel %vm6739_vm4, %v2331_v43, %v7672_v48  ;;  %v2350_v25 = vsel %vm6739_vm4, %v2345_v46, %v7662_v9  ;;  %v7765_v12 = vld [vmem:[%s6695_s9 + $0xc] sm:$0xe] }
  0xc2   : > { %v2360_v10 = vsel %vm6739_vm4, %v2355_v38, %v2359_v32  ;;  %v2374_v3 = vsel %vm6739_vm4, %v2369_v24, %v7682_v55  ;;  %v2384_v20 = vsel %vm6739_vm4, %v2379_v34, %v2383_v14  ;;  %v2426_v48 = vor.u32 %v2425_v11, %v7712_v39  ;;  %v5517_v55 = vld [vmem:[%s6695_s9 + $0x30] sm:$0xe]  ;;  %v5518_v14 = vld [vmem:[%s6695_s9 + $0x3c] sm:$0xe] }
  0xc3   : > { %6181 = vmatmul.mubr.msk.bf16.gmra.mxu0 %vm676_vm3, %v7596_v62  ;;  %v2398_v62 = vsel %vm6739_vm4, %v2393_v19, %v2397_v42  ;;  %v2408_v38 = vsel %vm6739_vm4, %v2403_v33, %v2407_v2  ;;  %v7772_v9 = vrot.slane %v2416_v57, 4  ;;  %v2793_v46 = vrot.slane %v7256_v49, 5  ;;  %v6431_v57 = vld [vmem:[%s6695_s9 + $0x78] sm:$0xff]  }
  0xc4   : > { %6184 = vmatprep.mubr.msk.bf16.mxu0 %vm676_vm3, %v5490_v18  ;;  %v7776_v43 = vcombine.low %v2326_v53, %v2336_v60  ;;  %v7778_v32 = vrot.slane %v2426_v48, 4  ;;  %v7780_v52 = vrot.slane %v2429_v58, 5  ;;  %v5532_v7 = vrot.slane %v5516_v13, 9  ;;  %v6432_v53 = vld [vmem:[%s6695_s9 + $0x84] sm:$0xff]   ;;  %v5521_v13 = vld [vmem:[%s6695_s9 + $0x60] sm:$0xe] }
  0xc5   : > { %v7783_v54 = vcombine.low %v2350_v25, %v2360_v10  ;;  %v7785_v42 = vcombine.low %v2374_v3, %v2384_v20  ;;  %v5530_v37 = vrot.slane %v7765_v12, 9  ;;  %v2807_v24 = vrot.slane %v7305_v44, 5  ;;  %v6438_v49 = vld [vmem:[%s6695_s9 + $0x18] sm:$0xff]  }
  0xc6   : > { %6147 = vmatmul.mubr.msk.bf16.gmra.mxu1 %vm676_vm3, %v6429_v23  ;;  %v7791_v15 = vcombine.low %v2398_v62, %v2408_v38  ;;  %v2796_v34 = vrot.slane %v7292_v47, 5  ;;  %v2810_v29 = vrot.slane %v7320_v21, 5  ;;  %v5533_v56 = vrot.slane %v5517_v55, 9  ;;  %v5523_v55 = vld [vmem:[%s6695_s9 + $0x78] sm:$0xe] }
  0xc7   : > { %6150 = vmatprep.mubr.msk.bf16.mxu1 %vm676_vm3, %v6430_v63  ;;  %v2422_v16 = vsel %vm6739_vm4, %v7772_v9, %v7712_v39  ;;  %v7802_v44 = vrot.slane %v2793_v46, 4  ;;  %v7806_v18 = vsel %vm7025_vm7, %v5532_v7, %v2807_v24  ;;  %v2809_v19 = vrot.slane %v2807_v24, 4 }
  0xc8   : > { %v2432_v21 = vsel %vm6739_vm4, %v7778_v32, %v7780_v52  ;;  %v2814_v33 = vrot.slane %v7343_v5, 5  ;;  %v2817_v2 = vrot.slane %v7351_v41, 5  ;;  %v5534_v59 = vrot.slane %v5518_v14, 9  ;;  %v6437_v52 = vld [vmem:[%s6695_s9 + $0xc0] sm:$0xff]  }
  0xc9   : > { %v7818_v11 = vsel %vm7025_vm7, %v2809_v19, %v2810_v29  ;;  %v2821_v58 = vrot.slane %v7360_v61, 5  ;;  %v2824_v23 = vrot.slane %v7412_v50, 5  ;;  %v5535_v36 = vrot.slane %v5519_v26, 9  ;;  %v5524_v19 = vld [vmem:[%s6695_s9 + $0x84] sm:$0xe] }
  0xca   : > { %v5549_v5 = vcombine.low %v7806_v18, %v7818_v11  ;;  %v7828_v41 = vsel %vm7025_vm7, %v5533_v56, %v2814_v33  ;;  %v2816_v60 = vrot.slane %v2814_v33, 4  ;;  %v2828_v25 = vrot.slane %v7378_v1, 5 }
  0xcb   : > { %6185 = vmatmul.mubr.msk.bf16.gmra.mxu0 %vm676_vm3, %v5491_v17  ;;  %v7835_v61 = vsel %vm7025_vm7, %v5534_v59, %v2821_v58  ;;  %v2823_v50 = vrot.slane %v2821_v58, 4  ;;  %v2831_v17 = vrot.slane %v7426_v8, 5  ;;  %v5536_v63 = vrot.slane %v5520_v6, 9  ;;  %v9585_v59 = vld [vmem:[#allocation7_spill] sm:$0xff] }
  0xcc   : > { %6188 = vmatprep.mubr.msk.bf16.mxu0 %vm676_vm3, %v5492_v51  ;;  %v7840_v10 = vsel %vm7025_vm7, %v2816_v60, %v2817_v2  ;;  %v7844_v3 = vsel %vm7025_vm7, %v5535_v36, %v2828_v25  ;;  %v2830_v1 = vrot.slane %v2828_v25, 4  ;;  %v2835_v20 = vrot.slane %v7421_v40, 5  ;;  %v5522_v51 = vld [vmem:[%s6695_s9 + $0x6c] sm:$0xe]  ;;  %v6433_v58 = vld [vmem:[%s6695_s9 + $0x90] sm:$0xff]  }
  0xcd   : > { %v5550_v48 = vcombine.low %v7828_v41, %v7840_v10  ;;  %v7853_v8 = vsel %vm7025_vm7, %v2823_v50, %v2824_v23  ;;  %v2838_v62 = vrot.slane %v7443_v35, 5  ;;  %v5537_v38 = vrot.slane %v5521_v13, 9  ;;  %v9586_v36 = vld [vmem:[#allocation6_spill] sm:$0xff]  ;;  %v5525_v60 = vld [vmem:[%s6695_s9 + $0x90] sm:$0xe]  ;;  %v9587_v50 = vld [vmem:[#allocation9_spill] sm:$0xff] }
  0xce   : > { %6151 = vmatmul.mubr.msk.bf16.gmra.mxu1 %vm676_vm3, %v6431_v57  ;;  %v5551_v40 = vcombine.low %v7835_v61, %v7853_v8  ;;  %v7862_v7 = vsel %vm7025_vm7, %v2830_v1, %v2831_v17  ;;  %v7866_v24 = vsel %vm7025_vm7, %v5536_v63, %v2835_v20  ;;  %v2837_v14 = vrot.slane %v2835_v20, 4 }
  0xcf   : > { %6154 = vmatprep.mubr.msk.bf16.mxu1 %vm676_vm3, %v6432_v53  ;;  %v5552_v35 = vcombine.low %v7844_v3, %v7862_v7  ;;  %v2842_v29 = vrot.slane %v7456_v28, 5  ;;  %v2845_v56 = vrot.slane %v7478_v30, 5  ;;  %v5538_v26 = vrot.slane %v5522_v51, 9  ;;  %v9588_v51 = vld [vmem:[#allocation8_spill] sm:$0xff]  ;;  %v5656_v3 = vld [vmem:[%s6695_s9 + $0x48] sm:$0xf] }
  0xd0   : > { %v7875_v33 = vsel %vm7025_vm7, %v2837_v14, %v2838_v62  ;;  %v2849_v2 = vrot.slane %v7475_v27, 5  ;;  %v2852_v6 = vrot.slane %v9585_v59, 5  ;;  %v5539_v57 = vrot.slane %v5523_v55, 9  ;;  %v6434_v27 = vld [vmem:[%s6695_s9 + $0x9c] sm:$0xff]   ;;  %v9596_v55 = vld [vmem:[#allocation18_spill] sm:$0xff] }
  0xd1   : > { %v5553_v23 = vcombine.low %v7866_v24, %v7875_v33  ;;  %v7884_v28 = vsel %vm7025_vm7, %v5537_v38, %v2842_v29  ;;  %v2844_v30 = vrot.slane %v2842_v29, 4  ;;  %v2856_v53 = vrot.slane %v9586_v36, 5  ;;  %v5526_v38 = vld [vmem:[%s6695_s9 + $0x9c] sm:$0xe]  ;;  %v9591_v36 = vld [vmem:[#allocation15_spill] sm:$0xff] }
  0xd2   : > { %v7893_v25 = vsel %vm7025_vm7, %v5538_v26, %v2849_v2  ;;  %v2851_v13 = vrot.slane %v2849_v2, 4  ;;  %v2859_v17 = vrot.slane %v9587_v50, 5  ;;  %v5540_v63 = vrot.slane %v5524_v19, 9  ;;  %v5527_v26 = vld [vmem:[%s6695_s9 + $0xa8] sm:$0xe] }
  0xd3   : > { %6189 = vmatmul.mubr.msk.bf16.gmra.mxu0 %vm676_vm3, %v7776_v43  ;;  %v7900_v1 = vsel %vm7025_vm7, %v2844_v30, %v2845_v56  ;;  %v7904_v43 = vsel %vm7025_vm7, %v5539_v57, %v2856_v53  ;;  %v2858_v20 = vrot.slane %v2856_v53, 4  ;;  %v2863_v62 = vrot.slane %v9588_v51, 5  ;;  %v5529_v57 = vld [vmem:[%s6695_s9 + $0xc0] sm:$0xe]  ;;  %v6435_v19 = vld [vmem:[%s6695_s9 + $0xa8] sm:$0xff]  }
  0xd4   : > { %6192 = vmatprep.mubr.msk.bf16.mxu0 %vm676_vm3, %v7783_v54  ;;  %v7912_v14 = vsel %vm7025_vm7, %v2851_v13, %v2852_v6  ;;  %v9589_v54 = vld [vmem:[#allocation11_spill] sm:$0xff]  ;;  %v5541_v56 = vrot.slane %v5525_v60, 9  ;;  %v2873_v53 = vrot.slane %v9591_v36, 5  ;;  %v5542_v60 = vrot.slane %v5526_v38, 9  ;;  %v9594_v38 = vld [vmem:[#allocation16_spill] sm:$0xff] }
  0xd5   : > { %v2866_v29 = vrot.slane %v9589_v54, 5  ;;  %v7921_v2 = vsel %vm7025_vm7, %v2858_v20, %v2859_v17  ;;  %v7925_v59 = vsel %vm7025_vm7, %v5540_v63, %v2863_v62  ;;  %v2865_v6 = vrot.slane %v2863_v62, 4  ;;  %v5528_v13 = vld [vmem:[%s6695_s9 + $0xb4] sm:$0xe]  ;;  %v9592_v17 = vld [vmem:[#allocation13_spill] sm:$0xff] }
  0xd6   : > { %6155 = vmatmul.mubr.msk.bf16.gmra.mxu1 %vm676_vm3, %v6433_v58  ;;  %v9590_v58 = vld [vmem:[#allocation10_spill] sm:$0xff]  ;;  %v2877_v63 = vrot.slane %v9592_v17, 5  ;;  %v9593_v20 = vld [vmem:[#allocation5_spill] sm:$0xff]  ;;  %v5543_v62 = vrot.slane %v5527_v26, 9  ;;  %v2884_v36 = vrot.slane %v9594_v38, 5  ;;  %v5544_v26 = vrot.slane %v5528_v13, 9 }
  0xd7   : > { %6158 = vmatprep.mubr.msk.bf16.mxu1 %vm676_vm3, %v6434_v27  ;;  %v2870_v30 = vrot.slane %v9590_v58, 5  ;;  %v7935_v50 = vsel %vm7025_vm7, %v2865_v6, %v2866_v29  ;;  %v2880_v51 = vrot.slane %v9593_v20, 5  ;;  %v9595_v17 = vld [vmem:[#allocation17_spill] sm:$0xff]  ;;  %v6436_v27 = vld [vmem:[%s6695_s9 + $0xb4] sm:$0xff]   ;;  %v2797_v39 = vsel %vm7025_vm7, %v7802_v44, %v2796_v34  ;;  %v8152_v7 = vld [vmem:[%s6695_s9 + $0x4c] sm:$0xf] }
  0xd8   : > { %v7950_v29 = vsel %vm7025_vm7, %v5542_v60, %v2877_v63  ;;  %v2879_v6 = vrot.slane %v2877_v63, 4  ;;  %v2887_v20 = vrot.slane %v9595_v17, 5  ;;  %v2886_v38 = vrot.slane %v2884_v36, 4  ;;  %v6519_v44 = vld [vmem:[%s6695_s9 + $0x20] sm:$0x1] }
  0xd9   : > { %v7943_v54 = vsel %vm7025_vm7, %v5541_v56, %v2870_v30  ;;  %v2872_v58 = vrot.slane %v2870_v30, 4  ;;  %v7962_v30 = vsel %vm7025_vm7, %v5543_v62, %v2884_v36  ;;  %v2891_v60 = vrot.slane %v9596_v55, 5 }
  0xda   : > { %v5545_v63 = vrot.slane %v5529_v57, 9  ;;  %v7978_v55 = vsel %vm7025_vm7, %v2886_v38, %v2887_v20  ;;  %v2898_v57 = vrot.slane %v7697_v22, 5  ;;  %v2794_v22 = vsel %vm7025_vm7, %v5530_v37, %v2793_v46  ;;  %v6440_v38 = vld [vmem:[%s6695_s9 + $0x30] sm:$0xff]  }
  0xdb   : > { %6193 = vmatmul.mubr.msk.bf16.gmra.mxu0 %vm676_vm3, %v7785_v42  ;;  %v7958_v56 = vsel %vm7025_vm7, %v2872_v58, %v2873_v53  ;;  %v7971_v42 = vsel %vm7025_vm7, %v2879_v6, %v2880_v51  ;;  %v2894_v53 = vrot.slane %v7688_v4, 5  ;;  %v2893_v58 = vrot.slane %v2891_v60, 4 }
  0xdc   : > { %6196 = vmatprep.mubr.msk.bf16.mxu0 %vm676_vm3, %v7791_v15  ;;  %v7982_v15 = vsel %vm7025_vm7, %v5544_v26, %v2891_v60  ;;  %v2901_v51 = vrot.slane %v7709_v45, 5  ;;  %v5515_v45 = vld [vmem:[%s6695_s9 + $0x18] sm:$0xe]  ;;  %v8022_v9 = vsel %vm7025_vm7, %v5545_v63, %v2898_v57  ;;  %v2900_v46 = vrot.slane %v2898_v57, 4  ;;  %v6439_v26 = vld [vmem:[%s6695_s9 + $0x24] sm:$0xff]  }
  0xdd   : > { %v8010_v32 = vsel %vm7025_vm7, %v2893_v58, %v2894_v53  ;;  %v5531_v37 = vrot.slane %v5515_v45, 9  ;;  %v5547_v34 = vcombine.low %v2794_v22, %v2797_v39  ;;  %v9597_v60 = vld [vmem:[#allocation12_spill] sm:$0xff] }
  0xde   : > { %6159 = vmatmul.mubr.msk.bf16.gmra.mxu1 %vm676_vm3, %v6435_v19  ;;  %v5497_v19 = vcombine.low %v2422_v16, %v2432_v21  ;;  %v8027_v47 = vsel %vm7025_vm7, %v2900_v46, %v2901_v51  ;;  %v2803_v21 = vrot.slane %v6519_v44, 5  ;;  %v4560_v53 = vsel %vm725_vm0, %v9597_v60, 0  ;;  %v5644_v63 = vld [vmem:[%s6695_s9 + $0x18] sm:$0xf]  ;;  %v5645_v57 = vld [vmem:[%s6695_s9 + $0x1c] sm:$0xf] }
  0xdf   : > { %6162 = vmatprep.mubr.msk.bf16.mxu1 %vm676_vm3, %v6436_v27  ;;  %v6518_v27 = vld [vmem:[%s6695_s9 + $0x1c] sm:$0xf]  ;;  %v5647_v51 = vld [vmem:[%s6695_s9 + $0x24] sm:$0xf]  ;;  %v3608_v45 = vshrl.u32 %v5644_v63, 16  ;;  %v3617_v39 = vshll.u32 %v5645_v57, 16 }
  0xe0   : > { %v2800_v36 = vrot.slane %v6518_v27, 5  ;;  %v3611_v27 = vshll.u32 %v5644_v63, 16  ;;  %v3632_v46 = vshrl.u32 %v5647_v51, 16  ;;  %v6442_v44 = vld [vmem:[%s6695_s9 + $0x48] sm:$0xff]   ;;  %v5725_v60 = vld [vmem:[%s6695_s9 + $0x18] sm:$0xe] }
  0xe1   : > { %v8068_v63 = vld [vmem:[%s6695_s9 + $0x2c] sm:$0x1] }
  0xe2   : > { %v2802_v16 = vrot.slane %v2800_v36, 4  ;;  %v2801_v17 = vsel %vm7025_vm7, %v5531_v37, %v2800_v36  ;;  %v8052_v36 = vld [vmem:[%s6695_s9 + $0x28] sm:$0xf]  ;;  %v6441_v37 = vld [vmem:[%s6695_s9 + $0x3c] sm:$0xff]   ;;  %v3634_v18 = vrot.slane %v3632_v46, 4 }
  0xe3   : > { %6197 = vmatmul.mubr.msk.bf16.gmra.mxu0 %vm676_vm3, %v5497_v19  ;;  %v9598_v19 = vld [vmem:[#allocation14_spill] sm:$0xff] }
  0xe4   : > { %6236 = vmatprep.mubr.msk.bf16.mxu0 %vm676_vm3, %v6438_v49  ;;  %v2804_v20 = vsel %vm7025_vm7, %v2802_v16, %v2803_v21  ;;  %v4090_v22 = vsel %vm725_vm0, %v9598_v19, 0  ;;  %v3621_v49 = vshrl.u32 %v5645_v57, 16  ;;  %v3645_v16 = vshrl.u32 %v8052_v36, 16  ;;  %v5646_v21 = vld [vmem:[%s6695_s9 + $0x20] sm:$0x1] }
  0xe5   : > { %v5548_v58 = vcombine.low %v2801_v17, %v2804_v20  ;;  %v3610_v17 = vrot.slane %v3608_v45, 4  ;;  %v3613_v20 = vrot.slane %v3611_v27, 5  ;;  %v5650_v19 = vld [vmem:[%s6695_s9 + $0x30] sm:$0xf]  ;;  %v3627_v45 = vshll.u32 %v5646_v21, 16 }
  0xe6   : > { %6163 = vmatmul.mubr.msk.bf16.gmra.mxu1 %vm676_vm3, %v6437_v52  ;;  %v3635_v52 = vshll.u32 %v5647_v51, 16  ;;  %v3647_v51 = vrot.slane %v3645_v16, 4  ;;  %v5741_v27 = vrot.slane %v5725_v60, 9  ;;  %v4354_v46 = vrot.slane %v5646_v21, 5  ;;  %v5726_v16 = vld [vmem:[%s6695_s9 + $0x24] sm:$0xe] }
  0xe7   : > { %6202 = vmatprep.mubr.msk.bf16.mxu1 %vm676_vm3, %v5547_v34  ;;  %v3641_v34 = vshll.u32 %v8052_v36, 16  ;;  %v6443_v21 = vld [vmem:[%s6695_s9 + $0x54] sm:$0xff]   ;;  %v3659_v10 = vshll.u32 %v5650_v19, 16  ;;  %v6444_v60 = vld [vmem:[%s6695_s9 + $0x60] sm:$0xff]  }
  0xe8   : > { %v3637_v11 = vrot.slane %v3635_v52, 5  ;;  %v3651_v52 = vshll.u32 %v8068_v63, 16 }
  0xeb   : > { %6237 = vmatmul.mubr.msk.bf16.vlgmr.msra.gmra.mxu0 %vm676_vm3, %v6439_v26  ;;  %v8064_v26 = vrot.slane %v3617_v39, 5 }
  0xec   : > { %6303 = vmatpush3.bf16.msra.mxu0 %v4560_v53  ;;  %6240 = vmatprep.mubr.msk.bf16.mxu0 %vm676_vm3, %v6440_v38  ;;  %v3623_v38 = vrot.slane %v3621_v49, 4  ;;  %v4351_v53 = vrot.slane %v5645_v57, 5  ;;  %v8078_v57 = vld [vmem:[%s6695_s9 + $0x34] sm:$0xf] }
  0xee   : > { %6203 = vmatmul.mubr.msk.bf16.vlgmr.msra.gmra.mxu1 %vm676_vm3, %v5548_v58  ;;  %v8073_v58 = vrot.slane %v3641_v34, 5  ;;  %v3624_v39 = vor.u32 %v3623_v38, %v8064_v26  ;;  %v4353_v49 = vrot.slane %v4351_v53, 4  ;;  %v3638_v34 = vor.u32 %v3637_v11, %v3634_v18 }
  0xef   : > { %6269 = vmatpush3.bf16.msra.mxu1 %v4090_v22  ;;  %6206 = vmatprep.mubr.msk.bf16.mxu1 %vm676_vm3, %v5549_v5  ;;  %v8071_v5 = vpop.f32.mrf.mxu0  ;;  %v3614_v22 = vor.u32 %v3613_v20, %v3610_v17  ;;  %v3656_v17 = vshrl.u32 %v5650_v19, 16  ;;  %v3669_v38 = vshrl.u32 %v8078_v57, 16  ;;  %v8103_v61 = vsel %vm7025_vm7, %v5741_v27, %v4351_v53  ;;  %v5653_v19 = vld [vmem:[%s6695_s9 + $0x3c] sm:$0xf] }
  0xf0   : > { %v3648_v41 = vor.u32 %v3647_v51, %v8073_v58  ;;  %v3625_v8 = vrot.slane %v3624_v39, 4  ;;  %v3653_v11 = vrot.slane %v3651_v52, 5  ;;  %v5742_v51 = vrot.slane %v5726_v16, 9  ;;  %v8117_v39 = vld [vmem:[%s6695_s9 + $0x38] sm:$0x1] }
  0xf1   : > { %v8095_v20 = vpop.f32.mrf.mxu0  ;;  %v3615_v18 = vrot.slane %v3614_v22, 4  ;;  %v3639_v12 = vrot.slane %v3638_v34, 4  ;;  %v4361_v22 = vrot.slane %v8068_v63, 5  ;;  %v3671_v52 = vrot.slane %v3669_v38, 4 }
  0xf2   : > { %v3649_v27 = vrot.slane %v3648_v41, 4  ;;  %v3680_v34 = vshrl.u32 %v5653_v19, 16  ;;  %v3683_v16 = vshll.u32 %v5653_v19, 16  ;;  %v8130_v41 = vld [vmem:[%s6695_s9 + $0x40] sm:$0xf] }
  0xf3   : > { %6241 = vmatmul.mubr.msk.bf16.gmra.mxu0 %vm676_vm3, %v6441_v37  ;;  %v8114_v53 = vpop.f32.mrf.mxu0  ;;  %v3620_v63 = vsel %vm6739_vm4, %v3615_v18, %v8064_v26  ;;  %v3644_v26 = vsel %vm6739_vm4, %v3639_v12, %v8073_v58  ;;  %v5727_v18 = vld [vmem:[%s6695_s9 + $0x30] sm:$0xe]  ;;  %v3689_v24 = vshll.u32 %v8130_v41, 16  ;;  %v3693_v33 = vshrl.u32 %v8130_v41, 16 }
  0xf4   : > { %6244 = vmatprep.mubr.msk.bf16.mxu0 %vm676_vm3, %v6442_v44  ;;  %v8086_v37 = vpop.f32.mrf.mxu1  ;;  %v4358_v44 = vrot.slane %v8052_v36, 5  ;;  %v3629_v36 = vrot.slane %v3627_v45, 5  ;;  %v3658_v45 = vrot.slane %v3656_v17, 4  ;;  %v3654_v58 = vsel %vm6739_vm4, %v3649_v27, %v3653_v11 }
  0xf5   : > { %9599 = vst [vmem:[#allocation7_spill] sm:$0xff] %v8086_v37  ;;  %v8159_v12 = vpop.f32.mrf.mxu0  ;;  %v3685_v19 = vrot.slane %v3683_v16, 5  ;;  %v3717_v11 = vshrl.u32 %v8152_v7, 16 }
  0xf6   : > { %6207 = vmatmul.mubr.msk.bf16.gmra.mxu1 %vm676_vm3, %v5550_v48  ;;  %v3665_v48 = vshll.u32 %v8078_v57, 16  ;;  %v8110_v6 = vpop.f32.mrf.mxu1  ;;  %v4360_v4 = vrot.slane %v4358_v44, 4  ;;  %v3630_v17 = vsel %vm6739_vm4, %v3625_v8, %v3629_v36  ;;  %v4365_v36 = vrot.slane %v8078_v57, 5  ;;  %v6446_v8 = vld [vmem:[%s6695_s9 + $0x78] sm:$0xff]  }
  0xf7   : > { %6210 = vmatprep.mubr.msk.bf16.mxu1 %vm676_vm3, %v5551_v40  ;;  %v8107_v40 = vsel %vm7025_vm7, %v4353_v49, %v4354_v46  ;;  %9600 = vst [vmem:[#allocation6_spill] sm:$0xff] %v8110_v6  ;;  %v3661_v49 = vrot.slane %v3659_v10, 5  ;;  %v8173_v27 = vcombine.low %v3620_v63, %v3630_v17  ;;  %v8175_v57 = vcombine.low %v3644_v26, %v3654_v58  ;;  %v8189_v17 = vld [vmem:[%s6695_s9 + $0x58] sm:$0xf]  ;;  %v8195_v58 = vld [vmem:[%s6695_s9 + $0x44] sm:$0x1] }
  0xf8   : > { %v8119_v46 = vrot.slane %v3665_v48, 5  ;;  %v8136_v10 = vpop.f32.mrf.mxu1  ;;  %v8143_v48 = vsel %vm7025_vm7, %v5742_v51, %v4358_v44  ;;  %v8147_v38 = vsel %vm7025_vm7, %v4360_v4, %v4361_v22  ;;  %v3682_v51 = vrot.slane %v3680_v34, 4  ;;  %v5659_v34 = vld [vmem:[%s6695_s9 + $0x54] sm:$0xf] }
  0xf9   : > { %9601 = vst [vmem:[#allocation9_spill] sm:$0xff] %v8136_v10  ;;  %v3662_v44 = vor.u32 %v3661_v49, %v3658_v45  ;;  %v3707_v22 = vshll.u32 %v5656_v3, 16  ;;  %v4367_v13 = vrot.slane %v4365_v36, 4  ;;  %v4368_v63 = vrot.slane %v8117_v39, 5  ;;  %v5728_v49 = vld [vmem:[%s6695_s9 + $0x3c] sm:$0xe] }
  0xfa   : > { %v3672_v4 = vor.u32 %v3671_v52, %v8119_v46  ;;  %v8171_v45 = vpop.f32.mrf.mxu1  ;;  %v5743_v52 = vrot.slane %v5727_v18, 9  ;;  %v3686_v18 = vor.u32 %v3685_v19, %v3682_v51  ;;  %v9604_v6 = vcombine.low %v7884_v28, %v7900_v1 }
  0xfb   : > { %6245 = vmatmul.mubr.msk.bf16.gmra.mxu0 %vm676_vm3, %v6443_v21  ;;  %v3713_v21 = vshll.u32 %v8152_v7, 16  ;;  %9602 = vst [vmem:[#allocation8_spill] sm:$0xff] %v8171_v45  ;;  %v3709_v45 = vrot.slane %v3707_v22, 5  ;;  %v3728_v51 = vshrl.u32 %v5659_v34, 16  ;;  %v3731_v19 = vshll.u32 %v5659_v34, 16 }
  0xfc   : > { %6248 = vmatprep.mubr.msk.bf16.mxu0 %vm676_vm3, %v6444_v60  ;;  %v3675_v60 = vshll.u32 %v8117_v39, 16  ;;  %v8192_v26 = vrot.slane %v3672_v4, 4  ;;  %v3719_v39 = vrot.slane %v3717_v11, 4  ;;  %v8230_v22 = vsel %vm7025_vm7, %v4367_v13, %v4368_v63 }
  0xfd   : > { %v8200_v10 = vrot.slane %v3713_v21, 5  ;;  %v9606_v21 = vcombine.low %v7893_v25, %v7912_v14  ;;  %v4372_v25 = vrot.slane %v8130_v41, 5  ;;  %v6448_v14 = vld [vmem:[%s6695_s9 + $0x90] sm:$0xff]   ;;  %v5744_v1 = vrot.slane %v5728_v49, 9  ;;  %v5662_v41 = vld [vmem:[%s6695_s9 + $0x60] sm:$0xf] }
  0xfe   : > { %6211 = vmatmul.mubr.msk.bf16.gmra.mxu1 %vm676_vm3, %v5552_v35  ;;  %v6445_v35 = vld [vmem:[%s6695_s9 + $0x6c] sm:$0xff]   ;;  %v8185_v62 = vrot.slane %v3675_v60, 5  ;;  %v3730_v37 = vrot.slane %v3728_v51, 4 }
  0xff   : > { %6214 = vmatprep.mubr.msk.bf16.mxu1 %vm676_vm3, %v5553_v23  ;;  %v3704_v23 = vshrl.u32 %v5656_v3, 16  ;;  %v8183_v3 = vrot.slane %v3662_v44, 4  ;;  %v3695_v44 = vrot.slane %v3693_v33, 4  ;;  %v3741_v33 = vshrl.u32 %v8189_v17, 16 }
 0x100   : > { %v8181_v16 = vpop.f32.mrf.mxu0  ;;  %v3720_v13 = vor.u32 %v3719_v39, %v8200_v10  ;;  %v4379_v39 = vrot.slane %v8152_v7, 5  ;;  %v9610_v7 = vcombine.low %v7904_v43, %v7921_v2  ;;  %v9612_v43 = vcombine.low %v7925_v59, %v7935_v50  ;;  %v6449_v2 = vld [vmem:[%s6695_s9 + $0x9c] sm:$0xff]  }
 0x101   : > { %9603 = vst [vmem:[#allocation11_spill] sm:$0xff] %v8181_v16  ;;  %v3706_v60 = vrot.slane %v3704_v23, 4  ;;  %v6447_v23 = vld [vmem:[%s6695_s9 + $0x84] sm:$0xff]   ;;  %v8257_v16 = vld [vmem:[%s6695_s9 + $0x5c] sm:$0x1]  ;;  %v4386_v59 = vrot.slane %v8189_v17, 5 }
 0x102   : > { %v8218_v28 = vpop.f32.mrf.mxu0 }
 0x103   : > { %6249 = vmatmul.mubr.msk.bf16.gmra.mxu0 %vm676_vm3, %v6445_v35  ;;  %v8197_v35 = vrot.slane %v3689_v24, 5  ;;  %v3737_v24 = vshll.u32 %v8189_v17, 16  ;;  %9607 = vst [vmem:[#allocation15_spill] sm:$0xff] %v8218_v28  ;;  %v3733_v28 = vrot.slane %v3731_v19, 5 }
 0x104   : > { %6252 = vmatprep.mubr.msk.bf16.mxu0 %vm676_vm3, %v6446_v8  ;;  %v8206_v4 = vpop.f32.mrf.mxu1  ;;  %v8209_v8 = vld [vmem:[%s6695_s9 + $0x50] sm:$0x1]  ;;  %v8250_v49 = vpop.f32.mrf.mxu0 }
 0x105   : > { %9605 = vst [vmem:[#allocation10_spill] sm:$0xff] %v8206_v4  ;;  %v3696_v34 = vor.u32 %v3695_v44, %v8197_v35  ;;  %v8240_v4 = vrot.slane %v3686_v18, 4  ;;  %v8247_v11 = vrot.slane %v3737_v24, 5  ;;  %v3743_v44 = vrot.slane %v3741_v33, 4  ;;  %9609 = vst [vmem:[#allocation5_spill] sm:$0xff] %v8250_v49 }
 0x106   : > { %6215 = vmatmul.mubr.msk.bf16.gmra.mxu1 %vm676_vm3, %v9604_v6  ;;  %v8226_v6 = vsel %vm7025_vm7, %v5743_v52, %v4365_v36  ;;  %v3710_v36 = vor.u32 %v3709_v45, %v3706_v60  ;;  %v3723_v52 = vshll.u32 %v8209_v8, 16  ;;  %v8245_v63 = vpop.f32.mrf.mxu1  ;;  %v4374_v18 = vrot.slane %v4372_v25, 4  ;;  %v5729_v24 = vld [vmem:[%s6695_s9 + $0x48] sm:$0xe] }
 0x107   : > { %6218 = vmatprep.mubr.msk.bf16.mxu1 %vm676_vm3, %v9606_v21  ;;  %v3699_v21 = vshll.u32 %v8195_v58, 16  ;;  %9608 = vst [vmem:[#allocation13_spill] sm:$0xff] %v8245_v63  ;;  %v4375_v60 = vrot.slane %v8195_v58, 5  ;;  %v3697_v51 = vrot.slane %v3696_v34, 4  ;;  %v3752_v33 = vshrl.u32 %v5662_v41, 16 }
 0x108   : > { %v8263_v63 = vsel %vm7025_vm7, %v5744_v1, %v4372_v25  ;;  %v3711_v45 = vrot.slane %v3710_v36, 4  ;;  %v3721_v49 = vrot.slane %v3720_v13, 4  ;;  %v3725_v58 = vrot.slane %v3723_v52, 5  ;;  %v8278_v36 = vld [vmem:[%s6695_s9 + $0x64] sm:$0xf]  ;;  %v8285_v13 = vpop.f32.mrf.mxu0 }
 0x109   : > { %v3701_v19 = vrot.slane %v3699_v21, 5  ;;  %v3692_v34 = vsel %vm6739_vm4, %v8240_v4, %v8197_v35  ;;  %v3734_v21 = vor.u32 %v3733_v28, %v3730_v37  ;;  %v3744_v1 = vor.u32 %v3743_v44, %v8247_v11  ;;  %9613 = vst [vmem:[#allocation17_spill] sm:$0xff] %v8285_v13  ;;  %v5730_v28 = vld [vmem:[%s6695_s9 + $0x54] sm:$0xe]  ;;  %v6453_v13 = vld [vmem:[%s6695_s9 + $0xcc] sm:$0xff]  }
 0x10a   : > { %v3747_v25 = vshll.u32 %v8257_v16, 16  ;;  %v8289_v52 = vsel %vm7025_vm7, %v4374_v18, %v4375_v60  ;;  %v5745_v35 = vrot.slane %v5729_v24, 9  ;;  %v4381_v37 = vrot.slane %v4379_v39, 4 }
 0x10b   : > { %6253 = vmatmul.mubr.msk.bf16.gmra.mxu0 %vm676_vm3, %v6447_v23  ;;  %v3755_v23 = vshll.u32 %v5662_v41, 16  ;;  %v4382_v4 = vrot.slane %v8209_v8, 5  ;;  %v6450_v41 = vld [vmem:[%s6695_s9 + $0xa8] sm:$0xff]   ;;  %v3702_v44 = vsel %vm6739_vm4, %v3697_v51, %v3701_v19  ;;  %v3754_v50 = vrot.slane %v3752_v33, 4 }
 0x10c   : > { %6256 = vmatprep.mubr.msk.bf16.mxu0 %vm676_vm3, %v6448_v14  ;;  %v8269_v14 = vpop.f32.mrf.mxu1  ;;  %v3726_v18 = vsel %vm6739_vm4, %v3721_v49, %v3725_v58  ;;  %v3761_v60 = vshll.u32 %v8278_v36, 16  ;;  %v3765_v8 = vshrl.u32 %v8278_v36, 16  ;;  %v3745_v51 = vrot.slane %v3744_v1, 4  ;;  %v8307_v33 = vld [vmem:[%s6695_s9 + $0x68] sm:$0x1] }
 0x10d   : > { %9611 = vst [vmem:[#allocation16_spill] sm:$0xff] %v8269_v14  ;;  %v3735_v14 = vrot.slane %v3734_v21, 4  ;;  %v3749_v17 = vrot.slane %v3747_v25, 5  ;;  %v5746_v19 = vrot.slane %v5730_v28, 9  ;;  %v9616_v49 = vsel %vm6739_vm4, %v8192_v26, %v8185_v62  ;;  %v5665_v25 = vld [vmem:[%s6695_s9 + $0x6c] sm:$0xf] }
 0x10e   : > { %6219 = vmatmul.mubr.msk.bf16.gmra.mxu1 %vm676_vm3, %v9610_v7  ;;  %v3757_v7 = vrot.slane %v3755_v23, 5  ;;  %v8304_v24 = vpop.f32.mrf.mxu1  ;;  %v8328_v21 = vsel %vm7025_vm7, %v5745_v35, %v4379_v39  ;;  %v8332_v1 = vsel %vm7025_vm7, %v4381_v37, %v4382_v4  ;;  %v8335_v62 = vcombine.low %v3692_v34, %v3702_v44  ;;  %v5731_v4 = vld [vmem:[%s6695_s9 + $0x60] sm:$0xe]  ;;  %v5671_v44 = vld [vmem:[%s6695_s9 + $0x84] sm:$0xf] }
 0x10f   : > { %6222 = vmatprep.mubr.msk.bf16.mxu1 %vm676_vm3, %v9612_v43  ;;  %v3716_v43 = vsel %vm6739_vm4, %v3711_v45, %v8200_v10  ;;  %9614 = vst [vmem:[#allocation18_spill] sm:$0xff] %v8304_v24  ;;  %v9617_v45 = vsel %vm6739_vm4, %v8183_v3, %v8119_v46  ;;  %v4388_v46 = vrot.slane %v4386_v59, 4  ;;  %v4389_v3 = vrot.slane %v8257_v16, 5 }
 0x110   : > { %v8322_v23 = vcombine.low %v9617_v45, %v9616_v49  ;;  %9618 = vst [vmem:[#allocation14_spill] sm:$0xff] %v8335_v62  ;;  %v3758_v26 = vor.u32 %v3757_v7, %v3754_v50  ;;  %v8342_v28 = vcombine.low %v3716_v43, %v3726_v18  ;;  %v8344_v39 = vrot.slane %v3761_v60, 5 }
 0x111   : > { %v8310_v10 = vpop.f32.mrf.mxu0  ;;  %v8346_v35 = vrot.slane %v3765_v8, 4  ;;  %v3771_v37 = vshll.u32 %v8307_v33, 16  ;;  %v9620_v34 = vcombine.low %v7943_v54, %v7958_v56  ;;  %v3740_v50 = vsel %vm6739_vm4, %v3735_v14, %v8247_v11  ;;  %v5668_v54 = vld [vmem:[%s6695_s9 + $0x78] sm:$0xf] }
 0x112   : > { %9615 = vst [vmem:[#allocation12_spill] sm:$0xff] %v8310_v10  ;;  %9619 = vst [vmem:[#allocation19_spill] sm:$0xff] %v8342_v28  ;;  %v3750_v7 = vsel %vm6739_vm4, %v3745_v51, %v3749_v17  ;;  %v8366_v43 = vsel %vm7025_vm7, %v5746_v19, %v4386_v59  ;;  %v9622_v56 = vcombine.low %v7950_v29, %v7971_v42  ;;  %v3776_v60 = vshrl.u32 %v5665_v25, 16  ;;  %v8378_v51 = vld [vmem:[%s6695_s9 + $0x7c] sm:$0xf]  ;;  %v6452_v59 = vld [vmem:[%s6695_s9 + $0xc0] sm:$0xff]  }
 0x113   : > { %6257 = vmatmul.mubr.msk.bf16.gmra.mxu0 %vm676_vm3, %v6449_v2  ;;  %v8340_v2 = vld [vmem:[%s6695_s9 + $0x70] sm:$0xf]  ;;  %v8373_v18 = vpop.f32.mrf.mxu0  ;;  %v3779_v8 = vshll.u32 %v5665_v25, 16  ;;  %v8383_v17 = vsel %vm7025_vm7, %v4388_v46, %v4389_v3  ;;  %v8385_v29 = vrot.slane %v3758_v26, 4  ;;  %v5747_v42 = vrot.slane %v5731_v4, 9 }
 0x114   : > { %6260 = vmatprep.mubr.msk.bf16.mxu0 %vm676_vm3, %v6450_v41  ;;  %v6451_v41 = vld [vmem:[%s6695_s9 + $0xb4] sm:$0xff]   ;;  %9623 = vst [vmem:[#allocation21_spill] sm:$0xff] %v8373_v18  ;;  %v3785_v11 = vshll.u32 %v8340_v2, 16  ;;  %v3789_v14 = vshrl.u32 %v8340_v2, 16  ;;  %v4393_v19 = vrot.slane %v8278_v36, 5  ;;  %v8388_v49 = vcombine.low %v3740_v50, %v3750_v7 }
 0x115   : > { %v3768_v45 = vor.u32 %v8346_v35, %v8344_v39  ;;  %v8392_v25 = vrot.slane %v3771_v37, 5  ;;  %v3800_v46 = vshrl.u32 %v5668_v54, 16  ;;  %v3803_v3 = vshll.u32 %v5668_v54, 16  ;;  %v8404_v4 = vld [vmem:[%s6695_s9 + $0x88] sm:$0xf]  ;;  %v8407_v35 = vpop.f32.mrf.mxu0 }
 0x116   : > { %6223 = vmatmul.mubr.msk.bf16.gmra.mxu1 %vm676_vm3, %v9620_v34  ;;  %v8354_v16 = vpop.f32.mrf.mxu1  ;;  %9624 = vst [vmem:[#allocation22_spill] sm:$0xff] %v8388_v49  ;;  %v4396_v34 = vrot.slane %v8307_v33, 5  ;;  %v3809_v36 = vshll.u32 %v8378_v51, 16  ;;  %v3813_v26 = vshrl.u32 %v8378_v51, 16  ;;  %9626 = vst [vmem:[#allocation24_spill] sm:$0xff] %v8407_v35  ;;  %v3778_v33 = vrot.slane %v3776_v60, 4 }
 0x117   : > { %9621 = vst [vmem:[#allocation20_spill] sm:$0xff] %v8354_v16  ;;  %6226 = vmatprep.mubr.msk.bf16.mxu1 %vm676_vm3, %v9622_v56  ;;  %v8396_v56 = vld [vmem:[%s6695_s9 + $0x74] sm:$0x1]  ;;  %v3781_v37 = vrot.slane %v3779_v8, 5  ;;  %v8409_v50 = vrot.slane %v3785_v11, 5  ;;  %v3791_v7 = vrot.slane %v3789_v14, 4  ;;  %v9627_v54 = vcombine.low %v7962_v30, %v7978_v55  ;;  %v8437_v49 = vpop.f32.mrf.mxu0 }
 0x118   : > { %v8399_v58 = vpop.f32.mrf.mxu1  ;;  %v4395_v16 = vrot.slane %v4393_v19, 4  ;;  %v8422_v60 = vld [vmem:[%s6695_s9 + $0x80] sm:$0x1]  ;;  %v8425_v8 = vld [vmem:[%s6695_s9 + $0x6c] sm:$0xe]  ;;  %v3824_v11 = vshrl.u32 %v5671_v44, 16 }
 0x119   : > { %9625 = vst [vmem:[#allocation23_spill] sm:$0xff] %v8399_v58  ;;  %v8418_v58 = vsel %vm7025_vm7, %v5747_v42, %v4393_v19  ;;  %v3827_v14 = vshll.u32 %v5671_v44, 16  ;;  %v3837_v24 = vshrl.u32 %v8404_v4, 16  ;;  %v3802_v19 = vrot.slane %v3800_v46, 4  ;;  %9629 = vst [vmem:[#allocation26_spill] sm:$0xff] %v8437_v49 }
 0x11a   : > { %v8433_v42 = vpop.f32.mrf.mxu1  ;;  %v3805_v35 = vrot.slane %v3803_v3, 5  ;;  %v8435_v18 = vrot.slane %v3809_v36, 5  ;;  %v3815_v10 = vrot.slane %v3813_v26, 4  ;;  %v9630_v44 = vcombine.low %v7982_v15, %v8010_v32  ;;  %v8456_v32 = vld [vmem:[%s6695_s9 + $0x8c] sm:$0x1] }
 0x11b   : > { %6261 = vmatmul.mubr.msk.bf16.gmra.mxu0 %vm676_vm3, %v6451_v41  ;;  %v3795_v41 = vshll.u32 %v8396_v56, 16  ;;  %9628 = vst [vmem:[#allocation25_spill] sm:$0xff] %v8433_v42  ;;  %v3782_v30 = vor.u32 %v3781_v37, %v3778_v33  ;;  %v3792_v55 = vor.u32 %v3791_v7, %v8409_v50  ;;  %v3819_v46 = vshll.u32 %v8422_v60, 16  ;;  %v5733_v33 = vld [vmem:[%s6695_s9 + $0x78] sm:$0xe] }
 0x11c   : > { %6264 = vmatprep.mubr.msk.bf16.mxu0 %vm676_vm3, %v6452_v59  ;;  %v3833_v59 = vshll.u32 %v8404_v4, 16  ;;  %v8447_v3 = vrot.slane %v3768_v45, 4  ;;  %v8451_v36 = vsel %vm7025_vm7, %v4395_v16, %v4396_v34  ;;  %v5748_v26 = vrot.slane %v8425_v8, 9  ;;  %v8461_v42 = vpop.f32.mrf.mxu1  ;;  %v5674_v8 = vld [vmem:[%s6695_s9 + $0x90] sm:$0xf] }
 0x11d   : > { %v4407_v15 = vrot.slane %v8378_v51, 5  ;;  %v3826_v37 = vrot.slane %v3824_v11, 4  ;;  %v3829_v7 = vrot.slane %v3827_v14, 5  ;;  %9631 = vst [vmem:[#allocation27_spill] sm:$0xff] %v8461_v42  ;;  %v3797_v45 = vrot.slane %v3795_v41, 5 }
 0x11e   : > { %6227 = vmatmul.mubr.msk.bf16.gmra.mxu1 %vm676_vm3, %v9627_v54  ;;  %v4400_v54 = vrot.slane %v8340_v2, 5  ;;  %v8459_v2 = vrot.slane %v3833_v59, 5  ;;  %v4403_v49 = vrot.slane %v8396_v56, 5  ;;  %v3806_v16 = vor.u32 %v3805_v35, %v3802_v19  ;;  %v8470_v59 = vld [vmem:[%s6695_s9 + $0x94] sm:$0xf] }
 0x11f   : > { %6230 = vmatprep.mubr.msk.bf16.mxu1 %vm676_vm3, %v9630_v44  ;;  %v3839_v44 = vrot.slane %v3837_v24, 4  ;;  %v3816_v34 = vor.u32 %v3815_v10, %v8435_v18  ;;  %v3783_v51 = vrot.slane %v3782_v30, 4  ;;  %v3793_v11 = vrot.slane %v3792_v55, 4 }
 0x120   : > { %v4402_v62 = vrot.slane %v4400_v54, 4  ;;  %v3821_v14 = vrot.slane %v3819_v46, 5  ;;  %v9632_v24 = vcombine.low %v8103_v61, %v8107_v40  ;;  %v5749_v56 = vrot.slane %v5733_v33, 9 }
 0x121   : > { %v4409_v35 = vrot.slane %v4407_v15, 4  ;;  %v4410_v10 = vrot.slane %v8422_v60, 5  ;;  %v3843_v41 = vshll.u32 %v8456_v32, 16  ;;  %v3840_v30 = vor.u32 %v3839_v44, %v8459_v2 }
 0x122   : > { %v3848_v55 = vshrl.u32 %v5674_v8, 16  ;;  %v3851_v46 = vshll.u32 %v5674_v8, 16  ;;  %v9634_v61 = vcombine.low %v8022_v9, %v8027_v47  ;;  %v3807_v40 = vrot.slane %v3806_v16, 4 }
 0x123   : > { %v8466_v28 = vpop.f32.mrf.mxu0  ;;  %6265 = vmatmul.mubr.msk.bf16.gmra.mxu0 %vm676_vm3, %v6453_v13  ;;  %v3830_v13 = vor.u32 %v3829_v7, %v3826_v37  ;;  %v3817_v33 = vrot.slane %v3816_v34, 4  ;;  %v3857_v60 = vshll.u32 %v8470_v59, 16  ;;  %v3774_v37 = vsel %vm6739_vm4, %v8447_v3, %v8392_v25 }
 0x124   : > { %6304 = vmatprep.mubr.msk.bf16.mxu0 %vm676_vm3, %v9632_v24  ;;  %v3861_v24 = vshrl.u32 %v8470_v59, 16  ;;  %v3788_v9 = vsel %vm6739_vm4, %v3783_v51, %v8409_v50  ;;  %v8502_v47 = vsel %vm7025_vm7, %v5748_v26, %v4400_v54  ;;  %v8506_v7 = vsel %vm7025_vm7, %v4402_v62, %v4403_v49  ;;  %v5734_v54 = vld [vmem:[%s6695_s9 + $0x84] sm:$0xe]  ;;  %v9673_v31 = vld [vmem:[#allocation27_spill] sm:$0xff] }
 0x125   : > { %v8478_v19 = vpop.f32.mrf.mxu0  ;;  %v8514_v25 = vsel %vm7025_vm7, %v5749_v56, %v4407_v15  ;;  %v8518_v50 = vsel %vm7025_vm7, %v4409_v35, %v4410_v10  ;;  %v3845_v3 = vrot.slane %v3843_v41, 5  ;;  %v3831_v62 = vrot.slane %v3830_v13, 4  ;;  %v8542_v13 = vld [vmem:[%s6695_s9 + $0x98] sm:$0x1] }
 0x126   : > { %9633 = vst [vmem:[#allocation28_spill] sm:$0xff] %v8478_v19  ;;  %v8481_v42 = vpop.f32.mrf.mxu1  ;;  %6231 = vmatmul.mubr.msk.bf16.gmra.mxu1 %vm676_vm3, %v9634_v61  ;;  %v3841_v49 = vrot.slane %v3840_v30, 4  ;;  %v3850_v16 = vrot.slane %v3848_v55, 4  ;;  %v3853_v34 = vrot.slane %v3851_v46, 5  ;;  %v3812_v15 = vsel %vm6739_vm4, %v3807_v40, %v8435_v18  ;;  %v5677_v30 = vld [vmem:[%s6695_s9 + $0x9c] sm:$0xf] }
 0x127   : > { %v8489_v19 = vpop.f32.mrf.mxu0  ;;  %6270 = vmatprep.mubr.msk.bf16.mxu1 %vm676_vm3, %v8173_v27  ;;  %v3798_v27 = vsel %vm6739_vm4, %v3793_v11, %v3797_v45  ;;  %v3822_v45 = vsel %vm6739_vm4, %v3817_v33, %v3821_v14  ;;  %v8530_v51 = vrot.slane %v3857_v60, 5  ;;  %v3863_v11 = vrot.slane %v3861_v24, 4  ;;  %v8573_v24 = vld [vmem:[%s6695_s9 + $0xa0] sm:$0xf] }
 0x128   : > { %v8508_v44 = vpop.f32.mrf.mxu1  ;;  %v9635_v35 = vcombine.low %v8143_v48, %v8147_v38  ;;  %v5763_v10 = vcombine.low %v8366_v43, %v8383_v17  ;;  %v5764_v41 = vcombine.low %v8418_v58, %v8451_v36  ;;  %v5750_v18 = vrot.slane %v5734_v54, 9 }
 0x129   : > { %v8521_v26 = vpop.f32.mrf.mxu0  ;;  %v4414_v14 = vrot.slane %v8404_v4, 5  ;;  %v9636_v48 = vcombine.low %v8226_v6, %v8230_v22  ;;  %v9637_v38 = vsel %vm6739_vm4, %v8385_v29, %v8344_v39  ;;  %v8558_v61 = vcombine.low %v3788_v9, %v3798_v27  ;;  %v5735_v29 = vld [vmem:[%s6695_s9 + $0x90] sm:$0xe]  ;;  %v9644_v4 = vld [vmem:[#allocation5_spill] sm:$0xff] }
 0x12a   : > { %v8523_v8 = vpop.f32.mrf.mxu1  ;;  %v8556_v46 = vcombine.low %v9637_v38, %v3774_v37  ;;  %v8564_v60 = vcombine.low %v3812_v15, %v3822_v45  ;;  %v3836_v6 = vsel %vm6739_vm4, %v3831_v62, %v8459_v2  ;;  %v3846_v22 = vsel %vm6739_vm4, %v3841_v49, %v3845_v3 }
 0x12b   : > { %v6102_v56 = vpop.f32.mrf.mxu0  ;;  %6305 = vmatmul.mubr.msk.bf16.vlgmr.msra.gmra.mxu0 %vm676_vm3, %v9635_v35  ;;  %v3854_v39 = vor.u32 %v3853_v34, %v3850_v16  ;;  %v3864_v9 = vor.u32 %v3863_v11, %v8530_v51  ;;  %v3867_v27 = vshll.u32 %v8542_v13, 16  ;;  %v3872_v54 = vshrl.u32 %v5677_v30, 16 }
 0x12c   : > { %v8545_v55 = vpop.f32.mrf.mxu1  ;;  %6308 = vmatprep.mubr.msk.bf16.mxu0 %vm676_vm3, %v9636_v48  ;;  %v3875_v15 = vshll.u32 %v5677_v30, 16  ;;  %v8584_v3 = vsel %vm7025_vm7, %v5750_v18, %v4414_v14  ;;  %v4416_v62 = vrot.slane %v4414_v14, 4  ;;  %v4417_v49 = vrot.slane %v8456_v32, 5 }
 0x12d   : > { %v1480_v33 = vpop.f32.mrf.mxu0  ;;  %v5751_v16 = vrot.slane %v5735_v29, 9  ;;  %v4421_v34 = vrot.slane %v8470_v59, 5  ;;  %v3881_v11 = vshll.u32 %v8573_v24, 16  ;;  %v3885_v35 = vshrl.u32 %v8573_v24, 16 }
 0x12e   : > { %v6068_v37 = vpop.f32.mrf.mxu1  ;;  %6271 = vmatmul.mubr.msk.bf16.vlgmr.msra.gmra.mxu1 %vm676_vm3, %v8175_v57  ;;  %v8593_v48 = vcombine.low %v3836_v6, %v3846_v22  ;;  %v8595_v18 = vrot.slane %v3854_v39, 4  ;;  %v3865_v32 = vrot.slane %v3864_v9, 4  ;;  %v3869_v38 = vrot.slane %v3867_v27, 5  ;;  %v5680_v22 = vld [vmem:[%s6695_s9 + $0xa8] sm:$0xf] }
 0x12f   : > { %v1064_v45 = vadd.f32 %v6068_v37, %v8071_v5  ;;  %v6103_v2 = vpop.f32.mrf.mxu0  ;;  %6274 = vmatprep.mubr.msk.bf16.mxu1 %vm676_vm3, %v8322_v23  ;;  %v3874_v29 = vrot.slane %v3872_v54, 4  ;;  %v3877_v59 = vrot.slane %v3875_v15, 5  ;;  %v4424_v6 = vrot.slane %v8542_v13, 5  ;;  %v8621_v27 = vld [vmem:[%s6695_s9 + $0xac] sm:$0xf] }
 0x130   : > { %v1055_v57 = vpop.f32.mrf.mxu1  ;;  %v3887_v9 = vrot.slane %v3885_v35, 4  ;;  %v9641_v35 = vld [vmem:[#allocation11_spill] sm:$0xff] }
 0x131   : > { %v8590_v5 = vadd.f32 %v6102_v56, %v1064_v45  ;;  %v1056_v23 = vadd.f32 %v1055_v57, %v8095_v20  ;;  %v1483_v30 = vpop.f32.mrf.mxu0  ;;  %v9638_v45 = vcombine.low %v8263_v63, %v8289_v52  ;;  %v8606_v20 = vsel %vm7025_vm7, %v4416_v62, %v4417_v49  ;;  %v5736_v62 = vld [vmem:[%s6695_s9 + $0x9c] sm:$0xe] }
 0x132   : > { %v6069_v14 = vpop.f32.mrf.mxu1  ;;  %v4423_v63 = vrot.slane %v4421_v34, 4  ;;  %v8618_v52 = vrot.slane %v3881_v11, 5  ;;  %v4428_v49 = vrot.slane %v8573_v24, 5  ;;  %v3905_v24 = vshll.u32 %v8621_v27, 16 }
 0x133   : > { %v8597_v37 = vadd.f32 %v1480_v33, %v1056_v23  ;;  %v1067_v40 = vadd.f32 %v6069_v14, %v8114_v53  ;;  %v6106_v56 = vpop.f32.mrf.mxu0  ;;  %6309 = vmatmul.mubr.msk.bf16.gmra.mxu0 %vm676_vm3, %v9638_v45  ;;  %v9639_v33 = vcombine.low %v8328_v21, %v8332_v1  ;;  %v8616_v53 = vsel %vm7025_vm7, %v5751_v16, %v4421_v34  ;;  %v5679_v1 = vld [vmem:[%s6695_s9 + $0xa4] sm:$0x1]  ;;  %v9640_v16 = vld [vmem:[#allocation14_spill] sm:$0xff] }
 0x134   : > { %v1058_v39 = vpop.f32.mrf.mxu1  ;;  %v3860_v21 = vsel %vm6739_vm4, %v8595_v18, %v8530_v51  ;;  %v3896_v34 = vshrl.u32 %v5680_v22, 16  ;;  %v9642_v51 = vld [vmem:[#allocation19_spill] sm:$0xff]  ;;  %v3909_v18 = vshrl.u32 %v8621_v27, 16 }
 0x135   : > { %6312 = vmatprep.mubr.msk.bf16.mxu0 %vm676_vm3, %v9639_v33  ;;  %v8623_v54 = vadd.f32 %v6103_v2, %v1067_v40  ;;  %v1059_v13 = vadd.f32 %v1058_v39, %v8159_v12  ;;  %v1496_v15 = vpop.f32.mrf.mxu0  ;;  %v3870_v40 = vsel %vm6739_vm4, %v3865_v32, %v3869_v38  ;;  %v3878_v2 = vor.u32 %v3877_v59, %v3874_v29  ;;  %v9643_v59 = vld [vmem:[#allocation15_spill] sm:$0xff] }
 0x136   : > { %v6072_v57 = vpop.f32.mrf.mxu1  ;;  %6275 = vmatmul.mubr.msk.bf16.gmra.mxu1 %vm676_vm3, %v9640_v16  ;;  %v3899_v12 = vshll.u32 %v5680_v22, 16  ;;  %v8646_v39 = vsel %vm7025_vm7, %v4423_v63, %v4424_v6  ;;  %v3888_v32 = vor.u32 %v3887_v9, %v8618_v52  ;;  %v3891_v38 = vshll.u32 %v5679_v1, 16 }
 0x137   : > { %v8637_v11 = vadd.f32 %v1483_v30, %v1059_v13  ;;  %v1080_v23 = vadd.f32 %v6072_v57, %v9641_v35  ;;  %v6107_v14 = vpop.f32.mrf.mxu0  ;;  %6278 = vmatprep.mubr.msk.bf16.mxu1 %vm676_vm3, %v9642_v51  ;;  %v5752_v30 = vrot.slane %v5736_v62, 9  ;;  %v4430_v13 = vrot.slane %v4428_v49, 4 }
 0x138   : > { %v1071_v45 = vpop.f32.mrf.mxu1  ;;  %v4431_v57 = vrot.slane %v5679_v1, 5  ;;  %v8654_v51 = vrot.slane %v3878_v2, 4  ;;  %v3898_v6 = vrot.slane %v3896_v34, 4  ;;  %v3901_v63 = vrot.slane %v3899_v12, 5  ;;  %v8664_v1 = vld [vmem:[%s6695_s9 + $0xb0] sm:$0x1] }
 0x139   : > { %v8649_v29 = vadd.f32 %v6106_v56, %v1080_v23  ;;  %v1072_v22 = vadd.f32 %v1071_v45, %v9643_v59  ;;  %v1499_v33 = vpop.f32.mrf.mxu0  ;;  %v8666_v23 = vrot.slane %v3905_v24, 5  ;;  %v3911_v2 = vrot.slane %v3909_v18, 4  ;;  %v9645_v12 = vld [vmem:[#allocation17_spill] sm:$0xff] }
 0x13a   : > { %v6073_v16 = vpop.f32.mrf.mxu1  ;;  %v8676_v43 = vrot.slane %v3888_v32, 4  ;;  %v8678_v17 = vrot.slane %v3891_v38, 5  ;;  %v8686_v58 = vsel %vm7025_vm7, %v5752_v30, %v4428_v49  ;;  %v8690_v36 = vsel %vm7025_vm7, %v4430_v13, %v4431_v57  ;;  %v8702_v30 = vld [vmem:[%s6695_s9 + $0xb8] sm:$0xf] }
 0x13b   : > { %v8656_v9 = vadd.f32 %v1496_v15, %v1072_v22  ;;  %v1083_v62 = vadd.f32 %v6073_v16, %v9644_v4  ;;  %v6110_v56 = vpop.f32.mrf.mxu0  ;;  %6313 = vmatmul.mubr.msk.bf16.gmra.mxu0 %vm676_vm3, %v5763_v10  ;;  %v8672_v15 = vcombine.low %v3860_v21, %v3870_v40  ;;  %v5737_v10 = vld [vmem:[%s6695_s9 + $0xa8] sm:$0xe]  ;;  %v3902_v32 = vor.u32 %v3901_v63, %v3898_v6  ;;  %v9647_v22 = vld [vmem:[#allocation12_spill] sm:$0xff] }
 0x13c   : > { %v1074_v45 = vpop.f32.mrf.mxu1  ;;  %6316 = vmatprep.mubr.msk.bf16.mxu0 %vm676_vm3, %v5764_v41  ;;  %v5683_v41 = vld [vmem:[%s6695_s9 + $0xb4] sm:$0xf]  ;;  %v9646_v40 = vld [vmem:[#allocation22_spill] sm:$0xff]  ;;  %v3915_v38 = vshll.u32 %v8664_v1, 16  ;;  %v4435_v49 = vrot.slane %v8621_v27, 5  ;;  %v3912_v16 = vor.u32 %v3911_v2, %v8666_v23  ;;  %v3894_v27 = vsel %vm6739_vm4, %v8676_v43, %v8678_v17 }
 0x13d   : > { %v8681_v34 = vadd.f32 %v6107_v14, %v1083_v62  ;;  %v1075_v24 = vadd.f32 %v1074_v45, %v9645_v12  ;;  %v1512_v18 = vpop.f32.mrf.mxu0  ;;  %v5753_v62 = vrot.slane %v5737_v10, 9  ;;  %v3920_v6 = vshrl.u32 %v5683_v41, 16 }
 0x13e   : > { %v6076_v21 = vpop.f32.mrf.mxu1  ;;  %6279 = vmatmul.mubr.msk.bf16.gmra.mxu1 %vm676_vm3, %v9646_v40  ;;  %v3923_v63 = vshll.u32 %v5683_v41, 16  ;;  %v3929_v2 = vshll.u32 %v8702_v30, 16  ;;  %v3933_v10 = vshrl.u32 %v8702_v30, 16  ;;  %v5686_v40 = vld [vmem:[%s6695_s9 + $0xc0] sm:$0xf]  ;;  %v3903_v4 = vrot.slane %v3902_v32, 4 }
 0x13f   : > { %v8704_v59 = vadd.f32 %v1499_v33, %v1075_v24  ;;  %v1096_v13 = vadd.f32 %v6076_v21, %v9647_v22  ;;  %v6111_v57 = vpop.f32.mrf.mxu0  ;;  %6282 = vmatprep.mubr.msk.bf16.mxu1 %vm676_vm3, %v8556_v46  ;;  %v9649_v24 = vld [vmem:[#allocation21_spill] sm:$0xff]  ;;  %v3917_v43 = vrot.slane %v3915_v38, 5  ;;  %v4437_v17 = vrot.slane %v4435_v49, 4 }
 0x140   : > { %v1087_v45 = vpop.f32.mrf.mxu1  ;;  %v4438_v33 = vrot.slane %v8664_v1, 5  ;;  %v8732_v14 = vsel %vm7025_vm7, %v5753_v62, %v4435_v49  ;;  %v8735_v32 = vld [vmem:[%s6695_s9 + $0xc4] sm:$0xf]  ;;  %v9653_v1 = vcombine.low %v8514_v25, %v8518_v50  ;;  %v8747_v62 = vrot.slane %v3929_v2, 5 }
 0x141   : > { %v8716_v12 = vadd.f32 %v6110_v56, %v1096_v13  ;;  %v1088_v21 = vadd.f32 %v1087_v45, %v9649_v24  ;;  %v1515_v46 = vpop.f32.mrf.mxu0  ;;  %v9651_v56 = vld [vmem:[#allocation24_spill] sm:$0xff]  ;;  %v9652_v45 = vcombine.low %v8502_v47, %v8506_v7  ;;  %v3913_v24 = vrot.slane %v3912_v16, 4  ;;  %v9654_v16 = vld [vmem:[#allocation26_spill] sm:$0xff] }
 0x142   : > { %v6077_v22 = vpop.f32.mrf.mxu1  ;;  %v3944_v47 = vshrl.u32 %v5686_v40, 16  ;;  %v3947_v7 = vshll.u32 %v5686_v40, 16  ;;  %v3908_v25 = vsel %vm6739_vm4, %v3903_v4, %v8666_v23  ;;  %v8756_v50 = vsel %vm7025_vm7, %v4437_v17, %v4438_v33  ;;  %v5738_v40 = vld [vmem:[%s6695_s9 + $0xb4] sm:$0xe] }
 0x143   : > { %9648 = vst [vmem:[#allocation14_spill] sm:$0xff] %v8716_v12  ;;  %v8723_v35 = vadd.f32 %v1512_v18, %v1088_v21  ;;  %v1099_v41 = vadd.f32 %v6077_v22, %v9651_v56  ;;  %v6114_v13 = vpop.f32.mrf.mxu0  ;;  %6317 = vmatmul.mubr.msk.bf16.gmra.mxu0 %vm676_vm3, %v9652_v45  ;;  %v8742_v18 = vld [vmem:[%s6695_s9 + $0xbc] sm:$0x1]  ;;  %v3922_v21 = vrot.slane %v3920_v6, 4  ;;  %v3925_v22 = vrot.slane %v3923_v63, 5 }
 0x144   : > { %v1090_v38 = vpop.f32.mrf.mxu1  ;;  %6320 = vmatprep.mubr.msk.bf16.mxu0 %vm676_vm3, %v9653_v1  ;;  %v3957_v6 = vshrl.u32 %v8735_v32, 16  ;;  %v3939_v23 = vshll.u32 %v8742_v18, 16  ;;  %v4442_v17 = vrot.slane %v8702_v30, 5  ;;  %v9655_v1 = vld [vmem:[#allocation28_spill] sm:$0xff] }
 0x145   : > { %9650 = vst [vmem:[#allocation11_spill] sm:$0xff] %v8723_v35  ;;  %v8744_v56 = vadd.f32 %v6111_v57, %v1099_v41  ;;  %v1091_v45 = vadd.f32 %v1090_v38, %v9654_v16  ;;  %v1528_v49 = vpop.f32.mrf.mxu0  ;;  %v3935_v35 = vrot.slane %v3933_v10, 4  ;;  %v3953_v57 = vshll.u32 %v8735_v32, 16 }
 0x146   : > { %v6080_v12 = vpop.f32.mrf.mxu1  ;;  %6283 = vmatmul.mubr.msk.bf16.gmra.mxu1 %vm676_vm3, %v8558_v61  ;;  %v3918_v61 = vsel %vm6739_vm4, %v3913_v24, %v3917_v43  ;;  %v3926_v33 = vor.u32 %v3925_v22, %v3922_v21  ;;  %v3946_v41 = vrot.slane %v3944_v47, 4  ;;  %v3949_v38 = vrot.slane %v3947_v7, 5 }
 0x147   : > { %v8760_v63 = vadd.f32 %v1515_v46, %v1091_v45  ;;  %v1112_v2 = vadd.f32 %v6080_v12, %v8466_v28  ;;  %v6115_v10 = vpop.f32.mrf.mxu0  ;;  %6286 = vmatprep.mubr.msk.bf16.mxu1 %vm676_vm3, %v8564_v60  ;;  %v9656_v60 = vsel %vm6739_vm4, %v8654_v51, %v8618_v52  ;;  %v3936_v24 = vor.u32 %v3935_v35, %v8747_v62 }
 0x148   : > { %v1103_v4 = vpop.f32.mrf.mxu1  ;;  %v8778_v43 = vcombine.low %v9656_v60, %v3894_v27  ;;  %v8781_v30 = vcombine.low %v3908_v25, %v3918_v61  ;;  %v8785_v22 = vrot.slane %v3953_v57, 5  ;;  %v3959_v47 = vrot.slane %v3957_v6, 4  ;;  %v5688_v27 = vld [vmem:[%s6695_s9 + $0xc8] sm:$0x1] }
 0x149   : > { %v8770_v46 = vadd.f32 %v6114_v13, %v1112_v2  ;;  %v1104_v28 = vadd.f32 %v1103_v4, %v9655_v1  ;;  %v1531_v12 = vpop.f32.mrf.mxu0  ;;  %v5770_v13 = vcombine.low %v8732_v14, %v8756_v50  ;;  %v9657_v52 = vcombine.low %v8584_v3, %v8606_v20  ;;  %v5689_v14 = vld [vmem:[%s6695_s9 + $0xcc] sm:$0xf]  ;;  %v8806_v20 = vld [vmem:[%s6695_s9 + $0xd0] sm:$0xf]  ;;  %v5739_v4 = vld [vmem:[%s6695_s9 + $0xc0] sm:$0xe] }
 0x14a   : > { %v6081_v21 = vpop.f32.mrf.mxu1  ;;  %v8794_v35 = vrot.slane %v3939_v23, 5  ;;  %v5754_v51 = vrot.slane %v5738_v40, 9  ;;  %v9658_v50 = vcombine.low %v8616_v53, %v8646_v39  ;;  %v4445_v57 = vrot.slane %v8742_v18, 5 }
 0x14b   : > { %v8787_v7 = vadd.f32 %v1528_v49, %v1104_v28  ;;  %v1115_v16 = vadd.f32 %v6081_v21, %v8489_v19  ;;  %v6118_v45 = vpop.f32.mrf.mxu0  ;;  %6321 = vmatmul.mubr.msk.bf16.gmra.mxu0 %vm676_vm3, %v9657_v52  ;;  %v8802_v49 = vrot.slane %v3926_v33, 4  ;;  %v4444_v19 = vrot.slane %v4442_v17, 4 }
 0x14c   : > { %v1106_v25 = vpop.f32.mrf.mxu1  ;;  %6324 = vmatprep.mubr.msk.bf16.mxu0 %vm676_vm3, %v9658_v50  ;;  %v3950_v3 = vor.u32 %v3949_v38, %v3946_v41  ;;  %v8811_v23 = vrot.slane %v3936_v24, 4  ;;  %v4449_v53 = vrot.slane %v8735_v32, 5  ;;  %v3960_v33 = vor.u32 %v3959_v47, %v8785_v22 }
 0x14d   : > { %v8808_v6 = vadd.f32 %v6115_v10, %v1115_v16  ;;  %v1107_v2 = vadd.f32 %v1106_v25, %v8521_v26  ;;  %v1544_v61 = vpop.f32.mrf.mxu0  ;;  %v3963_v18 = vshll.u32 %v5688_v27, 16  ;;  %v3968_v40 = vshrl.u32 %v5689_v14, 16  ;;  %v9661_v10 = vld [vmem:[#allocation7_spill] sm:$0xff]  ;;  %v9662_v16 = vld [vmem:[#allocation6_spill] sm:$0xff] }
 0x14e   : > { %v6084_v39 = vpop.f32.mrf.mxu1  ;;  %6287 = vmatmul.mubr.msk.bf16.gmra.mxu1 %vm676_vm3, %v8593_v48  ;;  %v3971_v41 = vshll.u32 %v5689_v14, 16  ;;  %v3977_v28 = vshll.u32 %v8806_v20, 16  ;;  %v3981_v32 = vshrl.u32 %v8806_v20, 16  ;;  %v4443_v48 = vsel %vm7025_vm7, %v5754_v51, %v4442_v17  ;;  %v9663_v17 = vld [vmem:[#allocation9_spill] sm:$0xff] }
 0x14f   : > { %9659 = vst [vmem:[#allocation19_spill] sm:$0xff] %v8808_v6  ;;  %v8818_v38 = vadd.f32 %v1531_v12, %v1107_v2  ;;  %v1128_v1 = vadd.f32 %v6084_v39, %v9661_v10  ;;  %v6119_v26 = vpop.f32.mrf.mxu0  ;;  %6290 = vmatprep.mubr.msk.bf16.mxu1 %vm676_vm3, %v8672_v15  ;;  %v4446_v24 = vsel %vm7025_vm7, %v4444_v19, %v4445_v57  ;;  %v3951_v21 = vrot.slane %v3950_v3, 4 }
 0x150   : > { %v1119_v60 = vpop.f32.mrf.mxu1  ;;  %v5755_v12 = vrot.slane %v5739_v4, 9  ;;  %v4451_v25 = vrot.slane %v4449_v53, 4  ;;  %v4452_v15 = vrot.slane %v5688_v27, 5  ;;  %v3961_v2 = vrot.slane %v3960_v33, 4  ;;  %v5691_v33 = vld [vmem:[%s6695_s9 + $0xd4] sm:$0x1] }
 0x151   : > { %9660 = vst [vmem:[#allocation15_spill] sm:$0xff] %v8818_v38  ;;  %v8829_v47 = vadd.f32 %v6118_v45, %v1128_v1  ;;  %v1120_v52 = vadd.f32 %v1119_v60, %v9662_v16  ;;  %v1547_v14 = vpop.f32.mrf.mxu0  ;;  %v3965_v39 = vrot.slane %v3963_v18, 5  ;;  %v3970_v10 = vrot.slane %v3968_v40, 4  ;;  %v9665_v18 = vld [vmem:[#allocation8_spill] sm:$0xff] }
 0x152   : > { %v6085_v50 = vpop.f32.mrf.mxu1  ;;  %v3973_v38 = vrot.slane %v3971_v41, 5  ;;  %v9664_v45 = vcombine.low %v8686_v58, %v8690_v36  ;;  %v8839_v57 = vrot.slane %v3977_v28, 5  ;;  %v3983_v27 = vrot.slane %v3981_v32, 4 }
 0x153   : > { %v8832_v6 = vadd.f32 %v1544_v61, %v1120_v52  ;;  %v1131_v51 = vadd.f32 %v6085_v50, %v9663_v17  ;;  %v6122_v19 = vpop.f32.mrf.mxu0  ;;  %v3932_v61 = vsel %vm6739_vm4, %v8802_v49, %v8747_v62  ;;  %v3942_v4 = vsel %vm6739_vm4, %v8811_v23, %v8794_v35  ;;  %v5740_v62 = vld [vmem:[%s6695_s9 + $0xcc] sm:$0xe]  ;;  %s9298_s9 = scalar_lea.vmem [#allocation2], %s9273_s8 }
 0x154   : > { %6325 = vmatmul.mubr.msk.bf16.gmra.mxu0 %vm676_vm3, %v9664_v45  ;;  %v1122_v3 = vpop.f32.mrf.mxu1  ;;  %v4456_v58 = vrot.slane %v8806_v20, 5  ;;  %v4453_v1 = vsel %vm7025_vm7, %v4451_v25, %v4452_v15  ;;  %v5771_v35 = vcombine.low %v4443_v48, %v4446_v24  ;;  %v3956_v20 = vsel %vm6739_vm4, %v3951_v21, %v8785_v22  ;;  %v9667_v25 = vld [vmem:[#allocation13_spill] sm:$0xff]  ;;  %s5164_s11 = sshll.u32 %s9298_s9, 4  ;;  %s9429_s11 = int_to_ptr.vmem [resolvable:$true] %s5164_s11 }
 0x155   : > { %6328 = vmatprep.mubr.msk.bf16.mxu0 %vm676_vm3, %v5770_v13  ;;  %v8852_v36 = vadd.f32 %v6119_v26, %v1131_v51  ;;  %v1123_v40 = vadd.f32 %v1122_v3, %v9665_v18  ;;  %v1560_v41 = vpop.f32.mrf.mxu0  ;;  %v4450_v13 = vsel %vm7025_vm7, %v5755_v12, %v4449_v53  ;;  %v3966_v23 = vsel %vm6739_vm4, %v3961_v2, %v3965_v39  ;;  %v9666_v53 = vld [vmem:[#allocation10_spill] sm:$0xff]  ;;  %s6520_s23 = scalar_lea.vmem %s9429_s11, 2048  ;;  %p6527_p1 = scmp.lt.s32.totalorder %s9429_s11, %s6525_s27 }
 0x156   : > { %v6088_v49 = vpop.f32.mrf.mxu1  ;;  %6291 = vmatmul.mubr.msk.bf16.gmra.mxu1 %vm676_vm3, %v8778_v43  ;;  %v3974_v26 = vor.u32 %v3973_v38, %v3970_v10  ;;  %v3984_v12 = vor.u32 %v3983_v27, %v8839_v57  ;;  %v3987_v43 = vshll.u32 %v5691_v33, 16  ;;  %v5772_v24 = vcombine.low %v4450_v13, %v4453_v1  ;;  %p6521_p12 = scmp.ne.s32.totalorder %s9429_s11, %s6520_s23  ;;  %p6528_p2 = scmp.lt.s32.totalorder %s6526_s28, %s6520_s23 }
 0x157   : > { %v8867_v28 = vadd.f32 %v1547_v14, %v1123_v40  ;;  %v1144_v32 = vadd.f32 %v6088_v49, %v9666_v53  ;;  %v6123_v60 = vpop.f32.mrf.mxu0  ;;  %6294 = vmatprep.mubr.msk.bf16.mxu1 %vm676_vm3, %v8781_v30  ;;  %v5756_v16 = vrot.slane %v5740_v62, 9  ;;  %v4458_v52 = vrot.slane %v4456_v58, 4  ;;  %v9668_v30 = vld [vmem:[#allocation16_spill] sm:$0xff] }
 0x158   : > { %v1135_v48 = vpop.f32.mrf.mxu1  ;;  %v4459_v22 = vrot.slane %v5691_v33, 5  ;;  %v5706_v50 = vcombine.low %v3932_v61, %v3942_v4  ;;  %v5707_v2 = vcombine.low %v3956_v20, %v3966_v23  ;;  %v3975_v39 = vrot.slane %v3974_v26, 4  ;;  %v9669_v33 = vld [vmem:[#allocation18_spill] sm:$0xff]  ;;  %v9670_v62 = vld [vmem:[#allocation20_spill] sm:$0xff]  ;;  %v9671_v26 = vld [vmem:[#allocation23_spill] sm:$0xff]  ;;  %p6522_p13 = pnand %p6521_p12, %p6661_p4  ;;  %p6529_p3 = por %p6528_p2, %p6527_p1 }
 0x159   : > { %v8873_v21 = vadd.f32 %v6122_v19, %v1144_v32  ;;  %v1136_v38 = vadd.f32 %v1135_v48, %v9667_v25  ;;  %v1563_v14 = vpop.f32.mrf.mxu0  ;;  %v3985_v45 = vrot.slane %v3984_v12, 4  ;;  %v3989_v27 = vrot.slane %v3987_v43, 5  ;;  %v9672_v43 = vld [vmem:[#allocation25_spill] sm:$0xff] }
 0x15a   : > { %v6089_v15 = vpop.f32.mrf.mxu1  ;;  %v4457_v19 = vsel %vm7025_vm7, %v5756_v16, %v4456_v58  ;;  %v4460_v61 = vsel %vm7025_vm7, %v4458_v52, %v4459_v22  ;;  %v3980_v13 = vsel %vm6739_vm4, %v3975_v39, %v8839_v57  ;;  %p6523_p0 = pneg %p6522_p13 }
 0x15b   : > { %v8876_v10 = vadd.f32 %v1560_v41, %v1136_v38  ;;  %v1147_v17 = vadd.f32 %v6089_v15, %v9668_v30  ;;  %v6126_v51 = vpop.f32.mrf.mxu0  ;;  %v3990_v0 = vsel %vm6739_vm4, %v3985_v45, %v3989_v27 }
 0x15c   : > { %6329 = vmatmul.mubr.msk.bf16.gmra.mxu0 %vm676_vm3, %v5771_v35  ;;  %v1138_v3 = vpop.f32.mrf.mxu1  ;;  %v5773_v35 = vcombine.low %v4457_v19, %v4460_v61  ;;  %v5708_v12 = vcombine.low %v3980_v13, %v3990_v0  ;;  %p6530_p5 = pnand %p6529_p3, %p6523_p0 }
 0x15d   : > { %6332 = vmatprep.mubr.msk.bf16.mxu0 %vm676_vm3, %v5772_v24  ;;  %v8885_v4 = vadd.f32 %v6123_v60, %v1147_v17  ;;  %v1139_v18 = vadd.f32 %v1138_v3, %v9669_v33  ;;  %v1576_v40 = vpop.f32.mrf.mxu0 }
 0x15e   : > { %v6092_v41 = vpop.f32.mrf.mxu1  ;;  %6295 = vmatmul.mubr.msk.bf16.gmra.mxu1 %vm676_vm3, %v5706_v50 }
 0x15f   : > { %v8892_v1 = vadd.f32 %v1563_v14, %v1139_v18  ;;  %v1160_v49 = vadd.f32 %v6092_v41, %v9670_v62  ;;  %v6127_v58 = vpop.f32.mrf.mxu0  ;;  %6298 = vmatprep.mubr.msk.bf16.mxu1 %vm676_vm3, %v5707_v2 }
 0x160   : > { %v1151_v20 = vpop.f32.mrf.mxu1 }
 0x161   : > { %v8898_v23 = vadd.f32 %v6126_v51, %v1160_v49  ;;  %v1152_v53 = vadd.f32 %v1151_v20, %v9671_v26  ;;  %v1579_v32 = vpop.f32.mrf.mxu0 }
 0x162   : > { %v6093_v60 = vpop.f32.mrf.mxu1 }
 0x163   : > { %v8901_v57 = vadd.f32 %v1576_v40, %v1152_v53  ;;  %v1163_v48 = vadd.f32 %v6093_v60, %v9672_v43  ;;  %v6130_v24 = vpop.f32.mrf.mxu0 }
 0x164   : > { %6333 = vmatmul.mubr.msk.bf16.gmra.mxu0 %vm676_vm3, %v5773_v35  ;;  %v1154_v16 = vpop.f32.mrf.mxu1 }
 0x165   : > { %v8905_v52 = vadd.f32 %v6127_v58, %v1163_v48  ;;  %v1155_v22 = vadd.f32 %v1154_v16, %v9673_v31  ;;  %v1592_v25 = vpop.f32.mrf.mxu0 }
 0x166   : > { %v6096_v38 = vpop.f32.mrf.mxu1  ;;  %6299 = vmatmul.mubr.msk.bf16.gmra.mxu1 %vm676_vm3, %v5708_v12 }
 0x167   : > { %v8909_v14 = vadd.f32 %v1579_v32, %v1155_v22  ;;  %v1176_v15 = vadd.f32 %v6096_v38, %v8481_v42  ;;  %v6131_v50 = vpop.f32.mrf.mxu0 }
 0x168   : > { %v1167_v2 = vpop.f32.mrf.mxu1 }
 0x169   : > { %v8912_v39 = vadd.f32 %v6130_v24, %v1176_v15  ;;  %v1168_v30 = vadd.f32 %v1167_v2, %v8508_v44  ;;  %v1595_v17 = vpop.f32.mrf.mxu0 }
 0x16a   : > { %v6097_v51 = vpop.f32.mrf.mxu1 }
 0x16b   : > { %v8915_v45 = vadd.f32 %v1592_v25, %v1168_v30  ;;  %v1179_v27 = vadd.f32 %v6097_v51, %v8523_v8  ;;  %v6170_v3 = vpop.f32.mrf.mxu0  ;;  %v9674_v30 = vld [vmem:[#allocation14_spill] sm:$0xff] }
 0x16c   : > { %v1170_v19 = vpop.f32.mrf.mxu1 }
 0x16d   : > { %v8918_v61 = vadd.f32 %v6131_v50, %v1179_v27  ;;  %v1171_v33 = vadd.f32 %v1170_v19, %v8545_v55  ;;  %v2568_v18 = vpop.f32.mrf.mxu0 }
 0x16e   : > { %v6136_v42 = vpop.f32.mrf.mxu1 }
 0x16f   : > { %v8921_v40 = vadd.f32 %v1595_v17, %v1171_v33  ;;  %v1971_v41 = vadd.f32 %v6136_v42, %v8590_v5  ;;  %v6171_v13 = vpop.f32.mrf.mxu0 }
 0x170   : > { %v1842_v44 = vpop.f32.mrf.mxu1 }
 0x171   : > { %v8924_v62 = vadd.f32 %v6170_v3, %v1971_v41  ;;  %v1969_v49 = vadd.f32 %v1842_v44, %v8597_v37  ;;  %v2571_v58 = vpop.f32.mrf.mxu0  ;;  %v9675_v3 = vld [vmem:[#allocation11_spill] sm:$0xff] }
 0x172   : > { %v6137_v8 = vpop.f32.mrf.mxu1 }
 0x173   : > { %v8927_v0 = vadd.f32 %v2568_v18, %v1969_v49  ;;  %v1972_v35 = vadd.f32 %v6137_v8, %v8623_v54  ;;  %v6174_v20 = vpop.f32.mrf.mxu0 }
 0x174   : > { %v1845_v55 = vpop.f32.mrf.mxu1 }
 0x175   : > { %v8930_v26 = vadd.f32 %v6171_v13, %v1972_v35  ;;  %v1970_v53 = vadd.f32 %v1845_v55, %v8637_v11  ;;  %v2584_v32 = vpop.f32.mrf.mxu0 }
 0x176   : > { %v6140_v5 = vpop.f32.mrf.mxu1 }
 0x177   : > { %v8933_v60 = vadd.f32 %v2571_v58, %v1970_v53  ;;  %v1975_v12 = vadd.f32 %v6140_v5, %v8649_v29  ;;  %v6175_v43 = vpop.f32.mrf.mxu0 }
 0x178   : > { %v1858_v37 = vpop.f32.mrf.mxu1 }
 0x179   : > { %v8936_v48 = vadd.f32 %v6174_v20, %v1975_v12  ;;  %v1973_v24 = vadd.f32 %v1858_v37, %v8656_v9  ;;  %v2587_v16 = vpop.f32.mrf.mxu0 }
 0x17a   : > { %v6141_v54 = vpop.f32.mrf.mxu1 }
 0x17b   : > { %v8939_v31 = vadd.f32 %v2584_v32, %v1973_v24  ;;  %v1976_v22 = vadd.f32 %v6141_v54, %v8681_v34  ;;  %v6178_v25 = vpop.f32.mrf.mxu0  ;;  %v9677_v54 = vld [vmem:[#allocation15_spill] sm:$0xff] }
 0x17c   : > { %v1861_v11 = vpop.f32.mrf.mxu1 }
 0x17d   : > { %v8942_v38 = vadd.f32 %v6175_v43, %v1976_v22  ;;  %v1974_v15 = vadd.f32 %v1861_v11, %v8704_v59  ;;  %v2600_v50 = vpop.f32.mrf.mxu0  ;;  %v9676_v43 = vld [vmem:[#allocation19_spill] sm:$0xff] }
 0x17e   : > { %v6144_v29 = vpop.f32.mrf.mxu1 }
 0x17f   : > { %v8945_v2 = vadd.f32 %v2587_v16, %v1974_v15  ;;  %v1979_v17 = vadd.f32 %v6144_v29, %v9674_v30  ;;  %v6179_v51 = vpop.f32.mrf.mxu0 }
 0x180   : > { %v1874_v9 = vpop.f32.mrf.mxu1 }
 0x181   : > { %v8948_v27 = vadd.f32 %v6178_v25, %v1979_v17  ;;  %v1977_v19 = vadd.f32 %v1874_v9, %v9675_v3  ;;  %v2603_v33 = vpop.f32.mrf.mxu0 }
 0x182   : > { %v6145_v34 = vpop.f32.mrf.mxu1 }
 0x183   : > { %v8951_v18 = vadd.f32 %v2600_v50, %v1977_v19  ;;  %v1980_v42 = vadd.f32 %v6145_v34, %v8744_v56  ;;  %v6182_v41 = vpop.f32.mrf.mxu0 }
 0x184   : > { %v1877_v59 = vpop.f32.mrf.mxu1 }
 0x185   : > { %v8954_v13 = vadd.f32 %v6179_v51, %v1980_v42  ;;  %v1978_v44 = vadd.f32 %v1877_v59, %v8760_v63  ;;  %v2616_v49 = vpop.f32.mrf.mxu0 }
 0x186   : > { %v6148_v58 = vpop.f32.mrf.mxu1 }
 0x187   : > { %v8957_v8 = vadd.f32 %v2603_v33, %v1978_v44  ;;  %v1983_v35 = vadd.f32 %v6148_v58, %v8770_v46  ;;  %v6183_v20 = vpop.f32.mrf.mxu0 }
 0x188   : > { %v1890_v55 = vpop.f32.mrf.mxu1 }
 0x189   : > { %v8960_v53 = vadd.f32 %v6182_v41, %v1983_v35  ;;  %v1981_v32 = vadd.f32 %v1890_v55, %v8787_v7  ;;  %v2619_v5 = vpop.f32.mrf.mxu0 }
 0x18a   : > { %v6149_v56 = vpop.f32.mrf.mxu1 }
 0x18b   : > { %v8963_v12 = vadd.f32 %v2616_v49, %v1981_v32  ;;  %v1984_v37 = vadd.f32 %v6149_v56, %v9676_v43  ;;  %v6186_v24 = vpop.f32.mrf.mxu0 }
 0x18c   : > { %v1893_v63 = vpop.f32.mrf.mxu1 }
 0x18d   : > { %v8966_v16 = vadd.f32 %v6183_v20, %v1984_v37  ;;  %v1982_v22 = vadd.f32 %v1893_v63, %v9677_v54  ;;  %v2632_v25 = vpop.f32.mrf.mxu0 }
 0x18e   : > { %v6152_v46 = vpop.f32.mrf.mxu1 }
 0x18f   : > { %v8969_v11 = vadd.f32 %v2619_v5, %v1982_v22  ;;  %v1987_v15 = vadd.f32 %v6152_v46, %v8829_v47  ;;  %v6187_v50 = vpop.f32.mrf.mxu0 }
 0x190   : > { %v1906_v7 = vpop.f32.mrf.mxu1 }
 0x191   : > { %v8972_v29 = vadd.f32 %v6186_v24, %v1987_v15  ;;  %v1985_v30 = vadd.f32 %v1906_v7, %v8832_v6  ;;  %v2635_v17 = vpop.f32.mrf.mxu0 }
 0x192   : > { %v6153_v51 = vpop.f32.mrf.mxu1 }
 0x193   : > { %v8975_v9 = vadd.f32 %v2632_v25, %v1985_v30  ;;  %v1988_v3 = vadd.f32 %v6153_v51, %v8852_v36  ;;  %v6190_v19 = vpop.f32.mrf.mxu0 }
 0x194   : > { %v1909_v33 = vpop.f32.mrf.mxu1 }
 0x195   : > { %v8978_v34 = vadd.f32 %v6187_v50, %v1988_v3  ;;  %v1986_v42 = vadd.f32 %v1909_v33, %v8867_v28  ;;  %v2648_v41 = vpop.f32.mrf.mxu0 }
 0x196   : > { %v6156_v47 = vpop.f32.mrf.mxu1 }
 0x197   : > { %v8981_v59 = vadd.f32 %v2635_v17, %v1986_v42  ;;  %v1991_v44 = vadd.f32 %v6156_v47, %v8873_v21  ;;  %v6191_v49 = vpop.f32.mrf.mxu0 }
 0x198   : > { %v1922_v6 = vpop.f32.mrf.mxu1 }
 0x199   : > { %v8984_v58 = vadd.f32 %v6190_v19, %v1991_v44  ;;  %v1989_v35 = vadd.f32 %v1922_v6, %v8876_v10  ;;  %v2651_v20 = vpop.f32.mrf.mxu0 }
 0x19a   : > { %v6157_v36 = vpop.f32.mrf.mxu1 }
 0x19b   : > { %v8987_v55 = vadd.f32 %v2648_v41, %v1989_v35  ;;  %v1992_v32 = vadd.f32 %v6157_v36, %v8885_v4  ;;  %v6194_v5 = vpop.f32.mrf.mxu0 }
 0x19c   : > { %v1925_v28 = vpop.f32.mrf.mxu1 }
 0x19d   : > { %v8990_v56 = vadd.f32 %v6191_v49, %v1992_v32  ;;  %v1990_v43 = vadd.f32 %v1925_v28, %v8892_v1  ;;  %v2664_v37 = vpop.f32.mrf.mxu0 }
 0x19e   : > { %v6160_v21 = vpop.f32.mrf.mxu1 }
 0x19f   : > { %v8993_v24 = vadd.f32 %v2651_v20, %v1990_v43  ;;  %v1995_v63 = vadd.f32 %v6160_v21, %v8898_v23  ;;  %v6195_v54 = vpop.f32.mrf.mxu0 }
 0x1a0   : > { %v1938_v10 = vpop.f32.mrf.mxu1 }
 0x1a1   : > { %v8996_v22 = vadd.f32 %v6194_v5, %v1995_v63  ;;  %v1993_v25 = vadd.f32 %v1938_v10, %v8901_v57  ;;  %v2667_v46 = vpop.f32.mrf.mxu0 }
 0x1a2   : > { %v6161_v4 = vpop.f32.mrf.mxu1 }
 0x1a3   : > { %v8999_v15 = vadd.f32 %v2664_v37, %v1993_v25  ;;  %v1996_v50 = vadd.f32 %v6161_v4, %v8905_v52  ;;  %v6198_v7 = vpop.f32.mrf.mxu0 }
 0x1a4   : > { %v1941_v1 = vpop.f32.mrf.mxu1 }
 0x1a5   : > { %v9002_v30 = vadd.f32 %v6195_v54, %v1996_v50  ;;  %v1994_v17 = vadd.f32 %v1941_v1, %v8909_v14  ;;  %v2680_v51 = vpop.f32.mrf.mxu0 }
 0x1a6   : > { %v6164_v23 = vpop.f32.mrf.mxu1 }
 0x1a7   : > { %v9005_v3 = vadd.f32 %v2667_v46, %v1994_v17  ;;  %v1999_v19 = vadd.f32 %v6164_v23, %v8912_v39  ;;  %v6199_v33 = vpop.f32.mrf.mxu0 }
 0x1a8   : > { %v1954_v57 = vpop.f32.mrf.mxu1 }
 0x1a9   : > { %9678 = vst [vmem:[#allocation5_spill] sm:$0xff] %v9005_v3  ;;  %v9008_v42 = vadd.f32 %v6198_v7, %v1999_v19  ;;  %v1997_v41 = vadd.f32 %v1954_v57, %v8915_v45  ;;  %v2683_v47 = vpop.f32.mrf.mxu0 }
 0x1aa   : > { %v6165_v52 = vpop.f32.mrf.mxu1 }
 0x1ab   : > { %v9011_v44 = vadd.f32 %v2680_v51, %v1997_v41  ;;  %v2000_v49 = vadd.f32 %v6165_v52, %v8918_v61  ;;  %v6238_v6 = vpop.f32.mrf.mxu0 }
 0x1ac   : > { %v1957_v14 = vpop.f32.mrf.mxu1 }
 0x1ad   : > { %v9014_v35 = vadd.f32 %v6199_v33, %v2000_v49  ;;  %v1998_v20 = vadd.f32 %v1957_v14, %v8921_v40  ;;  %v3400_v36 = vpop.f32.mrf.mxu0 }
 0x1ae   : > { %v6204_v39 = vpop.f32.mrf.mxu1 }
 0x1af   : > { %v9017_v32 = vadd.f32 %v2683_v47, %v1998_v20  ;;  %v3167_v5 = vadd.f32 %v6204_v39, %v8924_v62  ;;  %v9020_v28 = vpop.f32.mrf.mxu0 }
 0x1b0   : > { %v3038_v45 = vpop.f32.mrf.mxu1 }
 0x1b1   : > { %v9022_v43 = vadd.f32 %v6238_v6, %v3167_v5  ;;  %v3165_v37 = vadd.f32 %v3038_v45, %v8927_v0  ;;  %v9025_v61 = vpop.f32.mrf.mxu0 }
 0x1b2   : > { %v9027_v21 = vpop.f32.mrf.mxu1 }
 0x1b3   : > { %v9029_v63 = vadd.f32 %v3400_v36, %v3165_v37  ;;  %v6242_v40 = vpop.f32.mrf.mxu0 }
 0x1b4   : > { %v9031_v54 = vpop.f32.mrf.mxu1 }
 0x1b5   : > { %v3416_v10 = vpop.f32.mrf.mxu0 }
 0x1b6   : > { %v6208_v25 = vpop.f32.mrf.mxu1 }
 0x1b7   : > { %v3171_v62 = vadd.f32 %v6208_v25, %v8936_v48  ;;  %v9034_v46 = vpop.f32.mrf.mxu0 }
 0x1b8   : > { %v3054_v4 = vpop.f32.mrf.mxu1 }
 0x1b9   : > { %v9036_v50 = vadd.f32 %v6242_v40, %v3171_v62  ;;  %v3169_v0 = vadd.f32 %v3054_v4, %v8939_v31  ;;  %v9039_v7 = vpop.f32.mrf.mxu0 }
 0x1ba   : > { %v9041_v1 = vpop.f32.mrf.mxu1 }
 0x1bb   : > { %v9043_v17 = vadd.f32 %v3416_v10, %v3169_v0  ;;  %v6246_v51 = vpop.f32.mrf.mxu0 }
 0x1bc   : > { %v9045_v23 = vpop.f32.mrf.mxu1 }
 0x1bd   : > { %v3432_v19 = vpop.f32.mrf.mxu0 }
 0x1be   : > { %v6212_v33 = vpop.f32.mrf.mxu1 }
 0x1bf   : > { %v3175_v48 = vadd.f32 %v6212_v33, %v8948_v27  ;;  %v9048_v57 = vpop.f32.mrf.mxu0 }
 0x1c0   : > { %v3070_v41 = vpop.f32.mrf.mxu1 }
 0x1c1   : > { %v9050_v47 = vadd.f32 %v6246_v51, %v3175_v48  ;;  %v3173_v31 = vadd.f32 %v3070_v41, %v8951_v18  ;;  %v9053_v52 = vpop.f32.mrf.mxu0 }
 0x1c2   : > { %v9055_v49 = vpop.f32.mrf.mxu1 }
 0x1c3   : > { %v9057_v6 = vadd.f32 %v3432_v19, %v3173_v31  ;;  %v6250_v14 = vpop.f32.mrf.mxu0 }
 0x1c4   : > { %v9059_v20 = vpop.f32.mrf.mxu1 }
 0x1c5   : > { %v3448_v36 = vpop.f32.mrf.mxu0 }
 0x1c6   : > { %v6216_v39 = vpop.f32.mrf.mxu1 }
 0x1c7   : > { %v3179_v27 = vadd.f32 %v6216_v39, %v8960_v53  ;;  %v9062_v5 = vpop.f32.mrf.mxu0 }
 0x1c8   : > { %v3086_v45 = vpop.f32.mrf.mxu1 }
 0x1c9   : > { %v9064_v37 = vadd.f32 %v6250_v14, %v3179_v27  ;;  %v3177_v18 = vadd.f32 %v3086_v45, %v8963_v12  ;;  %v9067_v40 = vpop.f32.mrf.mxu0 }
 0x1ca   : > { %v9069_v10 = vpop.f32.mrf.mxu1 }
 0x1cb   : > { %v9071_v25 = vadd.f32 %v3448_v36, %v3177_v18  ;;  %v6254_v62 = vpop.f32.mrf.mxu0 }
 0x1cc   : > { %v9073_v4 = vpop.f32.mrf.mxu1 }
 0x1cd   : > { %v3464_v0 = vpop.f32.mrf.mxu0 }
 0x1ce   : > { %v6220_v51 = vpop.f32.mrf.mxu1 }
 0x1cf   : > { %v3183_v53 = vadd.f32 %v6220_v51, %v8972_v29  ;;  %v9076_v19 = vpop.f32.mrf.mxu0 }
 0x1d0   : > { %v3102_v33 = vpop.f32.mrf.mxu1 }
 0x1d1   : > { %v9078_v48 = vadd.f32 %v6254_v62, %v3183_v53  ;;  %v3181_v12 = vadd.f32 %v3102_v33, %v8975_v9  ;;  %v3467_v41 = vpop.f32.mrf.mxu0 }
 0x1d2   : > { %v9081_v31 = vpop.f32.mrf.mxu1 }
 0x1d3   : > { %v9083_v14 = vadd.f32 %v3464_v0, %v3181_v12  ;;  %v6258_v36 = vpop.f32.mrf.mxu0 }
 0x1d4   : > { %v3105_v39 = vpop.f32.mrf.mxu1 }
 0x1d5   : > { %v3182_v27 = vadd.f32 %v3105_v39, %v8981_v59  ;;  %v3480_v45 = vpop.f32.mrf.mxu0 }
 0x1d6   : > { %v6224_v18 = vpop.f32.mrf.mxu1 }
 0x1d7   : > { %v9086_v3 = vadd.f32 %v3467_v41, %v3182_v27  ;;  %v3187_v29 = vadd.f32 %v6224_v18, %v8984_v58  ;;  %v9089_v51 = vpop.f32.mrf.mxu0 }
 0x1d8   : > { %9680 = vst [vmem:[#allocation22_spill] sm:$0xff] %v9089_v51  ;;  %v3118_v62 = vpop.f32.mrf.mxu1 }
 0x1d9   : > { %9679 = vst [vmem:[#allocation17_spill] sm:$0xff] %v9086_v3  ;;  %v9091_v53 = vadd.f32 %v6258_v36, %v3187_v29  ;;  %v3185_v9 = vadd.f32 %v3118_v62, %v8987_v55  ;;  %v9094_v33 = vpop.f32.mrf.mxu0 }
 0x1da   : > { %9682 = vst [vmem:[#allocation21_spill] sm:$0xff] %v9094_v33  ;;  %v9096_v0 = vpop.f32.mrf.mxu1 }
 0x1db   : > { %9681 = vst [vmem:[#allocation12_spill] sm:$0xff] %v9091_v53  ;;  %v9098_v12 = vadd.f32 %v3480_v45, %v3185_v9  ;;  %v6262_v59 = vpop.f32.mrf.mxu0 }
 0x1dc   : > { %v9100_v39 = vpop.f32.mrf.mxu1 }
 0x1dd   : > { %9683 = vst [vmem:[#allocation24_spill] sm:$0xff] %v9098_v12  ;;  %v3496_v41 = vpop.f32.mrf.mxu0 }
 0x1de   : > { %v6228_v27 = vpop.f32.mrf.mxu1 }
 0x1df   : > { %v3191_v58 = vadd.f32 %v6228_v27, %v8996_v22  ;;  %v9103_v18 = vpop.f32.mrf.mxu0 }
 0x1e0   : > { %9684 = vst [vmem:[#allocation26_spill] sm:$0xff] %v9103_v18  ;;  %v3134_v51 = vpop.f32.mrf.mxu1 }
 0x1e1   : > { %v9105_v36 = vadd.f32 %v6262_v59, %v3191_v58  ;;  %v3189_v55 = vadd.f32 %v3134_v51, %v8999_v15  ;;  %v9108_v29 = vpop.f32.mrf.mxu0 }
 0x1e2   : > { %9686 = vst [vmem:[#allocation7_spill] sm:$0xff] %v9108_v29  ;;  %v9110_v62 = vpop.f32.mrf.mxu1 }
 0x1e3   : > { %9685 = vst [vmem:[#allocation28_spill] sm:$0xff] %v9105_v36  ;;  %v9112_v45 = vadd.f32 %v3496_v41, %v3189_v55  ;;  %v6266_v9 = vpop.f32.mrf.mxu0  ;;  %v3168_v36 = vadd.f32 %v9027_v21, %v8930_v26 }
 0x1e4   : > { %v9114_v33 = vpop.f32.mrf.mxu1 }
 0x1e5   : > { %9687 = vst [vmem:[#allocation6_spill] sm:$0xff] %v9112_v45  ;;  %v3512_v12 = vpop.f32.mrf.mxu0 }
 0x1e6   : > { %v6232_v53 = vpop.f32.mrf.mxu1 }
 0x1e7   : > { %v3195_v22 = vadd.f32 %v6232_v53, %v9008_v42  ;;  %v6267_v27 = vpop.f32.mrf.mxu0 }
 0x1e8   : > { %v3150_v18 = vpop.f32.mrf.mxu1 }
 0x1e9   : > { %v9117_v3 = vadd.f32 %v6266_v9, %v3195_v22  ;;  %v3193_v59 = vadd.f32 %v3150_v18, %v9011_v44  ;;  %v3515_v15 = vpop.f32.mrf.mxu0  ;;  %v3166_v44 = vadd.f32 %v9031_v54, %v8933_v60  ;;  %v9139_v60 = vld [vmem:[%s9484_s2] ss:$0 sm:$0xff] }
 0x1ea   : > { %v6233_v51 = vpop.f32.mrf.mxu1 }
 0x1eb   : > { %v9120_v58 = vadd.f32 %v3512_v12, %v3193_v59  ;;  %v3196_v41 = vadd.f32 %v6233_v51, %v9014_v35  ;;  %v6306_v55 = vpop.f32.mrf.mxu0  ;;  %v3530_v59 = vadd.f32 %v9020_v28, %v3168_v36  ;;  %v3172_v28 = vadd.f32 %v9041_v1, %v8942_v38 }
 0x1ec   : > { %v3153_v45 = vpop.f32.mrf.mxu1 }
 0x1ed   : > { %v9125_v29 = vadd.f32 %v6267_v27, %v3196_v41  ;;  %v3194_v42 = vadd.f32 %v3153_v45, %v9017_v32  ;;  %v4596_v53 = vpop.f32.mrf.mxu0  ;;  %v3528_v27 = vadd.f32 %v9025_v61, %v3166_v44  ;;  %v3170_v61 = vadd.f32 %v9045_v23, %v8945_v2 }
 0x1ee   : > { %v6272_v9 = vpop.f32.mrf.mxu1 }
 0x1ef   : > { %v9130_v18 = vadd.f32 %v3515_v15, %v3194_v42  ;;  %v4255_v12 = vadd.f32 %v6272_v9, %v9022_v43  ;;  %v6307_v22 = vpop.f32.mrf.mxu0 }
 0x1f0   : > { %v4126_v35 = vpop.f32.mrf.mxu1 }
 0x1f1   : > { %v4253_v51 = vadd.f32 %v4126_v35, %v9029_v63  ;;  %v4599_v26 = vpop.f32.mrf.mxu0  ;;  %v4725_v32 = vadd.f32 %v6306_v55, %v4255_v12 }
 0x1f2   : > { %v6273_v21 = vpop.f32.mrf.mxu1 }
 0x1f3   : > { %v4256_v45 = vadd.f32 %v6273_v21, %v3530_v59  ;;  %v6310_v41 = vpop.f32.mrf.mxu0  ;;  %v4723_v43 = vadd.f32 %v4596_v53, %v4253_v51  ;;  %v9146_v36 = vadd.f32 %v9139_v60, %v4725_v32  ;;  %v3534_v59 = vadd.f32 %v9034_v46, %v3172_v28 }
 0x1f4   : > { %v4129_v54 = vpop.f32.mrf.mxu1  ;;  %v3176_v32 = vadd.f32 %v9055_v49, %v8954_v13 }
 0x1f5   : > { %v4726_v15 = vadd.f32 %v6307_v22, %v4256_v45  ;;  %v4254_v42 = vadd.f32 %v4129_v54, %v3528_v27  ;;  %v4612_v9 = vpop.f32.mrf.mxu0  ;;  %v9153_v35 = vadd.f32 %v9139_v60, %v4723_v43 }
 0x1f6   : > { %v6276_v63 = vpop.f32.mrf.mxu1 }
 0x1f7   : > { %v9149_v55 = vadd.f32 %v9139_v60, %v4726_v15  ;;  %v4724_v44 = vadd.f32 %v4599_v26, %v4254_v42  ;;  %v6311_v12 = vpop.f32.mrf.mxu0  ;;  %v4259_v53 = vadd.f32 %v6276_v63, %v9036_v50  ;;  %v3532_v26 = vadd.f32 %v9039_v7, %v3170_v61 }
 0x1f8   : > { %v4142_v22 = vpop.f32.mrf.mxu1  ;;  %v3174_v7 = vadd.f32 %v9059_v20, %v8957_v8 }
 0x1f9   : > { %v4795_v38 = vpack.c.bf16 %v9149_v55, %v9146_v36  ;;  %v9158_v1 = vadd.f32 %v9139_v60, %v4724_v44  ;;  %v4257_v2 = vadd.f32 %v4142_v22, %v9043_v17  ;;  %v4615_v23 = vpop.f32.mrf.mxu0  ;;  %v4729_v45 = vadd.f32 %v6310_v41, %v4259_v53 }
 0x1fa   : > { %v6277_v51 = vpop.f32.mrf.mxu1 }
 0x1fb   : > { %v5792_v21 = vmul.bf16 3216621497, %v4795_v38  ;;  %v4794_v50 = vpack.c.bf16 %v9158_v1, %v9153_v35  ;;  %v6314_v27 = vpop.f32.mrf.mxu0  ;;  %v4260_v54 = vadd.f32 %v6277_v51, %v3534_v59  ;;  %v4727_v17 = vadd.f32 %v4612_v9, %v4257_v2 }
 0x1fc   : > { %v4145_v43 = vpop.f32.mrf.mxu1  ;;  %v9171_v13 = vadd.f32 %v9139_v60, %v4729_v45  ;;  %v3538_v9 = vadd.f32 %v9048_v57, %v3176_v32  ;;  %v3536_v2 = vadd.f32 %v9053_v52, %v3174_v7 }
 0x1fd   : > { %6454 = vpow.bf16 %v5792_v21  ;;  %v5791_v15 = vmul.bf16 3216621497, %v4794_v50  ;;  %v4258_v42 = vadd.f32 %v4145_v43, %v3532_v26  ;;  %v4628_v63 = vpop.f32.mrf.mxu0  ;;  %v4730_v46 = vadd.f32 %v6311_v12, %v4260_v54 }
 0x1fe   : > { %v6280_v28 = vpop.f32.mrf.mxu1  ;;  %v9178_v12 = vadd.f32 %v9139_v60, %v4727_v17  ;;  %v3180_v43 = vadd.f32 %v9069_v10, %v8966_v16 }
 0x1ff   : > { %6456 = vpow.bf16 %v5791_v15  ;;  %v4728_v61 = vadd.f32 %v4615_v23, %v4258_v42  ;;  %v4263_v44 = vadd.f32 %v6280_v28, %v9050_v47  ;;  %v6315_v22 = vpop.f32.mrf.mxu0  ;;  %v9174_v49 = vadd.f32 %v9139_v60, %v4730_v46 }
 0x200   : > { %v4158_v41 = vpop.f32.mrf.mxu1  ;;  %v3178_v15 = vadd.f32 %v9073_v4, %v8969_v11 }
 0x201   : > { %v9181_v53 = vadd.f32 %v9139_v60, %v4728_v61  ;;  %v4261_v8 = vadd.f32 %v4158_v41, %v9057_v6  ;;  %v4631_v20 = vpop.f32.mrf.mxu0  ;;  %v4797_v47 = vpack.c.bf16 %v9174_v49, %v9171_v13  ;;  %v4733_v59 = vadd.f32 %v6314_v27, %v4263_v44 }
 0x202   : > { %v6281_v38 = vpop.f32.mrf.mxu1  ;;  %v3542_v61 = vadd.f32 %v9062_v5, %v3180_v43  ;;  %v3540_v41 = vadd.f32 %v9067_v40, %v3178_v15 }
 0x203   : > { %v4796_v23 = vpack.c.bf16 %v9181_v53, %v9178_v12  ;;  %v4264_v57 = vadd.f32 %v6281_v38, %v3538_v9  ;;  %v6318_v51 = vpop.f32.mrf.mxu0  ;;  %v5794_v26 = vmul.bf16 3216621497, %v4797_v47  ;;  %v4731_v32 = vadd.f32 %v4628_v63, %v4261_v8 }
 0x204   : > { %v4161_v21 = vpop.f32.mrf.mxu1  ;;  %v9194_v27 = vadd.f32 %v9139_v60, %v4733_v59 }
 0x205   : > { %v5793_v50 = vmul.bf16 3216621497, %v4796_v23  ;;  %v4734_v45 = vadd.f32 %v6315_v22, %v4264_v57  ;;  %v4262_v54 = vadd.f32 %v4161_v21, %v3536_v2  ;;  %v4644_v6 = vpop.f32.mrf.mxu0  ;;  %6458 = vpow.bf16 %v5794_v26 }
 0x206   : > { %v6284_v52 = vpop.f32.mrf.mxu1  ;;  %v9201_v7 = vadd.f32 %v9139_v60, %v4731_v32 }
 0x207   : > { %6460 = vpow.bf16 %v5793_v50  ;;  %v9197_v17 = vadd.f32 %v9139_v60, %v4734_v45  ;;  %v4732_v42 = vadd.f32 %v4631_v20, %v4262_v54  ;;  %v6319_v63 = vpop.f32.mrf.mxu0  ;;  %v4267_v46 = vadd.f32 %v6284_v52, %v9064_v37 }
 0x208   : > { %v4174_v28 = vpop.f32.mrf.mxu1  ;;  %v3184_v20 = vadd.f32 %v9081_v31, %v8978_v34 }
 0x209   : > { %v4799_v16 = vpack.c.bf16 %v9197_v17, %v9194_v27  ;;  %v9206_v11 = vadd.f32 %v9139_v60, %v4732_v42  ;;  %v4265_v10 = vadd.f32 %v4174_v28, %v9071_v25  ;;  %v4647_v4 = vpop.f32.mrf.mxu0  ;;  %v4737_v38 = vadd.f32 %v6318_v51, %v4267_v46 }
 0x20a   : > { %v6285_v44 = vpop.f32.mrf.mxu1 }
 0x20b   : > { %v6455_v22 = vpop.eup %6454  ;;  %v5796_v37 = vmul.bf16 3216621497, %v4799_v16  ;;  %v4798_v9 = vpack.c.bf16 %v9206_v11, %v9201_v7  ;;  %v6322_v8 = vpop.f32.mrf.mxu0  ;;  %v4268_v2 = vadd.f32 %v6285_v44, %v3542_v61  ;;  %v4735_v5 = vadd.f32 %v4644_v6, %v4265_v10 }
 0x20c   : > { %v4875_v47 = vadd.bf16 1065369472, %v6455_v22  ;;  %v4177_v23 = vpop.f32.mrf.mxu1  ;;  %v9217_v34 = vadd.f32 %v9139_v60, %v4737_v38  ;;  %v3546_v6 = vadd.f32 %v9076_v19, %v3184_v20  ;;  %v3186_v61 = vadd.f32 %v9100_v39, %v8993_v24 }
 0x20d   : > { %v6457_v25 = vpop.eup %6456  ;;  %6462 = vpow.bf16 %v5796_v37  ;;  %v5795_v59 = vmul.bf16 3216621497, %v4798_v9  ;;  %v4266_v57 = vadd.f32 %v4177_v23, %v3540_v41  ;;  %v4660_v26 = vpop.f32.mrf.mxu0  ;;  %v4738_v21 = vadd.f32 %v6319_v63, %v4268_v2  ;;  %v9688_v2 = vld [vmem:[#allocation17_spill] sm:$0xff] }
 0x20e   : > { %6464 = vrcp.bf16 %v4875_v47  ;;  %v4874_v40 = vadd.bf16 1065369472, %v6457_v25  ;;  %v6288_v50 = vpop.f32.mrf.mxu1  ;;  %v9224_v43 = vadd.f32 %v9139_v60, %v4735_v5  ;;  %v9691_v5 = vld [vmem:[#allocation5_spill] sm:$0xff] }
 0x20f   : > { %6466 = vpow.bf16 %v5795_v59  ;;  %v4736_v32 = vadd.f32 %v4647_v4, %v4266_v57  ;;  %v4271_v45 = vadd.f32 %v6288_v50, %v9078_v48  ;;  %v6323_v54 = vpop.f32.mrf.mxu0  ;;  %v9220_v31 = vadd.f32 %v9139_v60, %v4738_v21 }
 0x210   : > { %6468 = vrcp.bf16 %v4874_v40  ;;  %v4190_v51 = vpop.f32.mrf.mxu1  ;;  %v3188_v4 = vadd.f32 %v9096_v0, %v8990_v56  ;;  %v9689_v0 = vld [vmem:[#allocation12_spill] sm:$0xff]  ;;  %v3190_v57 = vadd.f32 %v9114_v33, %v9691_v5 }
 0x211   : > { %v9227_v15 = vadd.f32 %v9139_v60, %v4736_v32  ;;  %v4663_v52 = vpop.f32.mrf.mxu0  ;;  %v4801_v48 = vpack.c.bf16 %v9220_v31, %v9217_v34  ;;  %v4269_v42 = vadd.f32 %v4190_v51, %v9083_v14  ;;  %v4741_v28 = vadd.f32 %v6322_v8, %v4271_v45  ;;  %v9692_v32 = vld [vmem:[#allocation24_spill] sm:$0xff] }
 0x212   : > { %v6289_v63 = vpop.f32.mrf.mxu1  ;;  %v3192_v14 = vadd.f32 %v9110_v62, %v9002_v30  ;;  %v9690_v62 = vld [vmem:[#allocation22_spill] sm:$0xff] }
 0x213   : > { %v4800_v46 = vpack.c.bf16 %v9227_v15, %v9224_v43  ;;  %v4272_v16 = vadd.f32 %v6289_v63, %v3546_v6  ;;  %v6459_v19 = vpop.eup %6458  ;;  %v5798_v44 = vmul.bf16 3216621497, %v4801_v48  ;;  %v4739_v38 = vadd.f32 %v4660_v26, %v4269_v42  ;;  %v9694_v63 = vld [vmem:[#allocation26_spill] sm:$0xff] }
 0x214   : > { %v6326_v10 = vpop.f32.mrf.mxu0  ;;  %v4193_v22 = vpop.f32.mrf.mxu1  ;;  %v4877_v37 = vadd.bf16 1065369472, %v6459_v19  ;;  %v9242_v56 = vadd.f32 %v9139_v60, %v4741_v28  ;;  %v3550_v59 = vadd.f32 %v9690_v62, %v3188_v4  ;;  %v9695_v4 = vld [vmem:[#allocation7_spill] sm:$0xff] }
 0x215   : > { %v6461_v41 = vpop.eup %6460  ;;  %v5797_v9 = vmul.bf16 3216621497, %v4800_v46  ;;  %v4742_v20 = vadd.f32 %v6323_v54, %v4272_v16  ;;  %6470 = vpow.bf16 %v5798_v44  ;;  %v4270_v23 = vadd.f32 %v4193_v22, %v9688_v2 }
 0x216   : > { %v4676_v47 = vpop.f32.mrf.mxu0  ;;  %v4876_v8 = vadd.bf16 1065369472, %v6461_v41  ;;  %v6292_v25 = vpop.f32.mrf.mxu1  ;;  %6472 = vrcp.bf16 %v4877_v37  ;;  %v9255_v51 = vadd.f32 %v9139_v60, %v4739_v38  ;;  %v3554_v46 = vadd.f32 %v9694_v63, %v3192_v14 }
 0x217   : > { %v9245_v24 = vadd.f32 %v9139_v60, %v4742_v20  ;;  %v4275_v39 = vadd.f32 %v6292_v25, %v9689_v0  ;;  %v4740_v26 = vadd.f32 %v4663_v52, %v4270_v23  ;;  %v9693_v52 = vld [vmem:[#allocation21_spill] sm:$0xff]  ;;  %v9263_v44 = vadd.f32 %v9695_v4, %v3190_v57 }
 0x218   : > { %v6327_v30 = vpop.f32.mrf.mxu0  ;;  %6474 = vrcp.bf16 %v4876_v8  ;;  %v4206_v40 = vpop.f32.mrf.mxu1  ;;  %v3548_v42 = vadd.f32 %v9693_v52, %v3186_v61 }
 0x219   : > { %6476 = vpow.bf16 %v5797_v9  ;;  %v4803_v21 = vpack.c.bf16 %v9245_v24, %v9242_v56  ;;  %v4745_v50 = vadd.f32 %v6326_v10, %v4275_v39  ;;  %v4273_v45 = vadd.f32 %v4206_v40, %v9692_v32 }
 0x21a   : > { %v4679_v54 = vpop.f32.mrf.mxu0  ;;  %v9258_v6 = vadd.f32 %v9139_v60, %v4740_v26  ;;  %v6293_v33 = vpop.f32.mrf.mxu1  ;;  %v9696_v26 = vld [vmem:[#allocation28_spill] sm:$0xff] }
 0x21b   : > { %v6463_v48 = vpop.eup %6462  ;;  %v5800_v28 = vmul.bf16 3216621497, %v4803_v21  ;;  %v4276_v16 = vadd.f32 %v6293_v33, %v3550_v59  ;;  %v4743_v37 = vadd.f32 %v4676_v47, %v4273_v45  ;;  %v9269_v61 = vadd.f32 %v9139_v60, %v4745_v50 }
 0x21c   : > { %v6330_v19 = vpop.f32.mrf.mxu0  ;;  %v6465_v10 = vpop.eup %6464  ;;  %v4879_v22 = vadd.bf16 1065369472, %v6463_v48  ;;  %v4802_v41 = vpack.c.bf16 %v9258_v6, %v9255_v51 }
 0x21d   : > { %v4209_v9 = vpop.f32.mrf.mxu1  ;;  %v6467_v20 = vpop.eup %6466  ;;  %v4893_v8 = vmul.bf16 1065369472, %v6465_v10  ;;  %6478 = vpow.bf16 %v5800_v28  ;;  %v4746_v14 = vadd.f32 %v6327_v30, %v4276_v16  ;;  %v9279_v57 = vadd.f32 %v9139_v60, %v4743_v37  ;;  %v9697_v37 = vld [vmem:[#allocation6_spill] sm:$0xff] }
 0x21e   : > { %v4692_v38 = vpop.f32.mrf.mxu0  ;;  %v6469_v2 = vpop.eup %6468  ;;  %6480 = vrcp.bf16 %v4879_v22  ;;  %v4878_v23 = vadd.bf16 1065369472, %v6467_v20  ;;  %v5799_v25 = vmul.bf16 3216621497, %v4802_v41  ;;  %v4274_v0 = vadd.f32 %v4209_v9, %v3548_v42 }
 0x21f   : > { %v6296_v39 = vpop.f32.mrf.mxu1  ;;  %v4924_v62 = vunpack.c.l.bf16 %v4893_v8  ;;  %v4925_v47 = vunpack.c.h.bf16 %v4893_v8  ;;  %v4891_v59 = vmul.bf16 1065369472, %v6469_v2  ;;  %v9276_v5 = vadd.f32 %v9139_v60, %v4746_v14 }
 0x220   : > { %6482 = vrcp.bf16 %v4878_v23  ;;  %v4744_v30 = vadd.f32 %v4679_v54, %v4274_v0  ;;  %v4279_v40 = vadd.f32 %v6296_v39, %v9696_v26  ;;  %v6331_v48 = vpop.f32.mrf.mxu0 }
 0x221   : > { %v4222_v21 = vpop.f32.mrf.mxu1  ;;  %v4956_v50 = vmul.f32 %v4924_v62, %v9146_v36  ;;  %v4957_v32 = vmul.f32 %v4925_v47, %v9149_v55  ;;  %v4922_v45 = vunpack.c.l.bf16 %v4891_v59  ;;  %v4923_v33 = vunpack.c.h.bf16 %v4891_v59 }
 0x222   : > { %6484 = vpow.bf16 %v5799_v25  ;;  %v4805_v52 = vpack.c.bf16 %v9276_v5, %v9269_v61  ;;  %v9287_v42 = vadd.f32 %v9139_v60, %v4744_v30  ;;  %v4749_v63 = vadd.f32 %v6330_v19, %v4279_v40  ;;  %v4695_v2 = vpop.f32.mrf.mxu0 }
 0x223   : > { %v6297_v54 = vpop.f32.mrf.mxu1  ;;  %v5846_v28 = vpack.c.bf16 %v4956_v50, %v4956_v50  ;;  %v5847_v16 = vpack.c.bf16 %v4957_v32, %v4957_v32  ;;  %v4954_v10 = vmul.f32 %v4922_v45, %v9153_v35  ;;  %v4955_v36 = vmul.f32 %v4923_v33, %v9158_v1  ;;  %v6471_v55 = vpop.eup %6470 }
 0x224   : > { %v5802_v4 = vmul.bf16 3216621497, %v4805_v52  ;;  %v4804_v22 = vpack.c.bf16 %v9287_v42, %v9279_v57  ;;  %v9294_v41 = vadd.f32 %v9139_v60, %v4749_v63  ;;  %v4277_v9 = vadd.f32 %v4222_v21, %v9697_v37  ;;  %v6473_v8 = vpop.eup %6472  ;;  %v6334_v33 = vpop.f32.mrf.mxu0 }
 0x225   : > { %v4225_v20 = vpop.f32.mrf.mxu1  ;;  %5117 = vst.msk [vmem:[%s9298_s9 + $0x8] sm:$0xf] %vm5114_vm8, %v5846_v28  ;;  %5118 = vst.msk [vmem:[%s9298_s9 + $0xc] sm:$0xf] %vm5114_vm8, %v5847_v16  ;;  %v5844_v35 = vpack.c.bf16 %v4954_v10, %v4954_v10  ;;  %v5845_v1 = vpack.c.bf16 %v4955_v36, %v4955_v36  ;;  %v4881_v19 = vadd.bf16 1065369472, %v6471_v55  ;;  %v4280_v14 = vadd.f32 %v6297_v54, %v3554_v46 }
 0x226   : > { %v6475_v23 = vpop.eup %6474  ;;  %v4897_v25 = vmul.bf16 1065369472, %v6473_v8  ;;  %6486 = vpow.bf16 %v5802_v4  ;;  %v5801_v0 = vmul.bf16 3216621497, %v4804_v22  ;;  %v4747_v39 = vadd.f32 %v4692_v38, %v4277_v9 }
 0x227   : > { %v6300_v62 = vpop.f32.mrf.mxu1  ;;  %v6477_v47 = vpop.eup %6476  ;;  %5115 = vst.msk [vmem:[%s9298_s9] sm:$0xf] %vm5114_vm8, %v5844_v35  ;;  %5116 = vst.msk [vmem:[%s9298_s9 + $0x4] sm:$0xf] %vm5114_vm8, %v5845_v1  ;;  %v4895_v59 = vmul.bf16 1065369472, %v6475_v23  ;;  %6488 = vrcp.bf16 %v4881_v19  ;;  %v4750_v30 = vadd.f32 %v6331_v48, %v4280_v14  ;;  %v4278_v26 = vadd.f32 %v4225_v20, %v9263_v44 }
 0x228   : > { %v4928_v40 = vunpack.c.l.bf16 %v4897_v25  ;;  %v4929_v21 = vunpack.c.h.bf16 %v4897_v25  ;;  %v4880_v46 = vadd.bf16 1065369472, %v6477_v47  ;;  %6490 = vpow.bf16 %v5801_v0 }
 0x229   : > { %v4926_v50 = vunpack.c.l.bf16 %v4895_v59  ;;  %v4927_v32 = vunpack.c.h.bf16 %v4895_v59  ;;  %v9310_v45 = vadd.f32 %v9139_v60, %v4747_v39  ;;  %v9313_v38 = vadd.f32 %v9139_v60, %v4750_v30  ;;  %v4238_v52 = vpop.f32.mrf.mxu1 }
 0x22a   : > { %v4960_v63 = vmul.f32 %v4928_v40, %v9171_v13  ;;  %v4961_v48 = vmul.f32 %v4929_v21, %v9174_v49  ;;  %6492 = vrcp.bf16 %v4880_v46  ;;  %v4748_v44 = vadd.f32 %v4695_v2, %v4278_v26 }
 0x22b   : > { %v6479_v54 = vpop.eup %6478  ;;  %v4958_v28 = vmul.f32 %v4926_v50, %v9178_v12  ;;  %v4959_v16 = vmul.f32 %v4927_v32, %v9181_v53  ;;  %v4807_v10 = vpack.c.bf16 %v9313_v38, %v9294_v41  ;;  %v4283_v36 = vadd.f32 %v6300_v62, %v9117_v3  ;;  %v4708_v53 = vpop.f32.mrf.mxu0 }
 0x22c   : > { %v6481_v55 = vpop.eup %6480  ;;  %v5850_v4 = vpack.c.bf16 %v4960_v63, %v4960_v63  ;;  %v5851_v13 = vpack.c.bf16 %v4961_v48, %v4961_v48  ;;  %v4883_v49 = vadd.bf16 1065369472, %v6479_v54  ;;  %v9323_v22 = vadd.f32 %v9139_v60, %v4748_v44  ;;  %v6301_v8 = vpop.f32.mrf.mxu1 }
 0x22d   : > { %v5848_v37 = vpack.c.bf16 %v4958_v28, %v4958_v28  ;;  %v5849_v12 = vpack.c.bf16 %v4959_v16, %v4959_v16  ;;  %v4901_v9 = vmul.bf16 1065369472, %v6481_v55  ;;  %v5804_v20 = vmul.bf16 3216621497, %v4807_v10 }
 0x22e   : > { %v6483_v35 = vpop.eup %6482  ;;  %5121 = vst.msk [vmem:[%s9298_s9 + $0x18] sm:$0xf] %vm5114_vm8, %v5850_v4  ;;  %5122 = vst.msk [vmem:[%s9298_s9 + $0x1c] sm:$0xf] %vm5114_vm8, %v5851_v13  ;;  %6494 = vrcp.bf16 %v4883_v49  ;;  %v4806_v3 = vpack.c.bf16 %v9323_v22, %v9310_v45  ;;  %v4281_v1 = vadd.f32 %v4238_v52, %v9120_v58  ;;  %v4753_v0 = vadd.f32 %v6334_v33, %v4283_v36  ;;  %v6335_v58 = vpop.f32.mrf.mxu0 }
 0x22f   : > { %5119 = vst.msk [vmem:[%s9298_s9 + $0x10] sm:$0xf] %vm5114_vm8, %v5848_v37  ;;  %5120 = vst.msk [vmem:[%s9298_s9 + $0x14] sm:$0xf] %vm5114_vm8, %v5849_v12  ;;  %v4932_v19 = vunpack.c.l.bf16 %v4901_v9  ;;  %v4933_v14 = vunpack.c.h.bf16 %v4901_v9  ;;  %v4899_v2 = vmul.bf16 1065369472, %v6483_v35  ;;  %6496 = vpow.bf16 %v5804_v20  ;;  %v4241_v26 = vpop.f32.mrf.mxu1 }
 0x230   : > { %v6485_v23 = vpop.eup %6484  ;;  %v5803_v25 = vmul.bf16 3216621497, %v4806_v3  ;;  %v4284_v39 = vadd.f32 %v6301_v8, %v9125_v29  ;;  %v4751_v21 = vadd.f32 %v4708_v53, %v4281_v1  ;;  %v4282_v63 = vadd.f32 %v4241_v26, %v9130_v18  ;;  %v4711_v54 = vpop.f32.mrf.mxu0 }
 0x231   : > { %v4964_v62 = vmul.f32 %v4932_v19, %v9194_v27  ;;  %v4965_v47 = vmul.f32 %v4933_v14, %v9197_v17  ;;  %v4930_v59 = vunpack.c.l.bf16 %v4899_v2  ;;  %v4931_v30 = vunpack.c.h.bf16 %v4899_v2 }
 0x232   : > { %v4882_v40 = vadd.bf16 1065369472, %v6485_v23  ;;  %6498 = vpow.bf16 %v5803_v25  ;;  %v4754_v46 = vadd.f32 %v6335_v58, %v4284_v39  ;;  %v9342_v27 = vadd.f32 %v9139_v60, %v4753_v0 }
 0x233   : > { %v5854_v50 = vpack.c.bf16 %v4964_v62, %v4964_v62  ;;  %v5855_v32 = vpack.c.bf16 %v4965_v47, %v4965_v47  ;;  %v4962_v33 = vmul.f32 %v4930_v59, %v9201_v7  ;;  %v4963_v29 = vmul.f32 %v4931_v30, %v9206_v11 }
 0x234   : > { %v6487_v52 = vpop.eup %6486  ;;  %6500 = vrcp.bf16 %v4882_v40  ;;  %v9345_v17 = vadd.f32 %v9139_v60, %v4754_v46  ;;  %v4752_v36 = vadd.f32 %v4711_v54, %v4282_v63  ;;  %v9359_v55 = vadd.f32 %v9139_v60, %v4751_v21 }
 0x235   : > { %v6489_v48 = vpop.eup %6488  ;;  %5125 = vst.msk [vmem:[%s9298_s9 + $0x28] sm:$0xf] %vm5114_vm8, %v5854_v50  ;;  %5126 = vst.msk [vmem:[%s9298_s9 + $0x2c] sm:$0xf] %vm5114_vm8, %v5855_v32  ;;  %v5852_v7 = vpack.c.bf16 %v4962_v33, %v4962_v33  ;;  %v5853_v44 = vpack.c.bf16 %v4963_v29, %v4963_v29  ;;  %v4885_v11 = vadd.bf16 1065369472, %v6487_v52 }
 0x236   : > { %v6491_v28 = vpop.eup %6490  ;;  %v4905_v16 = vmul.bf16 1065369472, %v6489_v48  ;;  %v4809_v10 = vpack.c.bf16 %v9345_v17, %v9342_v27  ;;  %v9362_v12 = vadd.f32 %v9139_v60, %v4752_v36 }
 0x237   : > { %5123 = vst.msk [vmem:[%s9298_s9 + $0x20] sm:$0xf] %vm5114_vm8, %v5852_v7  ;;  %5124 = vst.msk [vmem:[%s9298_s9 + $0x24] sm:$0xf] %vm5114_vm8, %v5853_v44  ;;  %6502 = vrcp.bf16 %v4885_v11  ;;  %v4884_v18 = vadd.bf16 1065369472, %v6491_v28 }
 0x238   : > { %v6493_v4 = vpop.eup %6492  ;;  %v4936_v13 = vunpack.c.l.bf16 %v4905_v16  ;;  %v4937_v49 = vunpack.c.h.bf16 %v4905_v16  ;;  %v5806_v37 = vmul.bf16 3216621497, %v4809_v10  ;;  %v4808_v8 = vpack.c.bf16 %v9362_v12, %v9359_v55 }
 0x239   : > { %v4903_v9 = vmul.bf16 1065369472, %v6493_v4  ;;  %6504 = vrcp.bf16 %v4884_v18 }
 0x23a   : > { %v4968_v20 = vmul.f32 %v4936_v13, %v9217_v34  ;;  %v4969_v53 = vmul.f32 %v4937_v49, %v9220_v31  ;;  %6506 = vpow.bf16 %v5806_v37  ;;  %v5805_v60 = vmul.bf16 3216621497, %v4808_v8 }
 0x23b   : > { %v4934_v35 = vunpack.c.l.bf16 %v4903_v9  ;;  %v4935_v3 = vunpack.c.h.bf16 %v4903_v9 }
 0x23c   : > { %v6495_v1 = vpop.eup %6494  ;;  %v5858_v19 = vpack.c.bf16 %v4968_v20, %v4968_v20  ;;  %v5859_v14 = vpack.c.bf16 %v4969_v53, %v4969_v53  ;;  %6508 = vpow.bf16 %v5805_v60 }
 0x23d   : > { %v6497_v2 = vpop.eup %6496  ;;  %v4966_v23 = vmul.f32 %v4934_v35, %v9224_v43  ;;  %v4967_v25 = vmul.f32 %v4935_v3, %v9227_v15  ;;  %v4909_v34 = vmul.bf16 1065369472, %v6495_v1 }
 0x23e   : > { %5129 = vst.msk [vmem:[%s9298_s9 + $0x38] sm:$0xf] %vm5114_vm8, %v5858_v19  ;;  %5130 = vst.msk [vmem:[%s9298_s9 + $0x3c] sm:$0xf] %vm5114_vm8, %v5859_v14  ;;  %v4887_v31 = vadd.bf16 1065369472, %v6497_v2 }
 0x23f   : > { %v5856_v0 = vpack.c.bf16 %v4966_v23, %v4966_v23  ;;  %v5857_v39 = vpack.c.bf16 %v4967_v25, %v4967_v25  ;;  %v4940_v62 = vunpack.c.l.bf16 %v4909_v34  ;;  %v4941_v47 = vunpack.c.h.bf16 %v4909_v34 }
 0x240   : > { %v6499_v59 = vpop.eup %6498  ;;  %6510 = vrcp.bf16 %v4887_v31 }
 0x241   : > { %5127 = vst.msk [vmem:[%s9298_s9 + $0x30] sm:$0xf] %vm5114_vm8, %v5856_v0  ;;  %5128 = vst.msk [vmem:[%s9298_s9 + $0x34] sm:$0xf] %vm5114_vm8, %v5857_v39  ;;  %v4972_v43 = vmul.f32 %v4940_v62, %v9242_v56  ;;  %v4973_v15 = vmul.f32 %v4941_v47, %v9245_v24  ;;  %v4886_v30 = vadd.bf16 1065369472, %v6499_v59 }
 0x242   : > { %v6501_v58 = vpop.eup %6500 }
 0x243   : > { %v5862_v26 = vpack.c.bf16 %v4972_v43, %v4972_v43  ;;  %v5863_v40 = vpack.c.bf16 %v4973_v15, %v4973_v15  ;;  %v4907_v21 = vmul.bf16 1065369472, %v6501_v58  ;;  %6512 = vrcp.bf16 %v4886_v30 }
 0x245   : > { %v6503_v46 = vpop.eup %6502  ;;  %5133 = vst.msk [vmem:[%s9298_s9 + $0x48] sm:$0xf] %vm5114_vm8, %v5862_v26  ;;  %5134 = vst.msk [vmem:[%s9298_s9 + $0x4c] sm:$0xf] %vm5114_vm8, %v5863_v40  ;;  %v4938_v50 = vunpack.c.l.bf16 %v4907_v21  ;;  %v4939_v32 = vunpack.c.h.bf16 %v4907_v21 }
 0x246   : > { %v4913_v33 = vmul.bf16 1065369472, %v6503_v46 }
 0x247   : > { %v6505_v29 = vpop.eup %6504  ;;  %v4970_v56 = vmul.f32 %v4938_v50, %v9255_v51  ;;  %v4971_v24 = vmul.f32 %v4939_v32, %v9258_v6 }
 0x248   : > { %v6507_v52 = vpop.eup %6506  ;;  %v4944_v63 = vunpack.c.l.bf16 %v4913_v33  ;;  %v4945_v48 = vunpack.c.h.bf16 %v4913_v33  ;;  %v4911_v7 = vmul.bf16 1065369472, %v6505_v29 }
 0x249   : > { %v5860_v44 = vpack.c.bf16 %v4970_v56, %v4970_v56  ;;  %v5861_v11 = vpack.c.bf16 %v4971_v24, %v4971_v24  ;;  %v4889_v54 = vadd.bf16 1065369472, %v6507_v52 }
 0x24a   : > { %v4976_v28 = vmul.f32 %v4944_v63, %v9269_v61  ;;  %v4977_v16 = vmul.f32 %v4945_v48, %v9276_v5  ;;  %v4942_v10 = vunpack.c.l.bf16 %v4911_v7  ;;  %v4943_v36 = vunpack.c.h.bf16 %v4911_v7  ;;  %v6509_v51 = vpop.eup %6508 }
 0x24b   : > { %5131 = vst.msk [vmem:[%s9298_s9 + $0x40] sm:$0xf] %vm5114_vm8, %v5860_v44  ;;  %5132 = vst.msk [vmem:[%s9298_s9 + $0x44] sm:$0xf] %vm5114_vm8, %v5861_v11  ;;  %6514 = vrcp.bf16 %v4889_v54  ;;  %v4888_v49 = vadd.bf16 1065369472, %v6509_v51 }
 0x24c   : > { %v5866_v6 = vpack.c.bf16 %v4976_v28, %v4976_v28  ;;  %v5867_v18 = vpack.c.bf16 %v4977_v16, %v4977_v16  ;;  %v4974_v4 = vmul.f32 %v4942_v10, %v9279_v57  ;;  %v4975_v13 = vmul.f32 %v4943_v36, %v9287_v42 }
 0x24d   : > { %6516 = vrcp.bf16 %v4888_v49 }
 0x24e   : > { %v6511_v61 = vpop.eup %6510  ;;  %5137 = vst.msk [vmem:[%s9298_s9 + $0x58] sm:$0xf] %vm5114_vm8, %v5866_v6  ;;  %5138 = vst.msk [vmem:[%s9298_s9 + $0x5c] sm:$0xf] %vm5114_vm8, %v5867_v18  ;;  %v5864_v5 = vpack.c.bf16 %v4974_v4, %v4974_v4  ;;  %v5865_v37 = vpack.c.bf16 %v4975_v13, %v4975_v13 }
 0x24f   : > { %v4917_v9 = vmul.bf16 1065369472, %v6511_v61 }
 0x250   : > { %5135 = vst.msk [vmem:[%s9298_s9 + $0x50] sm:$0xf] %vm5114_vm8, %v5864_v5  ;;  %5136 = vst.msk [vmem:[%s9298_s9 + $0x54] sm:$0xf] %vm5114_vm8, %v5865_v37 }
 0x251   : > { %v6513_v20 = vpop.eup %6512  ;;  %v4948_v57 = vunpack.c.l.bf16 %v4917_v9  ;;  %v4949_v42 = vunpack.c.h.bf16 %v4917_v9 }
 0x252   : > { %v4915_v53 = vmul.bf16 1065369472, %v6513_v20 }
 0x253   : > { %v4980_v8 = vmul.f32 %v4948_v57, %v9294_v41  ;;  %v4981_v35 = vmul.f32 %v4949_v42, %v9313_v38 }
 0x254   : > { %v4946_v3 = vunpack.c.l.bf16 %v4915_v53  ;;  %v4947_v1 = vunpack.c.h.bf16 %v4915_v53 }
 0x255   : > { %v5870_v19 = vpack.c.bf16 %v4980_v8, %v4980_v8  ;;  %v5871_v14 = vpack.c.bf16 %v4981_v35, %v4981_v35 }
 0x256   : > { %v4978_v60 = vmul.f32 %v4946_v3, %v9310_v45  ;;  %v4979_v2 = vmul.f32 %v4947_v1, %v9323_v22 }
 0x257   : > { %5141 = vst.msk [vmem:[%s9298_s9 + $0x68] sm:$0xf] %vm5114_vm8, %v5870_v19  ;;  %5142 = vst.msk [vmem:[%s9298_s9 + $0x6c] sm:$0xf] %vm5114_vm8, %v5871_v14 }
 0x258   : > { %v5868_v23 = vpack.c.bf16 %v4978_v60, %v4978_v60  ;;  %v5869_v25 = vpack.c.bf16 %v4979_v2, %v4979_v2 }
 0x259   : > { %v6515_v34 = vpop.eup %6514 }
 0x25a   : > { %5139 = vst.msk [vmem:[%s9298_s9 + $0x60] sm:$0xf] %vm5114_vm8, %v5868_v23  ;;  %5140 = vst.msk [vmem:[%s9298_s9 + $0x64] sm:$0xf] %vm5114_vm8, %v5869_v25  ;;  %v4921_v41 = vmul.bf16 1065369472, %v6515_v34 }
 0x25b   : > { %v6517_v31 = vpop.eup %6516 }
 0x25c   : > { %v4952_v38 = vunpack.c.l.bf16 %v4921_v41  ;;  %v4953_v45 = vunpack.c.h.bf16 %v4921_v41  ;;  %v4919_v39 = vmul.bf16 1065369472, %v6517_v31 }
 0x25e   : > { %v4984_v22 = vmul.f32 %v4952_v38, %v9342_v27  ;;  %v4985_v0 = vmul.f32 %v4953_v45, %v9345_v17  ;;  %v4950_v59 = vunpack.c.l.bf16 %v4919_v39  ;;  %v4951_v43 = vunpack.c.h.bf16 %v4919_v39 }
 0x260   : > { %v5874_v62 = vpack.c.bf16 %v4984_v22, %v4984_v22  ;;  %v5875_v47 = vpack.c.bf16 %v4985_v0, %v4985_v0  ;;  %v4982_v15 = vmul.f32 %v4950_v59, %v9359_v55  ;;  %v4983_v27 = vmul.f32 %v4951_v43, %v9362_v12 }
 0x262   : > { %5145 = vst.msk [vmem:[%s9298_s9 + $0x78] sm:$0xf] %vm5114_vm8, %v5874_v62  ;;  %5146 = vst.msk [vmem:[%s9298_s9 + $0x7c] sm:$0xf] %vm5114_vm8, %v5875_v47  ;;  %v5872_v17 = vpack.c.bf16 %v4982_v15, %v4982_v15  ;;  %v5873_v30 = vpack.c.bf16 %v4983_v27, %v4983_v27 }
 0x264   : > { %5143 = vst.msk [vmem:[%s9298_s9 + $0x70] sm:$0xf] %vm5114_vm8, %v5872_v17  ;;  %5144 = vst.msk [vmem:[%s9298_s9 + $0x74] sm:$0xf] %vm5114_vm8, %v5873_v30 }
 0x265   : > { %6533 = shalt.err (!%p6530_p5)
}
 0x266   : > { %s6534_s29 = scalar_lea.hbm %s9427_s21, 2048  ;;  %s6538_s5 = scalar_lea.hbm %s9485_s3, 4096 }
 0x267   : > { %p6535_p6 = scmp.ne.s32.totalorder %s9427_s21, %s6534_s29  ;;  %p6539_p10 = scmp.lt.s32.totalorder %s9427_s21, %s9485_s3 }
 0x268   : > { %p6540_p11 = scmp.lt.s32.totalorder %s6538_s5, %s6534_s29 }
 0x269   : > { %p6536_p7 = pnand %p6535_p6, %p6661_p4 }
 0x26a   : > { %p6541_p12 = por %p6540_p11, %p6539_p10 }
 0x26b   : > { %p6537_p9 = pneg %p6536_p7 }
 0x26d   : > { %p6542_p13 = pnand %p6541_p12, %p6537_p9 }
 0x26f   : > { %6545 = shalt.err (!%p6542_p13)
}
 0x270   : > { %s6599_s8 = smov 64   ;;  %s6600_s9 = smov 4  }
 0x271   : > { %6349 = dma.vmem_to_hbm [thread:$0]  (%p6661_p4), %s9429_s11, 2048, %s9427_s21, %s9437_s15, %s6599_s8, %s6599_s8, %s6600_s9  }
 0x272 PF: > { %p6355_p0 = scmp.ge.s32.totalorder %s6596_s17, 2  ;;  %s5179_s10 = sand.u32 1, %s6576_s12  }
 0x273   : > { %s5180_s18 = scalar_lea.sflag [#allocation3], %s5179_s10 }
 0x274   : > { %p6352_p1 = pnand %p6355_p0, %p6668_p8 }
 0x276   : > { %p6353_p2 = pneg %p6352_p1 }
 0x278   : > { %6571 = dma.done.wait (%p6353_p2), %s5180_s18, 2048  }
 0x279   : > { %6573 = vsyncadd (%p6353_p2), %s5180_s18, 4294965248  ;;  %s16_s17 = sadd.s32 1, %s6596_s17   ;;  %s9698_s12 = smov %s6580_s13 }
 0x27a   : > { %p13_p3 = scmp.ge.s32.totalorder %s16_s17, 4   ;;  %s9699_s13 = smov %s6584_s14 }
 0x27b   : > { %s9700_s14 = smov %s6674_s25  ;;  %s9701_s15 = smov %s6592_s16 }
 0x27c   : > { %s9702_s16 = smov %s9704_s20  ;;  %15 = sbr.rel (!%p13_p3) target bundleno = 4 (0x4), region = 78 }
 0x281   :  { %5185 = vsyncpa [#allocation3], 1 }
 0x282   :  { %5187 = vsyncpa [#allocation3 + $0x1], 1 }

</bundles_post_ra>
